<compile_context>
chip_gen: v7x
topology: tpu7x:2x2x1
jax: 0.10.0
libtpu: 0.0.40
codegen_flags: <defaults>
</compile_context>

<pallas_src>
import functools

import numpy as np
import jax
import jax.numpy as jnp
from jax.experimental import pallas as pl
from jax.experimental.pallas import tpu as pltpu

EPS = 1e-5
_VMEM_LIMIT = 32 * 1024 * 1024


def _rup(c, m=128):
    return ((c + m - 1) // m) * m


# ----------------------------------------------------------------------------
# Pallas kernels
# ----------------------------------------------------------------------------
def _pw_kernel(x_ref, s_ref, t_ref, w_ref, o_ref):
    """o = relu(x*scale + shift) @ w   (bf16 MXU operands, f32 accumulate)."""
    act = jnp.maximum(x_ref[...].astype(jnp.float32) * s_ref[...] + t_ref[...], 0.0)
    y = jnp.dot(act.astype(w_ref.dtype), w_ref[...],
                preferred_element_type=jnp.float32)
    o_ref[...] = y.astype(o_ref.dtype)


def _pw_stats_kernel(x_ref, s_ref, t_ref, w_ref, o_ref, st_ref):
    """Same as _pw_kernel + fused per-tile (sum, sumsq) for the next BatchNorm."""
    act = jnp.maximum(x_ref[...].astype(jnp.float32) * s_ref[...] + t_ref[...], 0.0)
    y = jnp.dot(act.astype(w_ref.dtype), w_ref[...],
                preferred_element_type=jnp.float32)
    o_ref[...] = y.astype(o_ref.dtype)
    st_ref[0, 0:1, :] = jnp.sum(y, axis=0, keepdims=True)
    st_ref[0, 1:2, :] = jnp.sum(y * y, axis=0, keepdims=True)


def _pw_res_kernel(x_ref, s_ref, t_ref, w_ref, r_ref, o_ref):
    """Same as _pw_kernel with the residual add fused into the epilogue.

    The residual may be narrower than the lane-dense output; it is zero-extended
    in vregs (no padded HBM copy of the shortcut)."""
    act = jnp.maximum(x_ref[...].astype(jnp.float32) * s_ref[...] + t_ref[...], 0.0)
    y = jnp.dot(act.astype(w_ref.dtype), w_ref[...],
                preferred_element_type=jnp.float32)
    res = r_ref[...].astype(jnp.float32)
    if res.shape[1] < y.shape[1]:
        res = jnp.concatenate(
            [res, jnp.zeros((res.shape[0], y.shape[1] - res.shape[1]),
                            jnp.float32)], axis=1)
    o_ref[...] = (y + res).astype(o_ref.dtype)


def _conv3x3_kernel(x_ref, s_ref, t_ref, w_ref, o_ref, st_ref, pad_ref, acc_ref):
    """Fused BN+ReLU -> 3x3 conv (stride 1, pad 1), one batch element per step.

    x_ref  : (1, H, W, C) bf16 unpadded conv input
    s/t_ref: (1, C) f32 BN scale / shift
    w_ref  : (3, 3*C, N) bf16 taps; dy-indexed, K = dx*C + c
    o_ref  : (H*W, N) bf16 output rows
    st_ref : (1, 2, N) f32 per-batch (sum, sumsq) of the f32 output (for bn3)
    pad_ref: VMEM (H+2, W+2, C) f32 halo scratch
    acc_ref: VMEM (H*W, N) f32 accumulator
    """
    _, H, W, C = x_ref.shape
    f32 = jnp.float32

    # BN + ReLU prologue (f32); build the zero halo (conv pad=1) with concats
    # and park the padded activation in a VMEM scratch (no wrapper-side pad,
    # no full-plane iota/where masking).
    act = jnp.maximum(x_ref[0].astype(f32) * s_ref[0] + t_ref[0], 0.0)
    zr = jnp.zeros((1, W, C), f32)
    act = jnp.concatenate([zr, act, zr], axis=0)              # (H+2, W,   C)
    zc = jnp.zeros((H + 2, 1, C), f32)
    pad_ref[...] = jnp.concatenate([zc, act, zc], axis=1)     # (H+2, W+2, C)

    # 3 MXU matmuls: the 3 width taps are K-packed (K = 3*C), accumulated in the
    # f32 VMEM scratch; a single bf16 store drains it at the end.
    for dy in range(3):
        lhs = jnp.concatenate(
            [pad_ref[dy:dy + H, 0:W, :],
             pad_ref[dy:dy + H, 1:W + 1, :],
             pad_ref[dy:dy + H, 2:W + 2, :]], axis=-1)         # (H, W, 3C)
        lhs = lhs.reshape(H * W, 3 * C).astype(w_ref.dtype)
        tap = jnp.dot(lhs, w_ref[dy], preferred_element_type=f32)
        if dy == 0:
            acc_ref[...] = tap
        else:
            acc_ref[...] += tap

    out = acc_ref[...]
    o_ref[...] = out.astype(o_ref.dtype)
    # fused partial batch statistics for bn3
    st_ref[0, 0:1, :] = jnp.sum(out, axis=0, keepdims=True)
    st_ref[0, 1:2, :] = jnp.sum(out * out, axis=0, keepdims=True)


# ----------------------------------------------------------------------------
# Pallas wrappers
# ----------------------------------------------------------------------------
def _pick_tile(m, target=1024, min_steps=4):
    """Row tile for the 1x1 convs: as large as the HBM roofline wants (<=target)
    but leaving >= min_steps grid steps (megacore split / DMA-compute overlap).
    Returns (tile, needs_row_padding)."""
    if m <= 16 * min_steps:
        return m, False
    cap = max(16, min(target, m // min_steps))
    t = (cap // 16) * 16
    while t >= 16:
        if m % t == 0:
            return t, False
        t -= 16
    return min(256, _rup(m, 16)), True     # no clean divisor -> pad rows + slice


def fused_pw_conv(x2, scale, shift, w_pad, *, res=None,
                  out_dtype=jnp.bfloat16, want_stats=False):
    """relu(x*scale + shift) @ w_pad (+ res), row-tiled.

    Returns (out, stats) where stats is (steps, 2, n) per-tile sum / sum-of-
    squares of the f32 matmul result (None unless want_stats and no padding)."""
    M, cin = x2.shape
    n = w_pad.shape[1]
    tm, needs_pad = _pick_tile(M)
    if needs_pad:
        Mp = pl.cdiv(M, tm) * tm
        x2 = jnp.pad(x2, ((0, Mp - M), (0, 0)))
        if res is not None:
            res = jnp.pad(res, ((0, Mp - M), (0, 0)))
        want_stats = False    # padded rows would contaminate the fused statistics
    else:
        Mp = M
    grid = (Mp // tm,)

    scale = scale.reshape(1, cin).astype(jnp.float32)
    shift = shift.reshape(1, cin).astype(jnp.float32)
    w_pad = w_pad.astype(jnp.bfloat16)

    # NOTE: the weight / scale / shift blocks are constant-index; Buffered(1)
    # would save a little VMEM but they are tiny here, so default buffering is kept.
    in_specs = [pl.BlockSpec((tm, cin), lambda i: (i, 0)),
                pl.BlockSpec((1, cin), lambda i: (0, 0)),
                pl.BlockSpec((1, cin), lambda i: (0, 0)),
                pl.BlockSpec((cin, n), lambda i: (0, 0))]
    args = [x2, scale, shift, w_pad]

    out_shape = jax.ShapeDtypeStruct((Mp, n), out_dtype)
    out_spec = pl.BlockSpec((tm, n), lambda i: (i, 0))

    if res is not None:
        kernel = _pw_res_kernel
        in_specs.append(pl.BlockSpec((tm, res.shape[1]), lambda i: (i, 0)))
        args.append(res)
        out_shapes, out_specs = out_shape, out_spec
    elif want_stats:
        kernel = _pw_stats_kernel
        out_shapes = (out_shape,
                      jax.ShapeDtypeStruct((grid[0], 2, n), jnp.float32))
        out_specs = (out_spec, pl.BlockSpec((1, 2, n), lambda i: (i, 0, 0)))
    else:
        kernel = _pw_kernel
        out_shapes, out_specs = out_shape, out_spec

    out = pl.pallas_call(
        kernel,
        out_shape=out_shapes,
        grid=grid,
        in_specs=in_specs,
        out_specs=out_specs,
        compiler_params=pltpu.CompilerParams(
            dimension_semantics=("parallel",),
            vmem_limit_bytes=_VMEM_LIMIT),
    )(*args)

    if kernel is _pw_stats_kernel:
        y, st = out
        return y, st
    y = out[:M] if needs_pad else out
    return y, None


def fused_conv3x3(x_nhwc, scale, shift, w_packed):
    """BN+ReLU -> 3x3 conv (stride 1, pad 1); one batch element per grid step.

    x_nhwc: (B,H,W,C) -> returns ((B*H*W, N) bf16 rows, (B, 2, N) f32 stats)."""
    B, H, W, C = x_nhwc.shape
    N = w_packed.shape[2]
    return pl.pallas_call(
        _conv3x3_kernel,
        out_shape=(jax.ShapeDtypeStruct((B * H * W, N), jnp.bfloat16),
                   jax.ShapeDtypeStruct((B, 2, N), jnp.float32)),
        grid=(B,),
        in_specs=[pl.BlockSpec((1, H, W, C), lambda b: (b, 0, 0, 0)),
                  pl.BlockSpec((1, C), lambda b: (0, 0)),
                  pl.BlockSpec((1, C), lambda b: (0, 0)),
                  pl.BlockSpec((3, 3 * C, N), lambda b: (0, 0, 0))],
        out_specs=(pl.BlockSpec((H * W, N), lambda b: (b, 0)),
                   pl.BlockSpec((1, 2, N), lambda b: (b, 0, 0))),
        scratch_shapes=[pltpu.VMEM((H + 2, W + 2, C), jnp.float32),
                        pltpu.VMEM((H * W, N), jnp.float32)],
        compiler_params=pltpu.CompilerParams(
            dimension_semantics=("parallel",),
            vmem_limit_bytes=_VMEM_LIMIT),
    )(x_nhwc.astype(jnp.bfloat16),
      scale.reshape(1, C).astype(jnp.float32),
      shift.reshape(1, C).astype(jnp.float32),
      w_packed.astype(jnp.bfloat16))


# ----------------------------------------------------------------------------
# BottleneckBlock forward (Pallas path)
# ----------------------------------------------------------------------------
def _pad_cols(w, n):
    return jnp.pad(w, ((0, 0), (0, n - w.shape[1])))


def _pad_vec(v, n):
    return jnp.pad(v, (0, n - v.shape[0]))


def _stats_to_affine(sums, count, gamma, beta, c_real, eps=EPS):
    """Train-mode BN affine from fused (sum, sumsq) kernel outputs."""
    mean = sums[0, :c_real] / count
    var = jnp.maximum(sums[1, :c_real] / count - mean * mean, 0.0)
    scale = gamma * jax.lax.rsqrt(var + eps)
    shift = beta - mean * scale
    return scale, shift


def _bn_affine(x_ch_last, gamma, beta, eps=EPS):
    """Fallback: train-mode BN affine via a JAX reduction (biased batch var)."""
    x = x_ch_last.astype(jnp.float32)
    axes = tuple(range(x.ndim - 1))
    mean = jnp.mean(x, axis=axes)
    var = jnp.var(x, axis=axes)
    scale = gamma * jax.lax.rsqrt(var + eps)
    shift = beta - mean * scale
    return scale, shift


def bottleneck_forward(x_nchw, P, stride=1, eps=EPS):
    B, cin, H, W = x_nchw.shape
    planes = P['w3'].shape[0]
    c4 = P['w1'].shape[0]
    N1 = _rup(c4)          # lane-dense width of conv1 / conv2 outputs
    N3 = _rup(planes)      # lane-dense width of conv3 / shortcut outputs

    x_nhwc = jnp.transpose(x_nchw, (0, 2, 3, 1)).astype(jnp.float32)
    x2 = x_nhwc.reshape(B * H * W, cin)
    M = B * H * W

    # bn1 and the shortcut BN see the same input -> shared batch statistics.
    # (They must exist before conv1 can run, so this reduction stays in JAX.)
    mean_x = jnp.mean(x_nhwc, axis=(0, 1, 2))
    inv_x = jax.lax.rsqrt(jnp.var(x_nhwc, axis=(0, 1, 2)) + eps)
    s1 = P['g1'] * inv_x
    t1 = P['b1'] - mean_x * s1

    # conv1: 1x1 (cin -> c4), BN1+ReLU fused, bf16 lane-dense output,
    # per-tile sum/sumsq emitted for bn2 (no extra HBM pass over the output).
    w1 = _pad_cols(P['w1'].reshape(c4, cin).T, N1)
    a2, st2 = fused_pw_conv(x2, s1, t1, w1, want_stats=True)       # bf16 (M, N1)
    if st2 is not None:
        s2, t2 = _stats_to_affine(jnp.sum(st2, axis=0), M, P['g2'], P['b2'], c4, eps)
    else:
        s2, t2 = _bn_affine(a2[:, :c4], P['g2'], P['b2'], eps)

    # conv2: 3x3 (c4 -> c4), BN2+ReLU fused; halo built in a VMEM scratch,
    # width taps K-packed into 3 MXU matmuls, bf16 output + fused bn3 stats.
    w2 = jnp.transpose(P['w2'], (2, 3, 1, 0))                       # (3,3,ci,co)
    w2 = jnp.pad(w2, ((0, 0), (0, 0), (0, N1 - c4), (0, N1 - c4)))
    w2 = w2.reshape(3, 3 * N1, N1)
    a_nhwc = a2.reshape(B, H, W, N1)
    b_rows, st3 = fused_conv3x3(a_nhwc, _pad_vec(s2, N1), _pad_vec(t2, N1), w2)

    if stride == 1:
        b2d = b_rows                                                # (M, N1) bf16
        Bo, Ho, Wo = B, H, W
        s3, t3 = _stats_to_affine(jnp.sum(st3, axis=0), M, P['g3'], P['b3'], c4, eps)
    else:
        # TODO(synk): compute only the strided rows inside the 3x3 kernel.
        b_nhwc = b_rows.reshape(B, H, W, N1)[:, ::stride, ::stride, :]
        Bo, Ho, Wo = b_nhwc.shape[0], b_nhwc.shape[1], b_nhwc.shape[2]
        b2d = b_nhwc.reshape(Bo * Ho * Wo, N1)
        s3, t3 = _bn_affine(b2d[:, :c4], P['g3'], P['b3'], eps)
    Mo = Bo * Ho * Wo

    # Shortcut branch (bf16, lane-dense so the residual add fuses into conv3).
    if 'wsc' in P:
        ssc = P['gsc'] * inv_x
        tsc = P['bsc'] - mean_x * ssc
        xs = x_nhwc if stride == 1 else x_nhwc[:, ::stride, ::stride, :]
        wsc = _pad_cols(P['wsc'].reshape(planes, cin).T, N3)
        sc, _ = fused_pw_conv(xs.reshape(Mo, cin), ssc, tsc, wsc)   # bf16 (Mo, N3)
    else:
        # identity shortcut: pass at true width/f32, zero-extended in-kernel
        sc = x2

    # conv3: 1x1 (c4 -> planes), BN3+ReLU fused, residual added in the epilogue.
    w3 = jnp.pad(P['w3'].reshape(planes, c4).T,
                 ((0, N1 - c4), (0, N3 - planes)))
    out, _ = fused_pw_conv(b2d, _pad_vec(s3, N1), _pad_vec(t3, N1), w3,
                           res=sc, out_dtype=jnp.float32)

    out = out[:, :planes].reshape(Bo, Ho, Wo, planes)
    return jnp.transpose(out, (0, 3, 1, 2))


# ----------------------------------------------------------------------------
# Pure-JAX f32 reference (train-mode BatchNorm), for verification
# ----------------------------------------------------------------------------
def reference_forward(x, P, stride=1, eps=EPS):
    def bn(y, g, b):
        mean = jnp.mean(y, axis=(0, 2, 3), keepdims=True)
        var = jnp.var(y, axis=(0, 2, 3), keepdims=True)
        return ((y - mean) * jax.lax.rsqrt(var + eps) * g.reshape(1, -1, 1, 1)
                + b.reshape(1, -1, 1, 1))

    def conv(y, w, s=1, pad=0):
        return jax.lax.conv_general_dilated(
            y, w, window_strides=(s, s), padding=((pad, pad), (pad, pad)),
            dimension_numbers=('NCHW', 'OIHW', 'NCHW'))

    out = conv(jax.nn.relu(bn(x, P['g1'], P['b1'])), P['w1'])
    out = conv(jax.nn.relu(bn(out, P['g2'], P['b2'])), P['w2'], s=stride, pad=1)
    out = conv(jax.nn.relu(bn(out, P['g3'], P['b3'])), P['w3'])
    if 'wsc' in P:
        sc = conv(jax.nn.relu(bn(x, P['gsc'], P['bsc'])), P['wsc'], s=stride)
    else:
        sc = x
    return out + sc


# ----------------------------------------------------------------------------
# Deterministic parameters
# ----------------------------------------------------------------------------
def init_params(key, inplanes, planes, stride):
    c4 = planes // 4
    ks = jax.random.split(key, 12)

    def conv_w(k, cout, cin, ksz):
        fan_in = cin * ksz * ksz
        return jax.random.normal(k, (cout, cin, ksz, ksz), jnp.float32) / np.sqrt(fan_in)

    def gamma(k, c):
        return 1.0 + 0.1 * jax.random.normal(k, (c,), jnp.float32)

    def beta(k, c):
        return 0.1 * jax.random.normal(k, (c,), jnp.float32)

    P = {'w1': conv_w(ks[0], c4, inplanes, 1),
         'w2': conv_w(ks[1], c4, c4, 3),
         'w3': conv_w(ks[2], planes, c4, 1),
         'g1': gamma(ks[3], inplanes), 'b1': beta(ks[4], inplanes),
         'g2': gamma(ks[5], c4),       'b2': beta(ks[6], c4),
         'g3': gamma(ks[7], c4),       'b3': beta(ks[8], c4)}
    if stride != 1 or inplanes != planes:
        P['wsc'] = conv_w(ks[9], planes, inplanes, 1)
        P['gsc'] = gamma(ks[10], inplanes)
        P['bsc'] = beta(ks[11], inplanes)
    return P


# ----------------------------------------------------------------------------
if __name__ == "__main__":
    INPLANES, PLANES, STRIDE = 32, 64, 1
    B, H, W = 2, 16, 16

    key = jax.random.PRNGKey(0)
    k_x, k_p = jax.random.split(key)
    x = jax.random.normal(k_x, (B, INPLANES, H, W), jnp.float32)
    params = init_params(k_p, INPLANES, PLANES, STRIDE)

    fwd = jax.jit(functools.partial(bottleneck_forward, stride=STRIDE))
    out = jax.block_until_ready(fwd(x, params))

    assert out.shape == (B, PLANES, H, W), out.shape
    assert bool(jnp.all(jnp.isfinite(out)))

    # Verify against the pure-JAX f32 reference (bf16 operands/intermediates
    # on the Pallas path -> loose tolerance).
    ref = reference_forward(x, params, stride=STRIDE)
    rel = jnp.sqrt(jnp.sum((out - ref) ** 2)) / (jnp.sqrt(jnp.sum(ref ** 2)) + 1e-6)
    assert float(rel) < 8e-2, float(rel)

    print("KERNEL_OK")
</pallas_src>

<mosaic_0001>
module attributes {stable_mosaic.version = 11 : i64} {
  func.func @_pw_stats_kernel(%arg0: i32, %arg1: memref<128x32xf32, #tpu.memory_space<vmem>>, %arg2: memref<1x32xf32, #tpu.memory_space<vmem>>, %arg3: memref<1x32xf32, #tpu.memory_space<vmem>>, %arg4: memref<32x128xbf16, #tpu.memory_space<vmem>>, %arg5: memref<128x128xbf16, #tpu.memory_space<vmem>>, %arg6: memref<1x2x128xf32, #tpu.memory_space<vmem>>) attributes {dimension_semantics = [#tpu.dimension_semantics<parallel>], iteration_bounds = array<i64: 4>, scalar_prefetch = 0 : i64, scratch_operands = 0 : i64, tpu.core_type = #tpu.core_type<tc>, window_params = [{transform_indices = @transform_0, window_bounds = array<i64: 128, 32>}, {pipeline_mode = #tpu.pipeline_mode<synchronous>, transform_indices = @transform_1, window_bounds = array<i64: 1, 32>}, {pipeline_mode = #tpu.pipeline_mode<synchronous>, transform_indices = @transform_2, window_bounds = array<i64: 1, 32>}, {pipeline_mode = #tpu.pipeline_mode<synchronous>, transform_indices = @transform_3, window_bounds = array<i64: 32, 128>}, {transform_indices = @transform_4, window_bounds = array<i64: 128, 128>}, {transform_indices = @transform_5, window_bounds = array<i64: 1, 2, 128>}]} {
    %c0 = arith.constant 0 : index
    %c0_0 = arith.constant 0 : index
    %0 = vector.load %arg1[%c0, %c0_0] : memref<128x32xf32, #tpu.memory_space<vmem>>, vector<128x32xf32>
    %c0_1 = arith.constant 0 : index
    %c0_2 = arith.constant 0 : index
    %1 = vector.load %arg2[%c0_1, %c0_2] : memref<1x32xf32, #tpu.memory_space<vmem>>, vector<1x32xf32>
    %2 = vector.broadcast %1 : vector<1x32xf32> to vector<128x32xf32>
    %3 = arith.mulf %0, %2 : vector<128x32xf32>
    %c0_3 = arith.constant 0 : index
    %c0_4 = arith.constant 0 : index
    %4 = vector.load %arg3[%c0_3, %c0_4] : memref<1x32xf32, #tpu.memory_space<vmem>>, vector<1x32xf32>
    %5 = vector.broadcast %4 : vector<1x32xf32> to vector<128x32xf32>
    %6 = arith.addf %3, %5 : vector<128x32xf32>
    %cst = arith.constant 0.000000e+00 : f32
    %7 = vector.broadcast %cst : f32 to vector<128x32xf32>
    %8 = arith.maximumf %6, %7 : vector<128x32xf32>
    %9 = arith.truncf %8 : vector<128x32xf32> to vector<128x32xbf16>
    %c0_5 = arith.constant 0 : index
    %c0_6 = arith.constant 0 : index
    %10 = vector.load %arg4[%c0_5, %c0_6] : memref<32x128xbf16, #tpu.memory_space<vmem>>, vector<32x128xbf16>
    %cst_7 = arith.constant dense<0.000000e+00> : vector<128x128xf32>
    %11 = tpu.matmul %9, %10, %cst_7 {dimension_numbers = #tpu.dot_dimension_numbers<[1], [0], [0], [1], [0, 0, 1, 1], [], []>} : vector<128x32xbf16>, vector<32x128xbf16>, vector<128x128xf32> -> vector<128x128xf32>
    %12 = arith.truncf %11 : vector<128x128xf32> to vector<128x128xbf16>
    %c0_8 = arith.constant 0 : index
    %c0_9 = arith.constant 0 : index
    %13 = vector.load %arg5[%c0_8, %c0_9] : memref<128x128xbf16, #tpu.memory_space<vmem>>, vector<128x128xbf16>
    tpu.vector_store %arg5[%c0_8, %c0_9], %12 {strides = array<i32>} : memref<128x128xbf16, #tpu.memory_space<vmem>>, vector<128x128xbf16>,
    %cst_10 = arith.constant dense<0.000000e+00> : vector<128xf32>
    %14 = vector.multi_reduction <add>, %11, %cst_10 [0] : vector<128x128xf32> to vector<128xf32>
    %15 = vector.shape_cast %14 : vector<128xf32> to vector<1x128xf32>
    %c0_11 = arith.constant 0 : index
    %c0_12 = arith.constant 0 : index
    %c0_13 = arith.constant 0 : index
    %16 = vector.load %arg6[%c0_11, %c0_12, %c0_13] : memref<1x2x128xf32, #tpu.memory_space<vmem>>, vector<1x1x128xf32>
    %17 = vector.shape_cast %16 : vector<1x1x128xf32> to vector<1x128xf32>
    %18 = vector.shape_cast %15 : vector<1x128xf32> to vector<1x1x128xf32>
    tpu.vector_store %arg6[%c0_11, %c0_12, %c0_13], %18 {strides = array<i32>} : memref<1x2x128xf32, #tpu.memory_space<vmem>>, vector<1x1x128xf32>,
    %19 = arith.mulf %11, %11 : vector<128x128xf32>
    %cst_14 = arith.constant dense<0.000000e+00> : vector<128xf32>
    %20 = vector.multi_reduction <add>, %19, %cst_14 [0] : vector<128x128xf32> to vector<128xf32>
    %21 = vector.shape_cast %20 : vector<128xf32> to vector<1x128xf32>
    %c0_15 = arith.constant 0 : index
    %c1 = arith.constant 1 : index
    %c0_16 = arith.constant 0 : index
    %22 = vector.load %arg6[%c0_15, %c1, %c0_16] : memref<1x2x128xf32, #tpu.memory_space<vmem>>, vector<1x1x128xf32>
    %23 = vector.shape_cast %22 : vector<1x1x128xf32> to vector<1x128xf32>
    %24 = vector.shape_cast %21 : vector<1x128xf32> to vector<1x1x128xf32>
    tpu.vector_store %arg6[%c0_15, %c1, %c0_16], %24 {strides = array<i32>} : memref<1x2x128xf32, #tpu.memory_space<vmem>>, vector<1x1x128xf32>,
    return
  }
  func.func @transform_0(%arg0: i32) -> (i32, i32) {
    %c0_i32 = arith.constant 0 : i32
    %c0_i32_0 = arith.constant 0 : i32
    return %arg0, %c0_i32 : i32, i32
  }
  func.func @transform_1(%arg0: i32) -> (i32, i32) {
    %c0_i32 = arith.constant 0 : i32
    %c0_i32_0 = arith.constant 0 : i32
    %c0_i32_1 = arith.constant 0 : i32
    return %c0_i32, %c0_i32_0 : i32, i32
  }
  func.func @transform_2(%arg0: i32) -> (i32, i32) {
    %c0_i32 = arith.constant 0 : i32
    %c0_i32_0 = arith.constant 0 : i32
    %c0_i32_1 = arith.constant 0 : i32
    return %c0_i32, %c0_i32_0 : i32, i32
  }
  func.func @transform_3(%arg0: i32) -> (i32, i32) {
    %c0_i32 = arith.constant 0 : i32
    %c0_i32_0 = arith.constant 0 : i32
    %c0_i32_1 = arith.constant 0 : i32
    return %c0_i32, %c0_i32_0 : i32, i32
  }
  func.func @transform_4(%arg0: i32) -> (i32, i32) {
    %c0_i32 = arith.constant 0 : i32
    %c0_i32_0 = arith.constant 0 : i32
    return %arg0, %c0_i32 : i32, i32
  }
  func.func @transform_5(%arg0: i32) -> (i32, i32, i32) {
    %c0_i32 = arith.constant 0 : i32
    %c0_i32_0 = arith.constant 0 : i32
    %c0_i32_1 = arith.constant 0 : i32
    return %arg0, %c0_i32, %c0_i32_0 : i32, i32, i32
  }
}

module attributes {stable_mosaic.version = 11 : i64} {
  func.func @_conv3x3_kernel(%arg0: i32, %arg1: memref<1x16x16x128xbf16, #tpu.memory_space<vmem>>, %arg2: memref<1x128xf32, #tpu.memory_space<vmem>>, %arg3: memref<1x128xf32, #tpu.memory_space<vmem>>, %arg4: memref<3x384x128xbf16, #tpu.memory_space<vmem>>, %arg5: memref<256x128xbf16, #tpu.memory_space<vmem>>, %arg6: memref<1x2x128xf32, #tpu.memory_space<vmem>>, %arg7: memref<18x18x128xf32, #tpu.memory_space<vmem>>, %arg8: memref<256x128xf32, #tpu.memory_space<vmem>>) attributes {dimension_semantics = [#tpu.dimension_semantics<parallel>], iteration_bounds = array<i64: 2>, scalar_prefetch = 0 : i64, scratch_operands = 2 : i64, tpu.core_type = #tpu.core_type<tc>, window_params = [{transform_indices = @transform_0, window_bounds = array<i64: 1, 16, 16, 128>}, {pipeline_mode = #tpu.pipeline_mode<synchronous>, transform_indices = @transform_1, window_bounds = array<i64: 1, 128>}, {pipeline_mode = #tpu.pipeline_mode<synchronous>, transform_indices = @transform_2, window_bounds = array<i64: 1, 128>}, {pipeline_mode = #tpu.pipeline_mode<synchronous>, transform_indices = @transform_3, window_bounds = array<i64: 3, 384, 128>}, {transform_indices = @transform_4, window_bounds = array<i64: 256, 128>}, {transform_indices = @transform_5, window_bounds = array<i64: 1, 2, 128>}]} {
    %c0 = arith.constant 0 : index
    %c0_0 = arith.constant 0 : index
    %c0_1 = arith.constant 0 : index
    %c0_2 = arith.constant 0 : index
    %0 = vector.load %arg1[%c0, %c0_0, %c0_1, %c0_2] : memref<1x16x16x128xbf16, #tpu.memory_space<vmem>>, vector<1x16x16x128xbf16>
    %1 = vector.shape_cast %0 : vector<1x16x16x128xbf16> to vector<16x16x128xbf16>
    %2 = arith.extf %1 : vector<16x16x128xbf16> to vector<16x16x128xf32>
    %c0_3 = arith.constant 0 : index
    %c0_4 = arith.constant 0 : index
    %3 = vector.load %arg2[%c0_3, %c0_4] : memref<1x128xf32, #tpu.memory_space<vmem>>, vector<1x128xf32>
    %4 = vector.shape_cast %3 : vector<1x128xf32> to vector<128xf32>
    %5 = vector.shape_cast %4 : vector<128xf32> to vector<1x1x128xf32>
    %6 = vector.broadcast %5 : vector<1x1x128xf32> to vector<16x16x128xf32>
    %7 = arith.mulf %2, %6 : vector<16x16x128xf32>
    %c0_5 = arith.constant 0 : index
    %c0_6 = arith.constant 0 : index
    %8 = vector.load %arg3[%c0_5, %c0_6] : memref<1x128xf32, #tpu.memory_space<vmem>>, vector<1x128xf32>
    %9 = vector.shape_cast %8 : vector<1x128xf32> to vector<128xf32>
    %10 = vector.shape_cast %9 : vector<128xf32> to vector<1x1x128xf32>
    %11 = vector.broadcast %10 : vector<1x1x128xf32> to vector<16x16x128xf32>
    %12 = arith.addf %7, %11 : vector<16x16x128xf32>
    %cst = arith.constant 0.000000e+00 : f32
    %13 = vector.broadcast %cst : f32 to vector<16x16x128xf32>
    %14 = arith.maximumf %12, %13 : vector<16x16x128xf32>
    %cst_7 = arith.constant 0.000000e+00 : f32
    %15 = vector.broadcast %cst_7 : f32 to vector<1x16x128xf32>
    %16 = tpu.concatenate %15, %14, %15 in 0 : vector<1x16x128xf32>, vector<16x16x128xf32>, vector<1x16x128xf32> -> vector<18x16x128xf32>
    %cst_8 = arith.constant 0.000000e+00 : f32
    %17 = vector.broadcast %cst_8 : f32 to vector<18x1x128xf32>
    %18 = tpu.concatenate %17, %16, %17 in 1 : vector<18x1x128xf32>, vector<18x16x128xf32>, vector<18x1x128xf32> -> vector<18x18x128xf32>
    %c0_9 = arith.constant 0 : index
    %c0_10 = arith.constant 0 : index
    %c0_11 = arith.constant 0 : index
    %19 = vector.load %arg7[%c0_9, %c0_10, %c0_11] : memref<18x18x128xf32, #tpu.memory_space<vmem>>, vector<18x18x128xf32>
    tpu.vector_store %arg7[%c0_9, %c0_10, %c0_11], %18 {strides = array<i32>} : memref<18x18x128xf32, #tpu.memory_space<vmem>>, vector<18x18x128xf32>,
    %c0_12 = arith.constant 0 : index
    %c0_13 = arith.constant 0 : index
    %c0_14 = arith.constant 0 : index
    %20 = vector.load %arg7[%c0_12, %c0_13, %c0_14] : memref<18x18x128xf32, #tpu.memory_space<vmem>>, vector<16x16x128xf32>
    %c0_15 = arith.constant 0 : index
    %c1 = arith.constant 1 : index
    %c0_16 = arith.constant 0 : index
    %21 = vector.load %arg7[%c0_15, %c1, %c0_16] : memref<18x18x128xf32, #tpu.memory_space<vmem>>, vector<16x16x128xf32>
    %c0_17 = arith.constant 0 : index
    %c2 = arith.constant 2 : index
    %c0_18 = arith.constant 0 : index
    %22 = vector.load %arg7[%c0_17, %c2, %c0_18] : memref<18x18x128xf32, #tpu.memory_space<vmem>>, vector<16x16x128xf32>
    %23 = tpu.concatenate %20, %21, %22 in 2 : vector<16x16x128xf32>, vector<16x16x128xf32>, vector<16x16x128xf32> -> vector<16x16x384xf32>
    %24 = vector.shape_cast %23 : vector<16x16x384xf32> to vector<256x384xf32>
    %25 = arith.truncf %24 : vector<256x384xf32> to vector<256x384xbf16>
    %c0_19 = arith.constant 0 : index
    %c0_20 = arith.constant 0 : index
    %c0_21 = arith.constant 0 : index
    %26 = vector.load %arg4[%c0_19, %c0_20, %c0_21] : memref<3x384x128xbf16, #tpu.memory_space<vmem>>, vector<1x384x128xbf16>
    %27 = vector.shape_cast %26 : vector<1x384x128xbf16> to vector<384x128xbf16>
    %cst_22 = arith.constant dense<0.000000e+00> : vector<256x128xf32>
    %28 = tpu.matmul %25, %27, %cst_22 {dimension_numbers = #tpu.dot_dimension_numbers<[1], [0], [0], [1], [0, 0, 1, 1], [], []>} : vector<256x384xbf16>, vector<384x128xbf16>, vector<256x128xf32> -> vector<256x128xf32>
    %c0_23 = arith.constant 0 : index
    %c0_24 = arith.constant 0 : index
    %29 = vector.load %arg8[%c0_23, %c0_24] : memref<256x128xf32, #tpu.memory_space<vmem>>, vector<256x128xf32>
    tpu.vector_store %arg8[%c0_23, %c0_24], %28 {strides = array<i32>} : memref<256x128xf32, #tpu.memory_space<vmem>>, vector<256x128xf32>,
    %c1_25 = arith.constant 1 : index
    %c0_26 = arith.constant 0 : index
    %c0_27 = arith.constant 0 : index
    %30 = vector.load %arg7[%c1_25, %c0_26, %c0_27] : memref<18x18x128xf32, #tpu.memory_space<vmem>>, vector<16x16x128xf32>
    %c1_28 = arith.constant 1 : index
    %c1_29 = arith.constant 1 : index
    %c0_30 = arith.constant 0 : index
    %31 = vector.load %arg7[%c1_28, %c1_29, %c0_30] : memref<18x18x128xf32, #tpu.memory_space<vmem>>, vector<16x16x128xf32>
    %c1_31 = arith.constant 1 : index
    %c2_32 = arith.constant 2 : index
    %c0_33 = arith.constant 0 : index
    %32 = vector.load %arg7[%c1_31, %c2_32, %c0_33] : memref<18x18x128xf32, #tpu.memory_space<vmem>>, vector<16x16x128xf32>
    %33 = tpu.concatenate %30, %31, %32 in 2 : vector<16x16x128xf32>, vector<16x16x128xf32>, vector<16x16x128xf32> -> vector<16x16x384xf32>
    %34 = vector.shape_cast %33 : vector<16x16x384xf32> to vector<256x384xf32>
    %35 = arith.truncf %34 : vector<256x384xf32> to vector<256x384xbf16>
    %c1_34 = arith.constant 1 : index
    %c0_35 = arith.constant 0 : index
    %c0_36 = arith.constant 0 : index
    %36 = vector.load %arg4[%c1_34, %c0_35, %c0_36] : memref<3x384x128xbf16, #tpu.memory_space<vmem>>, vector<1x384x128xbf16>
    %37 = vector.shape_cast %36 : vector<1x384x128xbf16> to vector<384x128xbf16>
    %cst_37 = arith.constant dense<0.000000e+00> : vector<256x128xf32>
    %38 = tpu.matmul %35, %37, %cst_37 {dimension_numbers = #tpu.dot_dimension_numbers<[1], [0], [0], [1], [0, 0, 1, 1], [], []>} : vector<256x384xbf16>, vector<384x128xbf16>, vector<256x128xf32> -> vector<256x128xf32>
    %c0_38 = arith.constant 0 : index
    %c0_39 = arith.constant 0 : index
    %39 = vector.load %arg8[%c0_38, %c0_39] : memref<256x128xf32, #tpu.memory_space<vmem>>, vector<256x128xf32>
    %40 = arith.addf %39, %38 : vector<256x128xf32>
    %c0_40 = arith.constant 0 : index
    %c0_41 = arith.constant 0 : index
    %41 = vector.load %arg8[%c0_40, %c0_41] : memref<256x128xf32, #tpu.memory_space<vmem>>, vector<256x128xf32>
    tpu.vector_store %arg8[%c0_40, %c0_41], %40 {strides = array<i32>} : memref<256x128xf32, #tpu.memory_space<vmem>>, vector<256x128xf32>,
    %c2_42 = arith.constant 2 : index
    %c0_43 = arith.constant 0 : index
    %c0_44 = arith.constant 0 : index
    %42 = vector.load %arg7[%c2_42, %c0_43, %c0_44] : memref<18x18x128xf32, #tpu.memory_space<vmem>>, vector<16x16x128xf32>
    %c2_45 = arith.constant 2 : index
    %c1_46 = arith.constant 1 : index
    %c0_47 = arith.constant 0 : index
    %43 = vector.load %arg7[%c2_45, %c1_46, %c0_47] : memref<18x18x128xf32, #tpu.memory_space<vmem>>, vector<16x16x128xf32>
    %c2_48 = arith.constant 2 : index
    %c2_49 = arith.constant 2 : index
    %c0_50 = arith.constant 0 : index
    %44 = vector.load %arg7[%c2_48, %c2_49, %c0_50] : memref<18x18x128xf32, #tpu.memory_space<vmem>>, vector<16x16x128xf32>
    %45 = tpu.concatenate %42, %43, %44 in 2 : vector<16x16x128xf32>, vector<16x16x128xf32>, vector<16x16x128xf32> -> vector<16x16x384xf32>
    %46 = vector.shape_cast %45 : vector<16x16x384xf32> to vector<256x384xf32>
    %47 = arith.truncf %46 : vector<256x384xf32> to vector<256x384xbf16>
    %c2_51 = arith.constant 2 : index
    %c0_52 = arith.constant 0 : index
    %c0_53 = arith.constant 0 : index
    %48 = vector.load %arg4[%c2_51, %c0_52, %c0_53] : memref<3x384x128xbf16, #tpu.memory_space<vmem>>, vector<1x384x128xbf16>
    %49 = vector.shape_cast %48 : vector<1x384x128xbf16> to vector<384x128xbf16>
    %cst_54 = arith.constant dense<0.000000e+00> : vector<256x128xf32>
    %50 = tpu.matmul %47, %49, %cst_54 {dimension_numbers = #tpu.dot_dimension_numbers<[1], [0], [0], [1], [0, 0, 1, 1], [], []>} : vector<256x384xbf16>, vector<384x128xbf16>, vector<256x128xf32> -> vector<256x128xf32>
    %c0_55 = arith.constant 0 : index
    %c0_56 = arith.constant 0 : index
    %51 = vector.load %arg8[%c0_55, %c0_56] : memref<256x128xf32, #tpu.memory_space<vmem>>, vector<256x128xf32>
    %52 = arith.addf %51, %50 : vector<256x128xf32>
    %c0_57 = arith.constant 0 : index
    %c0_58 = arith.constant 0 : index
    %53 = vector.load %arg8[%c0_57, %c0_58] : memref<256x128xf32, #tpu.memory_space<vmem>>, vector<256x128xf32>
    tpu.vector_store %arg8[%c0_57, %c0_58], %52 {strides = array<i32>} : memref<256x128xf32, #tpu.memory_space<vmem>>, vector<256x128xf32>,
    %c0_59 = arith.constant 0 : index
    %c0_60 = arith.constant 0 : index
    %54 = vector.load %arg8[%c0_59, %c0_60] : memref<256x128xf32, #tpu.memory_space<vmem>>, vector<256x128xf32>
    %55 = arith.truncf %54 : vector<256x128xf32> to vector<256x128xbf16>
    %c0_61 = arith.constant 0 : index
    %c0_62 = arith.constant 0 : index
    %56 = vector.load %arg5[%c0_61, %c0_62] : memref<256x128xbf16, #tpu.memory_space<vmem>>, vector<256x128xbf16>
    tpu.vector_store %arg5[%c0_61, %c0_62], %55 {strides = array<i32>} : memref<256x128xbf16, #tpu.memory_space<vmem>>, vector<256x128xbf16>,
    %cst_63 = arith.constant dense<0.000000e+00> : vector<128xf32>
    %57 = vector.multi_reduction <add>, %54, %cst_63 [0] : vector<256x128xf32> to vector<128xf32>
    %58 = vector.shape_cast %57 : vector<128xf32> to vector<1x128xf32>
    %c0_64 = arith.constant 0 : index
    %c0_65 = arith.constant 0 : index
    %c0_66 = arith.constant 0 : index
    %59 = vector.load %arg6[%c0_64, %c0_65, %c0_66] : memref<1x2x128xf32, #tpu.memory_space<vmem>>, vector<1x1x128xf32>
    %60 = vector.shape_cast %59 : vector<1x1x128xf32> to vector<1x128xf32>
    %61 = vector.shape_cast %58 : vector<1x128xf32> to vector<1x1x128xf32>
    tpu.vector_store %arg6[%c0_64, %c0_65, %c0_66], %61 {strides = array<i32>} : memref<1x2x128xf32, #tpu.memory_space<vmem>>, vector<1x1x128xf32>,
    %62 = arith.mulf %54, %54 : vector<256x128xf32>
    %cst_67 = arith.constant dense<0.000000e+00> : vector<128xf32>
    %63 = vector.multi_reduction <add>, %62, %cst_67 [0] : vector<256x128xf32> to vector<128xf32>
    %64 = vector.shape_cast %63 : vector<128xf32> to vector<1x128xf32>
    %c0_68 = arith.constant 0 : index
    %c1_69 = arith.constant 1 : index
    %c0_70 = arith.constant 0 : index
    %65 = vector.load %arg6[%c0_68, %c1_69, %c0_70] : memref<1x2x128xf32, #tpu.memory_space<vmem>>, vector<1x1x128xf32>
    %66 = vector.shape_cast %65 : vector<1x1x128xf32> to vector<1x128xf32>
    %67 = vector.shape_cast %64 : vector<1x128xf32> to vector<1x1x128xf32>
    tpu.vector_store %arg6[%c0_68, %c1_69, %c0_70], %67 {strides = array<i32>} : memref<1x2x128xf32, #tpu.memory_space<vmem>>, vector<1x1x128xf32>,
    return
  }
  func.func @transform_0(%arg0: i32) -> (i32, i32, i32, i32) {
    %c0_i32 = arith.constant 0 : i32
    %c0_i32_0 = arith.constant 0 : i32
    %c0_i32_1 = arith.constant 0 : i32
    %c0_i32_2 = arith.constant 0 : i32
    return %arg0, %c0_i32, %c0_i32_0, %c0_i32_1 : i32, i32, i32, i32
  }
  func.func @transform_1(%arg0: i32) -> (i32, i32) {
    %c0_i32 = arith.constant 0 : i32
    %c0_i32_0 = arith.constant 0 : i32
    %c0_i32_1 = arith.constant 0 : i32
    return %c0_i32, %c0_i32_0 : i32, i32
  }
  func.func @transform_2(%arg0: i32) -> (i32, i32) {
    %c0_i32 = arith.constant 0 : i32
    %c0_i32_0 = arith.constant 0 : i32
    %c0_i32_1 = arith.constant 0 : i32
    return %c0_i32, %c0_i32_0 : i32, i32
  }
  func.func @transform_3(%arg0: i32) -> (i32, i32, i32) {
    %c0_i32 = arith.constant 0 : i32
    %c0_i32_0 = arith.constant 0 : i32
    %c0_i32_1 = arith.constant 0 : i32
    %c0_i32_2 = arith.constant 0 : i32
    return %c0_i32, %c0_i32_0, %c0_i32_1 : i32, i32, i32
  }
  func.func @transform_4(%arg0: i32) -> (i32, i32) {
    %c0_i32 = arith.constant 0 : i32
    %c0_i32_0 = arith.constant 0 : i32
    return %arg0, %c0_i32 : i32, i32
  }
  func.func @transform_5(%arg0: i32) -> (i32, i32, i32) {
    %c0_i32 = arith.constant 0 : i32
    %c0_i32_0 = arith.constant 0 : i32
    %c0_i32_1 = arith.constant 0 : i32
    return %arg0, %c0_i32, %c0_i32_0 : i32, i32, i32
  }
}

module attributes {stable_mosaic.version = 11 : i64} {
  func.func @_pw_kernel(%arg0: i32, %arg1: memref<128x32xf32, #tpu.memory_space<vmem>>, %arg2: memref<1x32xf32, #tpu.memory_space<vmem>>, %arg3: memref<1x32xf32, #tpu.memory_space<vmem>>, %arg4: memref<32x128xbf16, #tpu.memory_space<vmem>>, %arg5: memref<128x128xbf16, #tpu.memory_space<vmem>>) attributes {dimension_semantics = [#tpu.dimension_semantics<parallel>], iteration_bounds = array<i64: 4>, scalar_prefetch = 0 : i64, scratch_operands = 0 : i64, tpu.core_type = #tpu.core_type<tc>, window_params = [{transform_indices = @transform_0, window_bounds = array<i64: 128, 32>}, {pipeline_mode = #tpu.pipeline_mode<synchronous>, transform_indices = @transform_1, window_bounds = array<i64: 1, 32>}, {pipeline_mode = #tpu.pipeline_mode<synchronous>, transform_indices = @transform_2, window_bounds = array<i64: 1, 32>}, {pipeline_mode = #tpu.pipeline_mode<synchronous>, transform_indices = @transform_3, window_bounds = array<i64: 32, 128>}, {transform_indices = @transform_4, window_bounds = array<i64: 128, 128>}]} {
    %c0 = arith.constant 0 : index
    %c0_0 = arith.constant 0 : index
    %0 = vector.load %arg1[%c0, %c0_0] : memref<128x32xf32, #tpu.memory_space<vmem>>, vector<128x32xf32>
    %c0_1 = arith.constant 0 : index
    %c0_2 = arith.constant 0 : index
    %1 = vector.load %arg2[%c0_1, %c0_2] : memref<1x32xf32, #tpu.memory_space<vmem>>, vector<1x32xf32>
    %2 = vector.broadcast %1 : vector<1x32xf32> to vector<128x32xf32>
    %3 = arith.mulf %0, %2 : vector<128x32xf32>
    %c0_3 = arith.constant 0 : index
    %c0_4 = arith.constant 0 : index
    %4 = vector.load %arg3[%c0_3, %c0_4] : memref<1x32xf32, #tpu.memory_space<vmem>>, vector<1x32xf32>
    %5 = vector.broadcast %4 : vector<1x32xf32> to vector<128x32xf32>
    %6 = arith.addf %3, %5 : vector<128x32xf32>
    %cst = arith.constant 0.000000e+00 : f32
    %7 = vector.broadcast %cst : f32 to vector<128x32xf32>
    %8 = arith.maximumf %6, %7 : vector<128x32xf32>
    %9 = arith.truncf %8 : vector<128x32xf32> to vector<128x32xbf16>
    %c0_5 = arith.constant 0 : index
    %c0_6 = arith.constant 0 : index
    %10 = vector.load %arg4[%c0_5, %c0_6] : memref<32x128xbf16, #tpu.memory_space<vmem>>, vector<32x128xbf16>
    %cst_7 = arith.constant dense<0.000000e+00> : vector<128x128xf32>
    %11 = tpu.matmul %9, %10, %cst_7 {dimension_numbers = #tpu.dot_dimension_numbers<[1], [0], [0], [1], [0, 0, 1, 1], [], []>} : vector<128x32xbf16>, vector<32x128xbf16>, vector<128x128xf32> -> vector<128x128xf32>
    %12 = arith.truncf %11 : vector<128x128xf32> to vector<128x128xbf16>
    %c0_8 = arith.constant 0 : index
    %c0_9 = arith.constant 0 : index
    %13 = vector.load %arg5[%c0_8, %c0_9] : memref<128x128xbf16, #tpu.memory_space<vmem>>, vector<128x128xbf16>
    tpu.vector_store %arg5[%c0_8, %c0_9], %12 {strides = array<i32>} : memref<128x128xbf16, #tpu.memory_space<vmem>>, vector<128x128xbf16>,
    return
  }
  func.func @transform_0(%arg0: i32) -> (i32, i32) {
    %c0_i32 = arith.constant 0 : i32
    %c0_i32_0 = arith.constant 0 : i32
    return %arg0, %c0_i32 : i32, i32
  }
  func.func @transform_1(%arg0: i32) -> (i32, i32) {
    %c0_i32 = arith.constant 0 : i32
    %c0_i32_0 = arith.constant 0 : i32
    %c0_i32_1 = arith.constant 0 : i32
    return %c0_i32, %c0_i32_0 : i32, i32
  }
  func.func @transform_2(%arg0: i32) -> (i32, i32) {
    %c0_i32 = arith.constant 0 : i32
    %c0_i32_0 = arith.constant 0 : i32
    %c0_i32_1 = arith.constant 0 : i32
    return %c0_i32, %c0_i32_0 : i32, i32
  }
  func.func @transform_3(%arg0: i32) -> (i32, i32) {
    %c0_i32 = arith.constant 0 : i32
    %c0_i32_0 = arith.constant 0 : i32
    %c0_i32_1 = arith.constant 0 : i32
    return %c0_i32, %c0_i32_0 : i32, i32
  }
  func.func @transform_4(%arg0: i32) -> (i32, i32) {
    %c0_i32 = arith.constant 0 : i32
    %c0_i32_0 = arith.constant 0 : i32
    return %arg0, %c0_i32 : i32, i32
  }
}

module attributes {stable_mosaic.version = 11 : i64} {
  func.func @_pw_res_kernel(%arg0: i32, %arg1: memref<128x128xbf16, #tpu.memory_space<vmem>>, %arg2: memref<1x128xf32, #tpu.memory_space<vmem>>, %arg3: memref<1x128xf32, #tpu.memory_space<vmem>>, %arg4: memref<128x128xbf16, #tpu.memory_space<vmem>>, %arg5: memref<128x128xbf16, #tpu.memory_space<vmem>>, %arg6: memref<128x128xf32, #tpu.memory_space<vmem>>) attributes {dimension_semantics = [#tpu.dimension_semantics<parallel>], iteration_bounds = array<i64: 4>, scalar_prefetch = 0 : i64, scratch_operands = 0 : i64, tpu.core_type = #tpu.core_type<tc>, window_params = [{transform_indices = @transform_0, window_bounds = array<i64: 128, 128>}, {pipeline_mode = #tpu.pipeline_mode<synchronous>, transform_indices = @transform_1, window_bounds = array<i64: 1, 128>}, {pipeline_mode = #tpu.pipeline_mode<synchronous>, transform_indices = @transform_2, window_bounds = array<i64: 1, 128>}, {pipeline_mode = #tpu.pipeline_mode<synchronous>, transform_indices = @transform_3, window_bounds = array<i64: 128, 128>}, {transform_indices = @transform_4, window_bounds = array<i64: 128, 128>}, {transform_indices = @transform_5, window_bounds = array<i64: 128, 128>}]} {
    %c0 = arith.constant 0 : index
    %c0_0 = arith.constant 0 : index
    %0 = vector.load %arg1[%c0, %c0_0] : memref<128x128xbf16, #tpu.memory_space<vmem>>, vector<128x128xbf16>
    %1 = arith.extf %0 : vector<128x128xbf16> to vector<128x128xf32>
    %c0_1 = arith.constant 0 : index
    %c0_2 = arith.constant 0 : index
    %2 = vector.load %arg2[%c0_1, %c0_2] : memref<1x128xf32, #tpu.memory_space<vmem>>, vector<1x128xf32>
    %3 = vector.broadcast %2 : vector<1x128xf32> to vector<128x128xf32>
    %4 = arith.mulf %1, %3 : vector<128x128xf32>
    %c0_3 = arith.constant 0 : index
    %c0_4 = arith.constant 0 : index
    %5 = vector.load %arg3[%c0_3, %c0_4] : memref<1x128xf32, #tpu.memory_space<vmem>>, vector<1x128xf32>
    %6 = vector.broadcast %5 : vector<1x128xf32> to vector<128x128xf32>
    %7 = arith.addf %4, %6 : vector<128x128xf32>
    %cst = arith.constant 0.000000e+00 : f32
    %8 = vector.broadcast %cst : f32 to vector<128x128xf32>
    %9 = arith.maximumf %7, %8 : vector<128x128xf32>
    %10 = arith.truncf %9 : vector<128x128xf32> to vector<128x128xbf16>
    %c0_5 = arith.constant 0 : index
    %c0_6 = arith.constant 0 : index
    %11 = vector.load %arg4[%c0_5, %c0_6] : memref<128x128xbf16, #tpu.memory_space<vmem>>, vector<128x128xbf16>
    %cst_7 = arith.constant dense<0.000000e+00> : vector<128x128xf32>
    %12 = tpu.matmul %10, %11, %cst_7 {dimension_numbers = #tpu.dot_dimension_numbers<[1], [0], [0], [1], [0, 0, 1, 1], [], []>} : vector<128x128xbf16>, vector<128x128xbf16>, vector<128x128xf32> -> vector<128x128xf32>
    %c0_8 = arith.constant 0 : index
    %c0_9 = arith.constant 0 : index
    %13 = vector.load %arg5[%c0_8, %c0_9] : memref<128x128xbf16, #tpu.memory_space<vmem>>, vector<128x128xbf16>
    %14 = arith.extf %13 : vector<128x128xbf16> to vector<128x128xf32>
    %15 = arith.addf %12, %14 : vector<128x128xf32>
    %c0_10 = arith.constant 0 : index
    %c0_11 = arith.constant 0 : index
    %16 = vector.load %arg6[%c0_10, %c0_11] : memref<128x128xf32, #tpu.memory_space<vmem>>, vector<128x128xf32>
    tpu.vector_store %arg6[%c0_10, %c0_11], %15 {strides = array<i32>} : memref<128x128xf32, #tpu.memory_space<vmem>>, vector<128x128xf32>,
    return
  }
  func.func @transform_0(%arg0: i32) -> (i32, i32) {
    %c0_i32 = arith.constant 0 : i32
    %c0_i32_0 = arith.constant 0 : i32
    return %arg0, %c0_i32 : i32, i32
  }
  func.func @transform_1(%arg0: i32) -> (i32, i32) {
    %c0_i32 = arith.constant 0 : i32
    %c0_i32_0 = arith.constant 0 : i32
    %c0_i32_1 = arith.constant 0 : i32
    return %c0_i32, %c0_i32_0 : i32, i32
  }
  func.func @transform_2(%arg0: i32) -> (i32, i32) {
    %c0_i32 = arith.constant 0 : i32
    %c0_i32_0 = arith.constant 0 : i32
    %c0_i32_1 = arith.constant 0 : i32
    return %c0_i32, %c0_i32_0 : i32, i32
  }
  func.func @transform_3(%arg0: i32) -> (i32, i32) {
    %c0_i32 = arith.constant 0 : i32
    %c0_i32_0 = arith.constant 0 : i32
    %c0_i32_1 = arith.constant 0 : i32
    return %c0_i32, %c0_i32_0 : i32, i32
  }
  func.func @transform_4(%arg0: i32) -> (i32, i32) {
    %c0_i32 = arith.constant 0 : i32
    %c0_i32_0 = arith.constant 0 : i32
    return %arg0, %c0_i32 : i32, i32
  }
  func.func @transform_5(%arg0: i32) -> (i32, i32) {
    %c0_i32 = arith.constant 0 : i32
    %c0_i32_0 = arith.constant 0 : i32
    return %arg0, %c0_i32 : i32, i32
  }
}

</mosaic_0001>

<bundles_post_ra>
// kernel: bottleneck_forward.4
= control target key start
LH: loop header
LB: loop body
LE: loop exit
PB: predicated region body
PF: predicated region fallthrough
CT: control target
= control target key end

     0   :  { %s876_s18 = smov 0   ;;  %s989_s0 = inlined_call_operand.vmem [shape: f32[512,32], index: 0, kind: input, shape index: {}]   ;;  %s990_s1 = inlined_call_operand.vmem [shape: f32[1,32], index: 1, kind: input, shape index: {}]   ;;  %s991_s2 = inlined_call_operand.vmem [shape: f32[1,32], index: 2, kind: input, shape index: {}]   ;;  %s992_s3 = inlined_call_operand.vmem [shape: bf16[32,128], index: 3, kind: input, shape index: {}]   ;;  %s993_s4 = inlined_call_operand.vmem [shape: bf16[512,128], index: 4, kind: output, shape index: {0}]   ;;  %s994_s5 = inlined_call_operand.vmem [shape: f32[4,2,128], index: 5, kind: output, shape index: {1}]  }
   0x1 LB: > { %s882_s19 = sadd.s32 4294967295, %s844_s18   ;;  %p695_p0 = scmp.ge.s32.totalorder %s844_s18, 1  ;;  %s844_s18 = sphi %s876_s18, %s16_s18  }
   0x2   : > { %p191_p1 = scmp.lt.s32.totalorder %s844_s18, 5 }
   0x4   : > { %p192_p2 = pnand %p695_p0, %p191_p1 }
   0x5   : > { %v836_v0 = vld [vmem:[%s992_s3] sm:$0xff] (!%p192_p2)   ;;  %s696_s22 = sshll.u32 (!%p192_p2), %s882_s19, 4  ;;  %v837_v1 = vld [vmem:[%s992_s3 + $0x8] sm:$0xff] (!%p192_p2)   ;;  %vm342_vm0 = vcmask (!%p192_p2), 261120   ;;  %p235_p4 = scmp.lt.s32.totalorder (!%p192_p2), %s882_s19, 3 }
   0x6   : > { %195 = sbr.rel (%p192_p2) target bundleno = 286 (0x11e), region = 36  ;;  %p224_p3 = scmp.lt.s32.totalorder (!%p192_p2), %s696_s22, 63  ;;  %804 = vmatprep.subr.bf16.mxu0 (!%p192_p2), %v836_v0  ;;  %824 = vmatprep.subr.bf16.mxu1 (!%p192_p2), %v836_v0  ;;  %v899_v2 = vld [vmem:[%s990_s1] ss:$0 sm:$0xff] (!%p192_p2) }
   0x7   : > { %805 = vmatpush3.bf16.msra.mxu0 (!%p192_p2), %v836_v0  ;;  %826 = vmatpush3.bf16.msra.mxu1 (!%p192_p2), %v836_v0  ;;  %v909_v3 = vld [vmem:[%s991_s2] ss:$0 sm:$0xff] (!%p192_p2) }
   0x8   : > { %806 = vmatprep.subr.bf16.mxu0 (!%p192_p2), %v837_v1  ;;  %825 = vmatprep.subr.bf16.mxu1 (!%p192_p2), %v837_v1 }
   0xb   : > { %807 = vmatpush3.bf16.msra.mxu0 (!%p192_p2), %v837_v1  ;;  %827 = vmatpush3.bf16.msra.mxu1 (!%p192_p2), %v837_v1 }
   0xd   : > { %s996_s22 = smov (!%p224_p3, %s696_s22), 63  ;;  %s998_s19 = smov (!%p235_p4, %s882_s19), 3 }
   0xe   : > { %s697_s25 = sshll.u32 %s996_s22, 3  ;;  %s699_s8 = sshll.u32 %s996_s22, 2 }
   0xf   : > { %s904_s30 = scalar_lea.vmem %s989_s0, %s697_s25  ;;  %s971_s11 = scalar_lea.vmem %s993_s4, %s699_s8 }
  0x10   : > { %v240_v4 = vld [vmem:[%s904_s30] sm:$0xff]  ;;  %v241_v5 = vld [vmem:[%s904_s30 + $0x8] sm:$0xff]  ;;  %v242_v6 = vld [vmem:[%s904_s30 + $0x10] sm:$0xff]  ;;  %s700_s12 = sshll.u32 %s998_s19, 1 }
  0x11   : > { %v263_v7 = vmul.f32 %v899_v2, %v240_v4  ;;  %v264_v8 = vmul.f32 %v899_v2, %v241_v5  ;;  %v243_v9 = vld [vmem:[%s904_s30 + $0x18] sm:$0xff]  ;;  %v265_v10 = vmul.f32 %v899_v2, %v242_v6  ;;  %v244_v11 = vld [vmem:[%s904_s30 + $0x20] sm:$0xff]  ;;  %v245_v12 = vld [vmem:[%s904_s30 + $0x28] sm:$0xff]  ;;  %s238_s15 = scalar_lea.vmem %s994_s5, %s700_s12 }
  0x12   : > { %v266_v13 = vmul.f32 %v899_v2, %v243_v9  ;;  %v267_v14 = vmul.f32 %v899_v2, %v244_v11  ;;  %v268_v15 = vmul.f32 %v899_v2, %v245_v12  ;;  %v246_v16 = vld [vmem:[%s904_s30 + $0x30] sm:$0xff]  ;;  %v247_v17 = vld [vmem:[%s904_s30 + $0x38] sm:$0xff]  ;;  %v248_v26 = vld [vmem:[%s904_s30 + $0x40] sm:$0xff] }
  0x13   : > { %v286_v18 = vadd.f32 %v909_v3, %v263_v7  ;;  %v287_v19 = vadd.f32 %v909_v3, %v264_v8  ;;  %v288_v20 = vadd.f32 %v909_v3, %v265_v10  ;;  %v269_v21 = vmul.f32 %v899_v2, %v246_v16  ;;  %v249_v27 = vld [vmem:[%s904_s30 + $0x48] sm:$0xff]  ;;  %v250_v32 = vld [vmem:[%s904_s30 + $0x50] sm:$0xff]  ;;  %v251_v37 = vld [vmem:[%s904_s30 + $0x58] sm:$0xff] }
  0x14   : > { %v289_v22 = vadd.f32 %v909_v3, %v266_v13  ;;  %v290_v23 = vadd.f32 %v909_v3, %v267_v14  ;;  %v291_v24 = vadd.f32 %v909_v3, %v268_v15  ;;  %v270_v25 = vmul.f32 %v899_v2, %v247_v17  ;;  %v252_v38 = vld [vmem:[%s904_s30 + $0x60] sm:$0xff]  ;;  %v253_v42 = vld [vmem:[%s904_s30 + $0x68] sm:$0xff]  ;;  %v254_v43 = vld [vmem:[%s904_s30 + $0x70] sm:$0xff] }
  0x15   : > { %v302_v28 = vmax.f32 %v286_v18, 0.0  ;;  %v303_v29 = vmax.f32 %v287_v19, 0.0  ;;  %v304_v30 = vmax.f32 %v288_v20, 0.0  ;;  %v292_v31 = vadd.f32 %v909_v3, %v269_v21  ;;  %v255_v52 = vld [vmem:[%s904_s30 + $0x78] sm:$0xff] }
  0x16   : > { %v305_v33 = vmax.f32 %v289_v22, 0.0  ;;  %v306_v34 = vmax.f32 %v290_v23, 0.0  ;;  %v307_v35 = vmax.f32 %v291_v24, 0.0  ;;  %v293_v36 = vadd.f32 %v909_v3, %v270_v25 }
  0x17   : > { %v318_v39 = vpack.c.bf16 %v303_v29, %v302_v28  ;;  %v271_v40 = vmul.f32 %v899_v2, %v248_v26  ;;  %v272_v41 = vmul.f32 %v899_v2, %v249_v27  ;;  %v308_v46 = vmax.f32 %v292_v31, 0.0 }
  0x18   : > { %v319_v44 = vpack.c.bf16 %v305_v33, %v304_v30  ;;  %v320_v45 = vpack.c.bf16 %v307_v35, %v306_v34  ;;  %v273_v47 = vmul.f32 %v899_v2, %v250_v32  ;;  %v274_v50 = vmul.f32 %v899_v2, %v251_v37 }
  0x19   : > { %808 = vmatprep.mubr.msk.bf16.mxu0 %vm342_vm0, %v318_v39  ;;  %v294_v48 = vadd.f32 %v909_v3, %v271_v40  ;;  %v295_v49 = vadd.f32 %v909_v3, %v272_v41  ;;  %v275_v51 = vmul.f32 %v899_v2, %v252_v38  ;;  %v309_v53 = vmax.f32 %v293_v36, 0.0 }
  0x1a   : > { %809 = vmatmul.mubr.msk.bf16.vlgmr.msra.gmra.mrb[0].mxu0 %vm342_vm0, %v319_v44  ;;  %v296_v54 = vadd.f32 %v909_v3, %v273_v47  ;;  %v276_v55 = vmul.f32 %v899_v2, %v253_v42  ;;  %v277_v56 = vmul.f32 %v899_v2, %v254_v43  ;;  %v297_v59 = vadd.f32 %v909_v3, %v274_v50 }
  0x1b   : > { %812 = vmatprep.mubr.msk.bf16.mxu0 %vm342_vm0, %v320_v45  ;;  %v310_v57 = vmax.f32 %v294_v48, 0.0  ;;  %v311_v58 = vmax.f32 %v295_v49, 0.0  ;;  %v298_v60 = vadd.f32 %v909_v3, %v275_v51  ;;  %v278_v63 = vmul.f32 %v899_v2, %v255_v52 }
  0x1c   : > { %v312_v61 = vmax.f32 %v296_v54, 0.0  ;;  %v299_v62 = vadd.f32 %v909_v3, %v276_v55  ;;  %v313_v1 = vmax.f32 %v297_v59, 0.0  ;;  %v300_v5 = vadd.f32 %v909_v3, %v277_v56 }
  0x1d   : > { %v322_v0 = vpack.c.bf16 %v311_v58, %v310_v57  ;;  %v314_v4 = vmax.f32 %v298_v60, 0.0  ;;  %v321_v6 = vpack.c.bf16 %v309_v53, %v308_v46  ;;  %v301_v8 = vadd.f32 %v909_v3, %v278_v63 }
  0x1e   : > { %v315_v7 = vmax.f32 %v299_v62, 0.0  ;;  %v323_v9 = vpack.c.bf16 %v313_v1, %v312_v61  ;;  %v316_v11 = vmax.f32 %v300_v5, 0.0 }
  0x1f   : > { %816 = vmatprep.mubr.msk.bf16.mxu1 %vm342_vm0, %v322_v0  ;;  %v317_v12 = vmax.f32 %v301_v8, 0.0 }
  0x20   : > { %v324_v10 = vpack.c.bf16 %v315_v7, %v314_v4  ;;  %817 = vmatmul.mubr.msk.bf16.vlgmr.msra.gmra.mrb[0].mxu1 %vm342_vm0, %v323_v9 }
  0x21   : > { %v325_v2 = vpack.c.bf16 %v317_v12, %v316_v11 }
  0x22   : > { %813 = vmatmul.mubr.msk.bf16.gmra.mrb[4].mxu0 %vm342_vm0, %v321_v6  ;;  %820 = vmatprep.mubr.msk.bf16.mxu1 %vm342_vm0, %v324_v10 }
  0x28   : > { %821 = vmatmul.mubr.msk.bf16.gmra.mrb[4].mxu1 %vm342_vm0, %v325_v2 }
  0xed   : > { %v810_v13 = vpop.f32.mrb[0].mxu0 }
  0xee   : > { %v401_v14 = vpop.f32.mrb[1].mxu0  ;;  %v568_v21 = vmul.f32 %v810_v13, %v810_v13 }
  0xef   : > { %v811_v3 = vpop.f32.mrb[2].mxu0  ;;  %v566_v17 = vmul.f32 %v401_v14, %v401_v14 }
  0xf0   : > { %v755_v15 = vpack.c.bf16 %v811_v3, %v810_v13  ;;  %v404_v16 = vpop.f32.mrb[3].mxu0  ;;  %v569_v25 = vmul.f32 %v811_v3, %v811_v3 }
  0xf1   : > { %v750_v18 = vpack.c.bf16 %v404_v16, %v401_v14  ;;  %v544_v19 = vadd.f32 %v404_v16, %v401_v14  ;;  %v567_v20 = vmul.f32 %v404_v16, %v404_v16 }
  0xf2   : > { %787 = vst [vmem:[%s971_s11 + $0x8] sm:$0xff] %v755_v15  }
  0xf3   : > { %751 = vst [vmem:[%s971_s11] sm:$0xff] %v750_v18   ;;  %v545_v22 = vadd.f32 %v810_v13, %v544_v19  ;;  %v582_v23 = vadd.f32 %v567_v20, %v566_v17  ;;  %v818_v24 = vpop.f32.mrb[0].mxu1 }
  0xf4   : > { %v433_v29 = vpop.f32.mrb[1].mxu1  ;;  %v576_v63 = vmul.f32 %v818_v24, %v818_v24 }
  0xf5   : > { %v583_v26 = vadd.f32 %v582_v23, %v568_v21  ;;  %v814_v27 = vpop.f32.mrb[4].mxu0  ;;  %v546_v28 = vadd.f32 %v811_v3, %v545_v22  ;;  %v819_v31 = vpop.f32.mrb[2].mxu1  ;;  %v574_v52 = vmul.f32 %v433_v29, %v433_v29 }
  0xf6   : > { %v417_v30 = vpop.f32.mrb[5].mxu0  ;;  %v775_v36 = vpack.c.bf16 %v819_v31, %v818_v24  ;;  %v436_v37 = vpop.f32.mrb[3].mxu1  ;;  %v572_v45 = vmul.f32 %v814_v27, %v814_v27  ;;  %v577_v4 = vmul.f32 %v819_v31, %v819_v31 }
  0xf7   : > { %v547_v32 = vadd.f32 %v546_v28, %v417_v30  ;;  %v570_v33 = vmul.f32 %v417_v30, %v417_v30  ;;  %v584_v34 = vadd.f32 %v583_v26, %v569_v25  ;;  %v815_v35 = vpop.f32.mrb[6].mxu0  ;;  %v770_v40 = vpack.c.bf16 %v436_v37, %v433_v29 }
  0xf8   : > { %v765_v38 = vpack.c.bf16 %v815_v35, %v814_v27  ;;  %v420_v39 = vpop.f32.mrb[7].mxu0  ;;  %791 = vst [vmem:[%s971_s11 + $0x28] sm:$0xff] %v775_v36   ;;  %v573_v49 = vmul.f32 %v815_v35, %v815_v35  ;;  %v575_v62 = vmul.f32 %v436_v37, %v436_v37 }
  0xf9   : > { %v585_v41 = vadd.f32 %v584_v34, %v570_v33  ;;  %v760_v42 = vpack.c.bf16 %v420_v39, %v417_v30  ;;  %v548_v43 = vadd.f32 %v547_v32, %v420_v39  ;;  %v571_v44 = vmul.f32 %v420_v39, %v420_v39  ;;  %790 = vst [vmem:[%s971_s11 + $0x20] sm:$0xff] %v770_v40  }
  0xfa   : > { %789 = vst [vmem:[%s971_s11 + $0x18] sm:$0xff] %v765_v38  }
  0xfb   : > { %788 = vst [vmem:[%s971_s11 + $0x10] sm:$0xff] %v760_v42   ;;  %v549_v46 = vadd.f32 %v814_v27, %v548_v43  ;;  %v586_v47 = vadd.f32 %v585_v41, %v571_v44  ;;  %v822_v48 = vpop.f32.mrb[4].mxu1 }
  0xfc   : > { %v449_v53 = vpop.f32.mrb[5].mxu1  ;;  %v580_v2 = vmul.f32 %v822_v48, %v822_v48 }
  0xfd   : > { %v587_v50 = vadd.f32 %v586_v47, %v572_v45  ;;  %v550_v51 = vadd.f32 %v815_v35, %v549_v46  ;;  %v823_v54 = vpop.f32.mrb[6].mxu1  ;;  %v578_v7 = vmul.f32 %v449_v53, %v449_v53 }
  0xfe   : > { %v785_v57 = vpack.c.bf16 %v823_v54, %v822_v48  ;;  %v452_v58 = vpop.f32.mrb[7].mxu1  ;;  %v581_v3 = vmul.f32 %v823_v54, %v823_v54 }
  0xff   : > { %v551_v55 = vadd.f32 %v550_v51, %v433_v29  ;;  %v588_v56 = vadd.f32 %v587_v50, %v573_v49  ;;  %v780_v59 = vpack.c.bf16 %v452_v58, %v449_v53  ;;  %v579_v12 = vmul.f32 %v452_v58, %v452_v58 }
 0x100   : > { %793 = vst [vmem:[%s971_s11 + $0x38] sm:$0xff] %v785_v57  }
 0x101   : > { %v589_v60 = vadd.f32 %v588_v56, %v574_v52  ;;  %v552_v61 = vadd.f32 %v551_v55, %v436_v37  ;;  %792 = vst [vmem:[%s971_s11 + $0x30] sm:$0xff] %v780_v59  }
 0x103   : > { %v553_v0 = vadd.f32 %v818_v24, %v552_v61  ;;  %v590_v1 = vadd.f32 %v589_v60, %v575_v62 }
 0x105   : > { %v591_v5 = vadd.f32 %v590_v1, %v576_v63  ;;  %v554_v6 = vadd.f32 %v819_v31, %v553_v0 }
 0x107   : > { %v555_v8 = vadd.f32 %v554_v6, %v449_v53  ;;  %v592_v9 = vadd.f32 %v591_v5, %v577_v4 }
 0x109   : > { %v593_v10 = vadd.f32 %v592_v9, %v578_v7  ;;  %v556_v11 = vadd.f32 %v555_v8, %v452_v58 }
 0x10b   : > { %v557_v13 = vadd.f32 %v822_v48, %v556_v11  ;;  %v594_v14 = vadd.f32 %v593_v10, %v579_v12 }
 0x10d   : > { %v558_v15 = vadd.f32 %v823_v54, %v557_v13  ;;  %v595_v16 = vadd.f32 %v594_v14, %v580_v2 }
 0x10f   : > { %v559_v17 = vrot.slane %v558_v15, 4  ;;  %v596_v18 = vadd.f32 %v595_v16, %v581_v3 }
 0x111   : > { %v560_v19 = vadd.f32 %v559_v17, %v558_v15  ;;  %v597_v20 = vrot.slane %v596_v18, 4 }
 0x113   : > { %v561_v21 = vrot.slane %v560_v19, 2  ;;  %v598_v22 = vadd.f32 %v597_v20, %v596_v18 }
 0x115   : > { %v562_v23 = vadd.f32 %v561_v21, %v560_v19  ;;  %v599_v24 = vrot.slane %v598_v22, 2 }
 0x117   : > { %v563_v25 = vrot.slane %v562_v23, 1  ;;  %v600_v26 = vadd.f32 %v599_v24, %v598_v22 }
 0x119   : > { %v564_v27 = vadd.f32 %v563_v25, %v562_v23  ;;  %v601_v28 = vrot.slane %v600_v26, 1 }
 0x11b   : > { %565 = vst [vmem:[%s238_s15] sm:$0x1] %v564_v27  ;;  %v602_v29 = vadd.f32 %v601_v28, %v600_v26 }
 0x11d   : > { %603 = vst [vmem:[%s238_s15 + $0x1] sm:$0x1] %v602_v29 }
 0x11e PF: > { %s16_s18 = sadd.s32 1, %s844_s18  }
 0x11f   : > { %p13_p5 = scmp.ge.s32.totalorder %s16_s18, 6  }
 0x121   :  { %15 = sbr.rel (!%p13_p5) target bundleno = 1 (0x1), region = 78 }

// kernel: bottleneck_forward.6
= control target key start
LH: loop header
LB: loop body
LE: loop exit
PB: predicated region body
PF: predicated region fallthrough
CT: control target
= control target key end

     0   :  { %s741_s15 = smov 0   ;;  %s836_s0 = inlined_call_operand.vmem [shape: f32[512,32], index: 0, kind: input, shape index: {}]   ;;  %s837_s1 = inlined_call_operand.vmem [shape: f32[1,32], index: 1, kind: input, shape index: {}]   ;;  %s838_s2 = inlined_call_operand.vmem [shape: f32[1,32], index: 2, kind: input, shape index: {}]   ;;  %s839_s3 = inlined_call_operand.vmem [shape: bf16[32,128], index: 3, kind: input, shape index: {}]   ;;  %s840_s4 = inlined_call_operand.vmem [shape: bf16[512,128], index: 4, kind: output, shape index: {}]  }
   0x1 LB: > { %s562_s16 = sadd.s32 4294967295, %s714_s15   ;;  %p566_p0 = scmp.ge.s32.totalorder %s714_s15, 1  ;;  %s714_s15 = sphi %s741_s15, %s14_s15  }
   0x2   : > { %p163_p1 = scmp.lt.s32.totalorder %s714_s15, 5 }
   0x4   : > { %p164_p2 = pnand %p566_p0, %p163_p1 }
   0x5   : > { %v706_v0 = vld [vmem:[%s839_s3] sm:$0xff] (!%p164_p2)   ;;  %s567_s19 = sshll.u32 (!%p164_p2), %s562_s16, 4  ;;  %v707_v1 = vld [vmem:[%s839_s3 + $0x8] sm:$0xff] (!%p164_p2)   ;;  %vm304_vm0 = vcmask (!%p164_p2), 261120  }
   0x6   : > { %167 = sbr.rel (%p164_p2) target bundleno = 254 (0xfe), region = 36  ;;  %p190_p3 = scmp.lt.s32.totalorder (!%p164_p2), %s567_s19, 63  ;;  %674 = vmatprep.subr.bf16.mxu0 (!%p164_p2), %v706_v0  ;;  %694 = vmatprep.subr.bf16.mxu1 (!%p164_p2), %v706_v0  ;;  %v761_v2 = vld [vmem:[%s837_s1] ss:$0 sm:$0xff] (!%p164_p2) }
   0x7   : > { %675 = vmatpush3.bf16.msra.mxu0 (!%p164_p2), %v706_v0  ;;  %696 = vmatpush3.bf16.msra.mxu1 (!%p164_p2), %v706_v0  ;;  %v771_v3 = vld [vmem:[%s838_s2] ss:$0 sm:$0xff] (!%p164_p2) }
   0x8   : > { %676 = vmatprep.subr.bf16.mxu0 (!%p164_p2), %v707_v1  ;;  %695 = vmatprep.subr.bf16.mxu1 (!%p164_p2), %v707_v1 }
   0xb   : > { %677 = vmatpush3.bf16.msra.mxu0 (!%p164_p2), %v707_v1  ;;  %697 = vmatpush3.bf16.msra.mxu1 (!%p164_p2), %v707_v1 }
   0xd   : > { %s842_s19 = smov (!%p190_p3, %s567_s19), 63 }
   0xe   : > { %s568_s22 = sshll.u32 %s842_s19, 3  ;;  %s570_s30 = sshll.u32 %s842_s19, 2 }
   0xf   : > { %s766_s27 = scalar_lea.vmem %s836_s0, %s568_s22  ;;  %s199_s7 = scalar_lea.vmem %s840_s4, %s570_s30 }
  0x10   : > { %v202_v4 = vld [vmem:[%s766_s27] sm:$0xff]  ;;  %v203_v5 = vld [vmem:[%s766_s27 + $0x8] sm:$0xff]  ;;  %v204_v11 = vld [vmem:[%s766_s27 + $0x10] sm:$0xff] }
  0x11   : > { %v210_v6 = vld [vmem:[%s766_s27 + $0x40] sm:$0xff]  ;;  %v225_v7 = vmul.f32 %v761_v2, %v202_v4  ;;  %v226_v8 = vmul.f32 %v761_v2, %v203_v5  ;;  %v211_v9 = vld [vmem:[%s766_s27 + $0x48] sm:$0xff]  ;;  %v205_v12 = vld [vmem:[%s766_s27 + $0x18] sm:$0xff]  ;;  %v227_v14 = vmul.f32 %v761_v2, %v204_v11 }
  0x12   : > { %v233_v10 = vmul.f32 %v761_v2, %v210_v6  ;;  %v234_v13 = vmul.f32 %v761_v2, %v211_v9  ;;  %v228_v15 = vmul.f32 %v761_v2, %v205_v12  ;;  %v212_v16 = vld [vmem:[%s766_s27 + $0x50] sm:$0xff]  ;;  %v213_v17 = vld [vmem:[%s766_s27 + $0x58] sm:$0xff]  ;;  %v206_v26 = vld [vmem:[%s766_s27 + $0x20] sm:$0xff] }
  0x13   : > { %v248_v18 = vadd.f32 %v771_v3, %v225_v7  ;;  %v249_v19 = vadd.f32 %v771_v3, %v226_v8  ;;  %v235_v21 = vmul.f32 %v761_v2, %v212_v16  ;;  %v250_v23 = vadd.f32 %v771_v3, %v227_v14  ;;  %v207_v27 = vld [vmem:[%s766_s27 + $0x28] sm:$0xff]  ;;  %v214_v32 = vld [vmem:[%s766_s27 + $0x60] sm:$0xff]  ;;  %v208_v38 = vld [vmem:[%s766_s27 + $0x30] sm:$0xff] }
  0x14   : > { %v256_v20 = vadd.f32 %v771_v3, %v233_v10  ;;  %v257_v22 = vadd.f32 %v771_v3, %v234_v13  ;;  %v251_v24 = vadd.f32 %v771_v3, %v228_v15  ;;  %v236_v25 = vmul.f32 %v761_v2, %v213_v17  ;;  %v215_v37 = vld [vmem:[%s766_s27 + $0x68] sm:$0xff]  ;;  %v209_v43 = vld [vmem:[%s766_s27 + $0x38] sm:$0xff]  ;;  %v216_v52 = vld [vmem:[%s766_s27 + $0x70] sm:$0xff] }
  0x15   : > { %v264_v28 = vmax.f32 %v248_v18, 0.0  ;;  %v265_v29 = vmax.f32 %v249_v19, 0.0  ;;  %v258_v31 = vadd.f32 %v771_v3, %v235_v21  ;;  %v266_v34 = vmax.f32 %v250_v23, 0.0  ;;  %v217_v53 = vld [vmem:[%s766_s27 + $0x78] sm:$0xff] }
  0x16   : > { %v272_v30 = vmax.f32 %v256_v20, 0.0  ;;  %v273_v33 = vmax.f32 %v257_v22, 0.0  ;;  %v267_v35 = vmax.f32 %v251_v24, 0.0  ;;  %v259_v36 = vadd.f32 %v771_v3, %v236_v25 }
  0x17   : > { %v280_v39 = vpack.c.bf16 %v265_v29, %v264_v28  ;;  %v274_v40 = vmax.f32 %v258_v31, 0.0  ;;  %v229_v41 = vmul.f32 %v761_v2, %v206_v26  ;;  %v230_v42 = vmul.f32 %v761_v2, %v207_v27 }
  0x18   : > { %v284_v44 = vpack.c.bf16 %v273_v33, %v272_v30  ;;  %v281_v45 = vpack.c.bf16 %v267_v35, %v266_v34  ;;  %v275_v46 = vmax.f32 %v259_v36, 0.0  ;;  %v237_v47 = vmul.f32 %v761_v2, %v214_v32 }
  0x19   : > { %678 = vmatprep.mubr.msk.bf16.mxu0 %vm304_vm0, %v280_v39  ;;  %v252_v48 = vadd.f32 %v771_v3, %v229_v41  ;;  %v253_v49 = vadd.f32 %v771_v3, %v230_v42  ;;  %v238_v50 = vmul.f32 %v761_v2, %v215_v37  ;;  %v231_v51 = vmul.f32 %v761_v2, %v208_v38 }
  0x1a   : > { %686 = vmatprep.mubr.msk.bf16.mxu1 %vm304_vm0, %v284_v44  ;;  %679 = vmatmul.mubr.msk.bf16.vlgmr.msra.gmra.mrb[0].mxu0 %vm304_vm0, %v281_v45  ;;  %v285_v54 = vpack.c.bf16 %v275_v46, %v274_v40  ;;  %v260_v55 = vadd.f32 %v771_v3, %v237_v47  ;;  %v232_v56 = vmul.f32 %v761_v2, %v209_v43 }
  0x1b   : > { %v268_v57 = vmax.f32 %v252_v48, 0.0  ;;  %v269_v58 = vmax.f32 %v253_v49, 0.0  ;;  %v261_v59 = vadd.f32 %v771_v3, %v238_v50  ;;  %v254_v60 = vadd.f32 %v771_v3, %v231_v51 }
  0x1c   : > { %687 = vmatmul.mubr.msk.bf16.vlgmr.msra.gmra.mrb[0].mxu1 %vm304_vm0, %v285_v54  ;;  %v276_v61 = vmax.f32 %v260_v55, 0.0  ;;  %v255_v62 = vadd.f32 %v771_v3, %v232_v56  ;;  %v239_v63 = vmul.f32 %v761_v2, %v216_v52  ;;  %v240_v0 = vmul.f32 %v761_v2, %v217_v53 }
  0x1d   : > { %v282_v1 = vpack.c.bf16 %v269_v58, %v268_v57  ;;  %v277_v4 = vmax.f32 %v261_v59, 0.0  ;;  %v270_v5 = vmax.f32 %v254_v60, 0.0 }
  0x1e   : > { %v271_v6 = vmax.f32 %v255_v62, 0.0  ;;  %v262_v7 = vadd.f32 %v771_v3, %v239_v63  ;;  %v263_v8 = vadd.f32 %v771_v3, %v240_v0 }
  0x1f   : > { %682 = vmatprep.mubr.msk.bf16.mxu0 %vm304_vm0, %v282_v1  ;;  %v286_v9 = vpack.c.bf16 %v277_v4, %v276_v61 }
  0x20   : > { %v283_v10 = vpack.c.bf16 %v271_v6, %v270_v5  ;;  %v278_v11 = vmax.f32 %v262_v7, 0.0  ;;  %v279_v12 = vmax.f32 %v263_v8, 0.0 }
  0x21   : > { %690 = vmatprep.mubr.msk.bf16.mxu1 %vm304_vm0, %v286_v9 }
  0x22   : > { %683 = vmatmul.mubr.msk.bf16.gmra.mrb[4].mxu0 %vm304_vm0, %v283_v10  ;;  %v287_v2 = vpack.c.bf16 %v279_v12, %v278_v11 }
  0x24   : > { %691 = vmatmul.mubr.msk.bf16.gmra.mrb[4].mxu1 %vm304_vm0, %v287_v2 }
  0xed   : > { %v680_v13 = vpop.f32.mrb[0].mxu0 }
  0xee   : > { %v363_v14 = vpop.f32.mrb[1].mxu0 }
  0xef   : > { %v688_v15 = vpop.f32.mrb[0].mxu1  ;;  %v681_v3 = vpop.f32.mrb[2].mxu0 }
  0xf0   : > { %v395_v16 = vpop.f32.mrb[1].mxu1  ;;  %v625_v17 = vpack.c.bf16 %v681_v3, %v680_v13  ;;  %v366_v18 = vpop.f32.mrb[3].mxu0 }
  0xf1   : > { %v689_v19 = vpop.f32.mrb[2].mxu1  ;;  %v620_v20 = vpack.c.bf16 %v366_v18, %v363_v14 }
  0xf2   : > { %657 = vst [vmem:[%s199_s7 + $0x8] sm:$0xff] %v625_v17   ;;  %v645_v21 = vpack.c.bf16 %v689_v19, %v688_v15  ;;  %v398_v22 = vpop.f32.mrb[3].mxu1 }
  0xf3   : > { %621 = vst [vmem:[%s199_s7] sm:$0xff] %v620_v20   ;;  %v640_v23 = vpack.c.bf16 %v398_v22, %v395_v16 }
  0xf4   : > { %661 = vst [vmem:[%s199_s7 + $0x28] sm:$0xff] %v645_v21  }
  0xf5   : > { %660 = vst [vmem:[%s199_s7 + $0x20] sm:$0xff] %v640_v23   ;;  %v684_v24 = vpop.f32.mrb[4].mxu0 }
  0xf6   : > { %v379_v25 = vpop.f32.mrb[5].mxu0 }
  0xf7   : > { %v692_v26 = vpop.f32.mrb[4].mxu1  ;;  %v685_v27 = vpop.f32.mrb[6].mxu0 }
  0xf8   : > { %v411_v28 = vpop.f32.mrb[5].mxu1  ;;  %v635_v29 = vpack.c.bf16 %v685_v27, %v684_v24  ;;  %v382_v30 = vpop.f32.mrb[7].mxu0 }
  0xf9   : > { %v693_v31 = vpop.f32.mrb[6].mxu1  ;;  %v630_v32 = vpack.c.bf16 %v382_v30, %v379_v25 }
  0xfa   : > { %659 = vst [vmem:[%s199_s7 + $0x18] sm:$0xff] %v635_v29   ;;  %v655_v33 = vpack.c.bf16 %v693_v31, %v692_v26  ;;  %v414_v34 = vpop.f32.mrb[7].mxu1 }
  0xfb   : > { %658 = vst [vmem:[%s199_s7 + $0x10] sm:$0xff] %v630_v32   ;;  %v650_v35 = vpack.c.bf16 %v414_v34, %v411_v28 }
  0xfc   : > { %663 = vst [vmem:[%s199_s7 + $0x38] sm:$0xff] %v655_v33  }
  0xfd   : > { %662 = vst [vmem:[%s199_s7 + $0x30] sm:$0xff] %v650_v35  }
  0xfe PF: > { %s14_s15 = sadd.s32 1, %s714_s15  }
  0xff   : > { %p11_p4 = scmp.ge.s32.totalorder %s14_s15, 6  }
 0x101   :  { %13 = sbr.rel (!%p11_p4) target bundleno = 1 (0x1), region = 66 }

// kernel: bottleneck_forward.7
= control target key start
LH: loop header
LB: loop body
LE: loop exit
PB: predicated region body
PF: predicated region fallthrough
CT: control target
= control target key end

     0   :  { %10 = vsyncpa [#allocation3], 0  ;;  %s1182_s0 = inlined_call_operand.vmem [shape: bf16[512,128], index: 0, kind: input, shape index: {}]   ;;  %s1183_s1 = inlined_call_operand.vmem [shape: f32[1,128], index: 1, kind: input, shape index: {}]   ;;  %s1184_s2 = inlined_call_operand.vmem [shape: f32[1,128], index: 2, kind: input, shape index: {}]   ;;  %s1185_s3 = inlined_call_operand.vmem [shape: bf16[128,128], index: 3, kind: input, shape index: {}]   ;;  %s1186_s4 = inlined_call_operand.vmem [shape: bf16[512,128], index: 4, kind: input, shape index: {}]   ;;  %s1187_s5 = inlined_call_operand.hbm [shape: f32[512,128], index: 5, kind: output, shape index: {}]  }
   0x1   :  { %12 = vsyncpa [#allocation3 + $0x1], 0  ;;  %s961_s18 = smov 0   ;;  %s963_s19 = smov 0  }
   0x2   :  { %s965_s20 = smov 0   ;;  %s967_s21 = smov 0  }
   0x3 LB: > { %s982_s22 = sadd.s32 4294967295, %s926_s21   ;;  %s648_s23 = sadd.s32 4294967294, %s926_s21   ;;  %s926_s21 = sphi %s967_s21, %s1193_s21   ;;  %s922_s20 = sphi %s965_s20, %s1192_s20   ;;  %s918_s19 = sphi %s963_s19, %s1191_s19   ;;  %s914_s18 = sphi %s961_s18, %s1190_s18  }
   0x4   : > { %s986_s24 = sadd.s32 1, %s926_s21   ;;  %s140_s25 = sadd.s32 1, %s922_s20 }
   0x5   : > { %s137_s26 = ssub.s32 %s926_s21, %s986_s24  ;;  %p150_p0 = scmp.ne.s32.totalorder %s922_s20, %s918_s19 }
   0x6   : > { %p138_p1 = scmp.eq.s32.totalorder %s137_s26, 0  ;;  %p151_p2 = scmp.eq.s32.totalorder %s982_s22, 3 }
   0x7   : > { %p156_p3 = scmp.ne.s32.totalorder %s918_s19, %s914_s18  ;;  %p157_p4 = scmp.eq.s32.totalorder %s648_s23, 3 }
   0x8   : > { %s997_s27 = scalar_select %p138_p1, %s922_s20, %s140_s25  }
   0x9   : > { %p999_p5 = por %p151_p2, %p150_p0  ;;  %p1003_p6 = por %p157_p4, %p156_p3 }
   0xa   : > { %p651_p7 = scmp.ge.s32.totalorder %s926_s21, 1  ;;  %p202_p8 = scmp.lt.s32.totalorder %s926_s21, 5 }
   0xc   : > { %p203_p9 = pnand %p651_p7, %p202_p8 }
   0xd   : > { %v856_v0 = vld [vmem:[%s1185_s3] sm:$0xff] (!%p203_p9)   ;;  %s653_s7 = sshll.u32 (!%p203_p9), %s982_s22, 4  ;;  %v857_v1 = vld [vmem:[%s1185_s3 + $0x8] sm:$0xff] (!%p203_p9)   ;;  %v858_v2 = vld [vmem:[%s1185_s3 + $0x10] sm:$0xff] (!%p203_p9)   ;;  %s232_s25 = sand.u32 (!%p203_p9), 1, %s918_s19  }
   0xe   : > { %206 = sbr.rel (%p203_p9) target bundleno = 287 (0x11f), region = 40  ;;  %p236_p10 = scmp.lt.s32.totalorder (!%p203_p9), %s653_s7, 63  ;;  %767 = vmatprep.subr.bf16.mxu0 (!%p203_p9), %v856_v0  ;;  %799 = vmatprep.subr.bf16.mxu1 (!%p203_p9), %v856_v0  ;;  %v859_v3 = vld [vmem:[%s1185_s3 + $0x18] sm:$0xff] (!%p203_p9)   ;;  %v1036_v5 = vld [vmem:[%s1183_s1] ss:$0 sm:$0xff] (!%p203_p9)  ;;  %v861_v32 = vld [vmem:[%s1185_s3 + $0x28] sm:$0xff] (!%p203_p9)  }
   0xf   : > { %768 = vmatpush3.bf16.msra.mxu0 (!%p203_p9), %v856_v0  ;;  %807 = vmatpush3.bf16.msra.mxu1 (!%p203_p9), %v856_v0  ;;  %v1043_v10 = vld [vmem:[%s1184_s2] ss:$0 sm:$0xff] (!%p203_p9)  ;;  %v862_v48 = vld [vmem:[%s1185_s3 + $0x30] sm:$0xff] (!%p203_p9)   ;;  %v863_v63 = vld [vmem:[%s1185_s3 + $0x38] sm:$0xff] (!%p203_p9)   ;;  %s652_s26 = sshll.u32 (!%p203_p9), %s232_s25, 7  ;;  %s1141_s9 = scalar_lea.sflag (!%p203_p9), [#allocation3], %s232_s25 }
  0x10   : > { %769 = vmatprep.subr.bf16.mxu0 (!%p203_p9), %v857_v1  ;;  %800 = vmatprep.subr.bf16.mxu1 (!%p203_p9), %v857_v1  ;;  %v860_v17 = vld [vmem:[%s1185_s3 + $0x20] sm:$0xff] (!%p203_p9)   ;;  %s928_s11 = smov (!%p203_p9), [#allocation2]  }
  0x11   : > { %s868_s13 = sshll.u32 (!%p203_p9), %s928_s11, 4  ;;  %s869_s13 = int_to_ptr.vmem [resolvable:$false] %s868_s13 }
  0x12   : > { %s870_s14 = scalar_lea.vmem (!%p203_p9), %s869_s13, 4096 }
  0x13   : > { %770 = vmatpush3.bf16.msra.mxu0 (!%p203_p9), %v857_v1  ;;  %808 = vmatpush3.bf16.msra.mxu1 (!%p203_p9), %v857_v1 }
  0x14   : > { %771 = vmatprep.subr.bf16.mxu0 (!%p203_p9), %v858_v2  ;;  %801 = vmatprep.subr.bf16.mxu1 (!%p203_p9), %v858_v2 }
  0x15   : > { %s1195_s7 = smov (!%p236_p10, %s653_s7), 63 }
  0x16   : > { %s654_s12 = sshll.u32 %s1195_s7, 2  ;;  %s1110_s7 = scalar_lea.vmem [#allocation2], %s652_s26 }
  0x17   : > { %s1027_s15 = scalar_lea.vmem %s1182_s0, %s654_s12  ;;  %772 = vmatpush3.bf16.msra.mxu0 %v858_v2  ;;  %809 = vmatpush3.bf16.msra.mxu1 %v858_v2  ;;  %s1099_s23 = scalar_lea.vmem %s1186_s4, %s654_s12 }
  0x18   : > { %v674_v4 = vld [vmem:[%s1027_s15] sm:$0xff]   ;;  %v737_v9 = vld [vmem:[%s1027_s15 + $0x8] sm:$0xff]   ;;  %v738_v16 = vld [vmem:[%s1027_s15 + $0x10] sm:$0xff]   ;;  %773 = vmatprep.subr.bf16.mxu0 %v859_v3  ;;  %802 = vmatprep.subr.bf16.mxu1 %v859_v3  ;;  %s672_s12 = sshll.u32 %s982_s22, 11  ;;  %s574_s30 = sshll.u32 %s1110_s7, 4  ;;  %s1131_s30 = int_to_ptr.vmem [resolvable:$true] %s574_s30 }
  0x19   : > { %v675_v6 = vunpack.c.l.bf16 %v674_v4  ;;  %v676_v7 = vunpack.c.h.bf16 %v674_v4  ;;  %v740_v8 = vld [vmem:[%s1027_s15 + $0x20] sm:$0xff]   ;;  %v741_v13 = vld [vmem:[%s1027_s15 + $0x28] sm:$0xff]   ;;  %v679_v20 = vunpack.c.l.bf16 %v737_v9  ;;  %v680_v21 = vunpack.c.h.bf16 %v737_v9  ;;  %v742_v31 = vld [vmem:[%s1027_s15 + $0x30] sm:$0xff]   ;;  %s1129_s8 = scalar_lea.hbm %s1187_s5, %s672_s12  ;;  %s864_s10 = scalar_lea.vmem %s1131_s30, 2048 }
  0x1a   : > { %v691_v11 = vunpack.c.l.bf16 %v740_v8  ;;  %v692_v12 = vunpack.c.h.bf16 %v740_v8  ;;  %v695_v24 = vunpack.c.l.bf16 %v741_v13  ;;  %v696_v25 = vunpack.c.h.bf16 %v741_v13  ;;  %v739_v44 = vld [vmem:[%s1027_s15 + $0x18] sm:$0xff]   ;;  %p865_p11 = scmp.ne.s32.totalorder %s1131_s30, %s864_s10  ;;  %p871_p0 = scmp.lt.s32.totalorder %s1131_s30, %s869_s13 }
  0x1b   : > { %v288_v14 = vmul.f32 %v675_v6, %v1036_v5  ;;  %v289_v15 = vmul.f32 %v676_v7, %v1036_v5  ;;  %v683_v28 = vunpack.c.l.bf16 %v738_v16  ;;  %774 = vmatpush3.bf16.msra.mxu0 %v859_v3  ;;  %810 = vmatpush3.bf16.msra.mxu1 %v859_v3  ;;  %v290_v35 = vmul.f32 %v679_v20, %v1036_v5  ;;  %v743_v47 = vld [vmem:[%s1027_s15 + $0x38] sm:$0xff]   ;;  %p872_p1 = scmp.lt.s32.totalorder %s870_s14, %s864_s10 }
  0x1c   : > { %v296_v18 = vmul.f32 %v691_v11, %v1036_v5  ;;  %v297_v19 = vmul.f32 %v692_v12, %v1036_v5  ;;  %775 = vmatprep.subr.bf16.mxu0 %v860_v17  ;;  %803 = vmatprep.subr.bf16.mxu1 %v860_v17  ;;  %v291_v36 = vmul.f32 %v680_v21, %v1036_v5  ;;  %v684_v40 = vunpack.c.h.bf16 %v738_v16  ;;  %p866_p12 = pnand %p865_p11, %p999_p5 }
  0x1d   : > { %v311_v22 = vadd.f32 %v1043_v10, %v288_v14  ;;  %v312_v23 = vadd.f32 %v1043_v10, %v289_v15  ;;  %v298_v38 = vmul.f32 %v695_v24, %v1036_v5  ;;  %v299_v39 = vmul.f32 %v696_v25, %v1036_v5  ;;  %p873_p2 = por %p872_p1, %p871_p0 }
  0x1e   : > { %v319_v26 = vadd.f32 %v1043_v10, %v296_v18  ;;  %v320_v27 = vadd.f32 %v1043_v10, %v297_v19  ;;  %v292_v42 = vmul.f32 %v683_v28, %v1036_v5  ;;  %v699_v43 = vunpack.c.l.bf16 %v742_v31  ;;  %v706_v28 = vld [vmem:[%s1099_s23] sm:$0xff]   ;;  %p867_p13 = pneg %p866_p12 }
  0x1f   : > { %v327_v29 = vmax.f32 %v311_v22, 0.0  ;;  %v328_v30 = vmax.f32 %v312_v23, 0.0  ;;  %776 = vmatpush3.bf16.msra.mxu0 %v860_v17  ;;  %811 = vmatpush3.bf16.msra.mxu1 %v860_v17  ;;  %v293_v45 = vmul.f32 %v684_v40, %v1036_v5  ;;  %v700_v46 = vunpack.c.h.bf16 %v742_v31 }
  0x20   : > { %v335_v33 = vmax.f32 %v319_v26, 0.0  ;;  %v336_v34 = vmax.f32 %v320_v27, 0.0  ;;  %777 = vmatprep.subr.bf16.mxu0 %v861_v32  ;;  %804 = vmatprep.subr.bf16.mxu1 %v861_v32  ;;  %v313_v49 = vadd.f32 %v1043_v10, %v290_v35  ;;  %v314_v50 = vadd.f32 %v1043_v10, %v291_v36  ;;  %v748_v27 = vld [vmem:[%s1099_s23 + $0x28] sm:$0xff]   ;;  %p874_p3 = pnand %p873_p2, %p867_p13 }
  0x21   : > { %v343_v37 = vpack.c.bf16 %v328_v30, %v327_v29  ;;  %v300_v51 = vmul.f32 %v699_v43, %v1036_v5  ;;  %v321_v52 = vadd.f32 %v1043_v10, %v298_v38  ;;  %v322_v53 = vadd.f32 %v1043_v10, %v299_v39  ;;  %v747_v29 = vld [vmem:[%s1099_s23 + $0x20] sm:$0xff]  }
  0x22   : > { %v347_v41 = vpack.c.bf16 %v336_v34, %v335_v33  ;;  %v301_v54 = vmul.f32 %v700_v46, %v1036_v5  ;;  %v687_v55 = vunpack.c.l.bf16 %v739_v44  ;;  %v315_v56 = vadd.f32 %v1043_v10, %v292_v42 }
  0x23   : > { %783 = vmatprep.mubr.bf16.mxu0 %v343_v37  ;;  %v688_v57 = vunpack.c.h.bf16 %v739_v44  ;;  %v703_v58 = vunpack.c.l.bf16 %v743_v47  ;;  %v704_v59 = vunpack.c.h.bf16 %v743_v47  ;;  %778 = vmatpush3.bf16.msra.mxu0 %v861_v32  ;;  %v316_v60 = vadd.f32 %v1043_v10, %v293_v45 }
  0x24   : > { %791 = vmatprep.mubr.bf16.mxu1 %v347_v41  ;;  %812 = vmatpush3.bf16.msra.mxu1 %v861_v32  ;;  %v323_v61 = vadd.f32 %v1043_v10, %v300_v51  ;;  %v324_v62 = vadd.f32 %v1043_v10, %v301_v54  ;;  %v329_v0 = vmax.f32 %v313_v49, 0.0  ;;  %v330_v1 = vmax.f32 %v314_v50, 0.0  ;;  %v750_v49 = vld [vmem:[%s1099_s23 + $0x38] sm:$0xff]   ;;  %v745_v54 = vld [vmem:[%s1099_s23 + $0x10] sm:$0xff]  }
  0x25   : > { %779 = vmatprep.subr.bf16.mxu0 %v862_v48  ;;  %805 = vmatprep.subr.bf16.mxu1 %v862_v48  ;;  %v337_v2 = vmax.f32 %v321_v52, 0.0  ;;  %v338_v3 = vmax.f32 %v322_v53, 0.0  ;;  %v294_v4 = vmul.f32 %v687_v55, %v1036_v5  ;;  %v295_v6 = vmul.f32 %v688_v57, %v1036_v5  ;;  %v749_v55 = vld [vmem:[%s1099_s23 + $0x30] sm:$0xff]  }
  0x26   : > { %v302_v7 = vmul.f32 %v703_v58, %v1036_v5  ;;  %v303_v8 = vmul.f32 %v704_v59, %v1036_v5  ;;  %v331_v9 = vmax.f32 %v315_v56, 0.0  ;;  %v332_v11 = vmax.f32 %v316_v60, 0.0 }
  0x27   : > { %780 = vmatpush3.bf16.msra.mxu0 %v862_v48  ;;  %v339_v12 = vmax.f32 %v323_v61, 0.0  ;;  %v340_v13 = vmax.f32 %v324_v62, 0.0  ;;  %v344_v14 = vpack.c.bf16 %v330_v1, %v329_v0  ;;  %v348_v15 = vpack.c.bf16 %v338_v3, %v337_v2 }
  0x28   : > { %813 = vmatpush3.bf16.msra.mxu1 %v862_v48  ;;  %781 = vmatprep.subr.bf16.mxu0 %v863_v63  ;;  %v317_v16 = vadd.f32 %v1043_v10, %v294_v4  ;;  %v318_v17 = vadd.f32 %v1043_v10, %v295_v6  ;;  %v325_v18 = vadd.f32 %v1043_v10, %v302_v7  ;;  %v727_v31 = vunpack.c.l.bf16 %v748_v27  ;;  %v746_v48 = vld [vmem:[%s1099_s23 + $0x18] sm:$0xff]  }
  0x29   : > { %806 = vmatprep.subr.bf16.mxu1 %v863_v63  ;;  %v326_v19 = vadd.f32 %v1043_v10, %v303_v8  ;;  %v345_v5 = vpack.c.bf16 %v332_v11, %v331_v9  ;;  %v349_v20 = vpack.c.bf16 %v340_v13, %v339_v12  ;;  %v744_v10 = vld [vmem:[%s1099_s23 + $0x8] sm:$0xff]   ;;  %v707_v32 = vunpack.c.l.bf16 %v706_v28 }
  0x2a   : > { %v333_v21 = vmax.f32 %v317_v16, 0.0  ;;  %v334_v22 = vmax.f32 %v318_v17, 0.0  ;;  %v341_v23 = vmax.f32 %v325_v18, 0.0  ;;  %v711_v30 = vunpack.c.l.bf16 %v744_v10 }
  0x2b   : > { %782 = vmatpush3.bf16.msra.mxu0 %v863_v63  ;;  %v342_v24 = vmax.f32 %v326_v19, 0.0  ;;  %v723_v33 = vunpack.c.l.bf16 %v747_v29  ;;  %v712_v34 = vunpack.c.h.bf16 %v744_v10  ;;  %v728_v35 = vunpack.c.h.bf16 %v748_v27 }
  0x2c   : > { %814 = vmatpush3.bf16.msra.mxu1 %v863_v63  ;;  %v346_v25 = vpack.c.bf16 %v334_v22, %v333_v21  ;;  %v708_v38 = vunpack.c.h.bf16 %v706_v28  ;;  %v724_v39 = vunpack.c.h.bf16 %v747_v29  ;;  %v719_v58 = vunpack.c.l.bf16 %v746_v48 }
  0x2d   : > { %v350_v26 = vpack.c.bf16 %v342_v24, %v341_v23  ;;  %v735_v59 = vunpack.c.l.bf16 %v750_v49  ;;  %v715_v60 = vunpack.c.l.bf16 %v745_v54  ;;  %v731_v61 = vunpack.c.l.bf16 %v749_v55 }
  0x2e   : > { %784 = vmatmul.mubr.bf16.vlgmr.msra.gmra.mrb[0].mxu0 %v344_v14  ;;  %v720_v62 = vunpack.c.h.bf16 %v746_v48  ;;  %v736_v63 = vunpack.c.h.bf16 %v750_v49  ;;  %v716_v2 = vunpack.c.h.bf16 %v745_v54  ;;  %v732_v3 = vunpack.c.h.bf16 %v749_v55 }
  0x2f   : > { %792 = vmatmul.mubr.bf16.vlgmr.msra.gmra.mrb[0].mxu1 %v348_v15  ;;  %787 = vmatprep.mubr.bf16.mxu0 %v345_v5 }
  0x30   : > { %795 = vmatprep.mubr.bf16.mxu1 %v349_v20 }
  0x36   : > { %788 = vmatmul.mubr.bf16.gmra.mrb[4].mxu0 %v346_v25 }
  0x37   : > { %796 = vmatmul.mubr.bf16.gmra.mrb[4].mxu1 %v350_v26 }
 0x101   : > { %v785_v36 = vpop.f32.mrb[0].mxu0 }
 0x102   : > { %v793_v37 = vpop.f32.mrb[0].mxu1  ;;  %v490_v40 = vadd.f32 %v785_v36, %v711_v30  ;;  %v481_v42 = vpop.f32.mrb[1].mxu0 }
 0x103   : > { %v522_v41 = vadd.f32 %v793_v37, %v727_v31  ;;  %v513_v43 = vpop.f32.mrb[1].mxu1  ;;  %v482_v44 = vadd.f32 %v707_v32, %v481_v42  ;;  %v786_v46 = vpop.f32.mrb[2].mxu0 }
 0x104   : > { %v514_v45 = vadd.f32 %v723_v33, %v513_v43  ;;  %v794_v47 = vpop.f32.mrb[2].mxu1  ;;  %546 = vst [vmem:[%s1110_s7 + $0x10] sm:$0xff] %v490_v40  ;;  %v493_v50 = vadd.f32 %v786_v46, %v712_v34  ;;  %v484_v52 = vpop.f32.mrb[3].mxu0 }
 0x105   : > { %554 = vst [vmem:[%s1110_s7 + $0x50] sm:$0xff] %v522_v41  ;;  %v525_v51 = vadd.f32 %v794_v47, %v728_v35  ;;  %v516_v53 = vpop.f32.mrb[3].mxu1  ;;  %544 = vst [vmem:[%s1110_s7] sm:$0xff] %v482_v44  ;;  %v485_v56 = vadd.f32 %v708_v38, %v484_v52 }
 0x106   : > { %552 = vst [vmem:[%s1110_s7 + $0x40] sm:$0xff] %v514_v45  ;;  %v517_v57 = vadd.f32 %v724_v39, %v516_v53  ;;  %547 = vst [vmem:[%s1110_s7 + $0x18] sm:$0xff] %v493_v50 }
 0x107   : > { %555 = vst [vmem:[%s1110_s7 + $0x58] sm:$0xff] %v525_v51  ;;  %545 = vst [vmem:[%s1110_s7 + $0x8] sm:$0xff] %v485_v56 }
 0x108   : > { %553 = vst [vmem:[%s1110_s7 + $0x48] sm:$0xff] %v517_v57 }
 0x109   : > { %v789_v0 = vpop.f32.mrb[4].mxu0 }
 0x10a   : > { %v797_v1 = vpop.f32.mrb[4].mxu1  ;;  %v506_v4 = vadd.f32 %v789_v0, %v719_v58  ;;  %v497_v7 = vpop.f32.mrb[5].mxu0 }
 0x10b   : > { %v538_v6 = vadd.f32 %v797_v1, %v735_v59  ;;  %v529_v8 = vpop.f32.mrb[5].mxu1  ;;  %v498_v9 = vadd.f32 %v715_v60, %v497_v7  ;;  %v790_v12 = vpop.f32.mrb[6].mxu0 }
 0x10c   : > { %v530_v11 = vadd.f32 %v731_v61, %v529_v8  ;;  %v798_v13 = vpop.f32.mrb[6].mxu1  ;;  %550 = vst [vmem:[%s1110_s7 + $0x30] sm:$0xff] %v506_v4  ;;  %v509_v14 = vadd.f32 %v790_v12, %v720_v62  ;;  %v500_v16 = vpop.f32.mrb[7].mxu0 }
 0x10d   : > { %558 = vst [vmem:[%s1110_s7 + $0x70] sm:$0xff] %v538_v6  ;;  %v541_v15 = vadd.f32 %v798_v13, %v736_v63  ;;  %v532_v17 = vpop.f32.mrb[7].mxu1  ;;  %548 = vst [vmem:[%s1110_s7 + $0x20] sm:$0xff] %v498_v9  ;;  %v501_v18 = vadd.f32 %v716_v2, %v500_v16 }
 0x10e   : > { %556 = vst [vmem:[%s1110_s7 + $0x60] sm:$0xff] %v530_v11  ;;  %v533_v19 = vadd.f32 %v732_v3, %v532_v17  ;;  %551 = vst [vmem:[%s1110_s7 + $0x38] sm:$0xff] %v509_v14 }
 0x10f   : > { %559 = vst [vmem:[%s1110_s7 + $0x78] sm:$0xff] %v541_v15  ;;  %549 = vst [vmem:[%s1110_s7 + $0x28] sm:$0xff] %v501_v18 }
 0x110   : > { %557 = vst [vmem:[%s1110_s7 + $0x68] sm:$0xff] %v533_v19 }
 0x111   : > { %877 = shalt.err (!%p874_p3)
}
 0x112   : > { %s878_s15 = scalar_lea.hbm %s1129_s8, 2048  ;;  %s882_s23 = scalar_lea.hbm %s1187_s5, 8192 }
 0x113   : > { %p879_p4 = scmp.ne.s32.totalorder %s1129_s8, %s878_s15  ;;  %p883_p9 = scmp.lt.u32.totalorder %s1129_s8, %s1187_s5 }
 0x114   : > { %p884_p10 = scmp.lt.u32.totalorder %s882_s23, %s878_s15  ;;  %p886_p12 = scmp.lt.u32.totalorder %s878_s15, %s1129_s8 }
 0x115   : > { %p880_p7 = pnand %p879_p4, %p999_p5 }
 0x116   : > { %p885_p11 = por %p884_p10, %p883_p9 }
 0x117   : > { %p881_p8 = pneg %p880_p7 }
 0x118   : > { %p887_p13 = por %p886_p12, %p885_p11 }
 0x11a   : > { %p888_p0 = pnand %p887_p13, %p881_p8 }
 0x11c   : > { %891 = shalt.err (!%p888_p0)
}
 0x11d   : > { %s929_s7 = smov 128   ;;  %s930_s12 = smov 8  }
 0x11e   : > { %815 = dma.vmem_to_hbm [thread:$0]  (%p999_p5), %s1131_s30, 2048, %s1129_s8, %s1141_s9, %s929_s7, %s929_s7, %s930_s12  }
 0x11f PF: > { %p821_p1 = scmp.ge.s32.totalorder %s926_s21, 2  ;;  %s589_s22 = sand.u32 1, %s914_s18  }
 0x120   : > { %s590_s6 = scalar_lea.sflag [#allocation3], %s589_s22 }
 0x121   : > { %p818_p2 = pnand %p821_p1, %p1003_p6 }
 0x123   : > { %909 = dma.done.wait (!%p818_p2), %s590_s6, 2048  }
 0x124   : > { %911 = vsyncadd (!%p818_p2), %s590_s6, 4294965248  ;;  %p15_p3 = scmp.ge.s32.totalorder %s986_s24, 6   ;;  %s1190_s18 = smov %s918_s19 }
 0x125   : > { %s1191_s19 = smov %s922_s20  ;;  %s1192_s20 = smov %s997_s27 }
 0x126   : > { %s1193_s21 = smov %s986_s24  ;;  %17 = sbr.rel (!%p15_p3) target bundleno = 3 (0x3), region = 78 }
 0x12d   :  { %595 = vsyncpa [#allocation3], 1 }
 0x12e   :  { %597 = vsyncpa [#allocation3 + $0x1], 1 }

// kernel: bottleneck_forward.5
= control target key start
LH: loop header
LB: loop body
LE: loop exit
PB: predicated region body
PF: predicated region fallthrough
CT: control target
= control target key end

     0   :  { %s4637_s18 = smov 0   ;;  %s5812_s0 = inlined_call_operand.vmem [shape: bf16[2,16,16,128], index: 0, kind: input, shape index: {}]   ;;  %s5813_s1 = inlined_call_operand.vmem [shape: f32[1,128], index: 1, kind: input, shape index: {}]   ;;  %s5814_s2 = inlined_call_operand.vmem [shape: f32[1,128], index: 2, kind: input, shape index: {}]   ;;  %s5815_s3 = inlined_call_operand.vmem [shape: bf16[3,384,128], index: 3, kind: input, shape index: {}]   ;;  %s5816_s4 = inlined_call_operand.vmem [shape: bf16[512,128], index: 4, kind: output, shape index: {0}]   ;;  %s5817_s5 = inlined_call_operand.vmem [shape: f32[2,2,128], index: 5, kind: output, shape index: {1}]  }
   0x1 LB: > { %s4643_s19 = sadd.s32 4294967295, %s4603_s18   ;;  %p3227_p0 = scmp.ge.s32.totalorder %s4603_s18, 1  ;;  %s4603_s18 = sphi %s4637_s18, %s16_s18  }
   0x2   : > { %p190_p1 = scmp.lt.s32.totalorder %s4603_s18, 3 }
   0x4   : > { %p191_p2 = pnand %p3227_p0, %p190_p1 }
   0x5   : > { %v4381_v0 = vld [vmem:[%s5815_s3 + $0x40] sm:$0xff] (!%p191_p2)   ;;  %vm445_vm0 = vcmask (!%p191_p2), 1040384   ;;  %v4605_v3 = vmov (!%p191_p2), 0.0   ;;  %v4384_v5 = vld [vmem:[%s5815_s3 + $0x48] sm:$0xff] (!%p191_p2)   ;;  %v4387_v10 = vld [vmem:[%s5815_s3 + $0x50] sm:$0xff] (!%p191_p2)   ;;  %p222_p3 = scmp.lt.s32.totalorder (!%p191_p2), %s4643_s19, 1 }
   0x6   : > { %194 = sbr.rel (%p191_p2) target bundleno = 577 (0x241), region = 36  ;;  %v4653_v1 = vld [vmem:[%s5815_s3 + $0x80] sm:$0xff] (!%p191_p2)   ;;  %3644 = vmatprep.subr.bf16.mxu0 (!%p191_p2), %v4381_v0  ;;  %v4658_v4 = vrot.slane (!%p191_p2), %v4605_v3, 7  ;;  %v4668_v6 = vld [vmem:[%s5815_s3 + $0x88] sm:$0xff] (!%p191_p2)   ;;  %v4686_v11 = vld [vmem:[%s5815_s3 + $0x90] sm:$0xff] (!%p191_p2)   ;;  %vm4606_vm2 = vmmov (!%p191_p2), 1  }
   0x7   : > { %v4383_v2 = vld [vmem:[%s5815_s3] sm:$0xff] (!%p191_p2)   ;;  %4196 = vmatprep.subr.bf16.mxu1 (!%p191_p2), %v4653_v1  ;;  %v4386_v8 = vld [vmem:[%s5815_s3 + $0x8] sm:$0xff] (!%p191_p2)   ;;  %v4389_v12 = vld [vmem:[%s5815_s3 + $0x10] sm:$0xff] (!%p191_p2)   ;;  %s3230_s17 = sshll.u32 (!%p191_p2), %s4643_s19, 5 }
   0x8   : > { %3645 = vmatpush3.bf16.msra.mxu0 (!%p191_p2), %v4383_v2  ;;  %4204 = vmatpush3.bf16.msra.mxu1 (!%p191_p2), %v4653_v1  ;;  %v546_v7 = vsel (!%p191_p2), %vm445_vm0, 0.0, %v4658_v4  ;;  %581 = vst [vmem:[#allocation2 + $0x8] sm:$0xff] (!%p191_p2), %v4658_v4  ;;  %632 = vst [vmem:[#allocation2 + $0x1a0] sm:$0xff] (!%p191_p2), %v4658_v4  ;;  %v563_v9 = vsel (!%p191_p2), %vm445_vm0, %v4658_v4, 0.0  ;;  %v4390_v13 = vld [vmem:[%s5815_s3 + $0x58] sm:$0xff] (!%p191_p2)   ;;  %v4393_v16 = vld [vmem:[%s5815_s3 + $0x60] sm:$0xff] (!%p191_p2)  }
   0x9   : > { %3646 = vmatprep.subr.bf16.mxu0 (!%p191_p2), %v4384_v5  ;;  %580 = vst [vmem:[#allocation2] sm:$0xff] (!%p191_p2), %v546_v7  ;;  %631 = vst [vmem:[#allocation2 + $0x198] sm:$0xff] (!%p191_p2), %v546_v7  ;;  %4197 = vmatprep.subr.bf16.mxu1 (!%p191_p2), %v4668_v6  ;;  %v4699_v14 = vld [vmem:[%s5815_s3 + $0x98] sm:$0xff] (!%p191_p2)   ;;  %v4713_v17 = vld [vmem:[%s5815_s3 + $0xa0] sm:$0xff] (!%p191_p2)   ;;  %p228_p4 = scmp.lt.s32.totalorder (!%p191_p2), %s3230_s17, 63 }
   0xa   : > { %582 = vst [vmem:[#allocation2 + $0x10] sm:$0x3] (!%p191_p2), %v563_v9  ;;  %633 = vst [vmem:[#allocation2 + $0x1a8] sm:$0x3] (!%p191_p2), %v563_v9  ;;  %v4392_v15 = vld [vmem:[%s5815_s3 + $0x18] sm:$0xff] (!%p191_p2)   ;;  %v4395_v18 = vld [vmem:[%s5815_s3 + $0x20] sm:$0xff] (!%p191_p2)  }
   0xb   : > { %v4396_v19 = vld [vmem:[%s5815_s3 + $0x68] sm:$0xff] (!%p191_p2)   ;;  %v4399_v22 = vld [vmem:[%s5815_s3 + $0x70] sm:$0xff] (!%p191_p2)   ;;  %v4402_v25 = vld [vmem:[%s5815_s3 + $0x78] sm:$0xff] (!%p191_p2)  }
   0xc   : > { %3647 = vmatpush3.bf16.msra.mxu0 (!%p191_p2), %v4386_v8  ;;  %4205 = vmatpush3.bf16.msra.mxu1 (!%p191_p2), %v4668_v6  ;;  %v4729_v20 = vld [vmem:[%s5815_s3 + $0xa8] sm:$0xff] (!%p191_p2)   ;;  %v4743_v23 = vld [vmem:[%s5815_s3 + $0xb0] sm:$0xff] (!%p191_p2)   ;;  %v4762_v29 = vld [vmem:[%s5815_s3 + $0xb8] sm:$0xff] (!%p191_p2)  }
   0xd   : > { %3648 = vmatprep.subr.bf16.mxu0 %v4387_v10  ;;  %4198 = vmatprep.subr.bf16.mxu1 %v4686_v11  ;;  %s4716_s25 = scalar_select %p222_p3, %s4643_s19, 1  ;;  %v4398_v21 = vld [vmem:[%s5815_s3 + $0x28] sm:$0xff]   ;;  %v4401_v24 = vld [vmem:[%s5815_s3 + $0x30] sm:$0xff]   ;;  %v4767_v33 = vld [vmem:[%s5813_s1] ss:$0 sm:$0xff]  ;;  %v4455_v10 = vpack.c.bf16 %v4658_v4, %v4658_v4 }
   0xe   : > { %v4773_v35 = vld [vmem:[%s5814_s2] ss:$0 sm:$0xff]  ;;  %v4404_v40 = vld [vmem:[%s5815_s3 + $0x38] sm:$0xff]   ;;  %vm4453_vm1 = vmneg %vm445_vm0  ;;  %s5821_s17 = smov (!%p228_p4, %s3230_s17), 63 }
   0xf   : > { %s3437_s7 = sshll.u32 %s4716_s25, 7  ;;  %v4405_v45 = vld [vmem:[%s5815_s3 + $0x100] sm:$0xff]   ;;  %vm4812_vm3 = vmpackc.low %vm4606_vm2, %vm4453_vm1  ;;  %s3231_s19 = sshll.u32 %s5821_s17, 2 }
  0x10   : > { %3649 = vmatpush3.bf16.msra.mxu0 %v4389_v12  ;;  %4206 = vmatpush3.bf16.msra.mxu1 %v4686_v11  ;;  %s4748_s16 = scalar_lea.vmem %s5812_s0, %s3437_s7  ;;  %v666_v26 = vld [vmem:[#allocation2 + $0x1] sm:$0xff]  ;;  %s5734_s22 = scalar_lea.vmem %s5816_s4, %s3231_s19 }
  0x11   : > { %3650 = vmatprep.subr.bf16.mxu0 %v4390_v13  ;;  %4199 = vmatprep.subr.bf16.mxu1 %v4699_v14  ;;  %v667_v27 = vld [vmem:[#allocation2 + $0x9] sm:$0xff]  ;;  %v3620_v28 = vld [vmem:[%s4748_s16 + $0x38] sm:$0xff]   ;;  %v3621_v34 = vld [vmem:[%s4748_s16 + $0x40] sm:$0xff]   ;;  %s3232_s23 = sshll.u32 %s4716_s25, 1 }
  0x12   : > { %v731_v30 = vpack.c.bf16 %v667_v27, %v666_v26  ;;  %v3500_v31 = vunpack.c.l.bf16 %v3620_v28  ;;  %v3501_v32 = vunpack.c.h.bf16 %v3620_v28  ;;  %v3504_v36 = vunpack.c.l.bf16 %v3621_v34  ;;  %v3471_v48 = vld [vmem:[%s4748_s16] sm:$0xff]   ;;  %v3622_v49 = vld [vmem:[%s4748_s16 + $0x48] sm:$0xff]   ;;  %v3623_v3 = vld [vmem:[%s4748_s16 + $0x50] sm:$0xff]   ;;  %s236_s27 = scalar_lea.vmem %s5817_s5, %s3232_s23 }
  0x13   : > { %v3505_v37 = vunpack.c.h.bf16 %v3621_v34  ;;  %v3472_v52 = vunpack.c.l.bf16 %v3471_v48  ;;  %v3473_v53 = vunpack.c.h.bf16 %v3471_v48  ;;  %v3508_v56 = vunpack.c.l.bf16 %v3622_v49 }
  0x14   : > { %3651 = vmatpush3.bf16.msra.mxu0 %v4392_v15  ;;  %4207 = vmatpush3.bf16.msra.mxu1 %v4699_v14  ;;  %v323_v38 = vmul.f32 %v3500_v31, %v4767_v33  ;;  %v324_v39 = vmul.f32 %v3501_v32, %v4767_v33  ;;  %v325_v41 = vmul.f32 %v3504_v36, %v4767_v33  ;;  %v3509_v57 = vunpack.c.h.bf16 %v3622_v49 }
  0x15   : > { %3652 = vmatprep.subr.bf16.mxu0 %v4393_v16  ;;  %4200 = vmatprep.subr.bf16.mxu1 %v4713_v17  ;;  %v326_v42 = vmul.f32 %v3505_v37, %v4767_v33  ;;  %v309_v60 = vmul.f32 %v3472_v52, %v4767_v33  ;;  %v310_v61 = vmul.f32 %v3473_v53, %v4767_v33  ;;  %v3513_v26 = vunpack.c.h.bf16 %v3623_v3 }
  0x16   : > { %1002 = vmatprep.mubr.bf16.mxu0 %v731_v30  ;;  %v362_v43 = vadd.f32 %v4773_v35, %v323_v38  ;;  %v363_v44 = vadd.f32 %v4773_v35, %v324_v39  ;;  %v364_v46 = vadd.f32 %v4773_v35, %v325_v41  ;;  %v327_v0 = vmul.f32 %v3508_v56, %v4767_v33  ;;  %v4406_v56 = vld [vmem:[%s5815_s3 + $0xc0] sm:$0xff]  }
  0x17   : > { %v365_v47 = vadd.f32 %v4773_v35, %v326_v42  ;;  %v328_v2 = vmul.f32 %v3509_v57, %v4767_v33  ;;  %v348_v12 = vadd.f32 %v4773_v35, %v309_v60  ;;  %v349_v4 = vadd.f32 %v4773_v35, %v310_v61 }
  0x18   : > { %3653 = vmatpush3.bf16.msra.mxu0 %v4395_v18  ;;  %4208 = vmatpush3.bf16.msra.mxu1 %v4713_v17  ;;  %v394_v50 = vmax.f32 %v362_v43, 0.0  ;;  %v395_v51 = vmax.f32 %v363_v44, 0.0  ;;  %v396_v54 = vmax.f32 %v364_v46, 0.0  ;;  %v3614_v18 = vld [vmem:[%s4748_s16 + $0x8] sm:$0xff]   ;;  %v330_v36 = vmul.f32 %v3513_v26, %v4767_v33  ;;  %v3624_v46 = vld [vmem:[%s4748_s16 + $0x58] sm:$0xff]   ;;  %v4409_v26 = vld [vmem:[%s5815_s3 + $0x110] sm:$0xff]  }
  0x19   : > { %3654 = vmatprep.subr.bf16.mxu0 %v4396_v19  ;;  %4201 = vmatprep.subr.bf16.mxu1 %v4729_v20  ;;  %v397_v55 = vmax.f32 %v365_v47, 0.0  ;;  %v380_v19 = vmax.f32 %v348_v12, 0.0  ;;  %v3476_v27 = vunpack.c.l.bf16 %v3614_v18  ;;  %v3477_v28 = vunpack.c.h.bf16 %v3614_v18  ;;  %v3625_v47 = vld [vmem:[%s4748_s16 + $0x60] sm:$0xff]   ;;  %v3615_v18 = vld [vmem:[%s4748_s16 + $0x10] sm:$0xff]  }
  0x1a   : > { %v4794_v58 = vrot.slane %v394_v50, 7  ;;  %v470_v59 = vrot.slane %v395_v51, 7  ;;  %v4799_v62 = vrot.slane %v396_v54, 7  ;;  %v3520_v12 = vunpack.c.l.bf16 %v3625_v47 }
  0x1b   : > { %v473_v63 = vrot.slane %v397_v55, 7  ;;  %v311_v37 = vmul.f32 %v3476_v27, %v4767_v33  ;;  %v312_v38 = vmul.f32 %v3477_v28, %v4767_v33 }
  0x1c   : > { %3655 = vmatpush3.bf16.msra.mxu0 %v4398_v21  ;;  %4209 = vmatpush3.bf16.msra.mxu1 %v4729_v20  ;;  %v4806_v5 = vsel %vm445_vm0, %v4794_v58, %v470_v59  ;;  %v554_v7 = vsel %vm445_vm0, 0.0, %v4794_v58  ;;  %v571_v8 = vsel %vm445_vm0, %v470_v59, 0.0  ;;  %v555_v15 = vsel %vm445_vm0, 0.0, %v4799_v62 }
  0x1d   : > { %3656 = vmatprep.subr.bf16.mxu0 %v4399_v22  ;;  %4202 = vmatprep.subr.bf16.mxu1 %v4743_v23  ;;  %604 = vst [vmem:[#allocation2 + $0xc0] sm:$0xff] %v554_v7  ;;  %605 = vst [vmem:[#allocation2 + $0xc8] sm:$0xff] %v4806_v5  ;;  %v4824_v13 = vsel %vm445_vm0, %v4799_v62, %v473_v63  ;;  %v572_v16 = vsel %vm445_vm0, %v473_v63, 0.0  ;;  %v366_v21 = vadd.f32 %v4773_v35, %v327_v0  ;;  %v4407_v63 = vld [vmem:[%s5815_s3 + $0x108] sm:$0xff]  }
  0x1e   : > { %606 = vst [vmem:[#allocation2 + $0xd0] sm:$0x3] %v571_v8  ;;  %607 = vst [vmem:[#allocation2 + $0xd8] sm:$0xff] %v555_v15  ;;  %v367_v22 = vadd.f32 %v4773_v35, %v328_v2  ;;  %v351_v60 = vadd.f32 %v4773_v35, %v312_v38  ;;  %v3516_v2 = vunpack.c.l.bf16 %v3624_v46  ;;  %v3480_v38 = vunpack.c.l.bf16 %v3615_v18 }
  0x1f   : > { %608 = vst [vmem:[#allocation2 + $0xe0] sm:$0xff] %v4824_v13  ;;  %609 = vst [vmem:[#allocation2 + $0xe8] sm:$0x3] %v572_v16  ;;  %v398_v30 = vmax.f32 %v366_v21, 0.0 }
  0x20   : > { %3657 = vmatpush3.bf16.msra.mxu0 %v4401_v24  ;;  %4210 = vmatpush3.bf16.msra.mxu1 %v4743_v23  ;;  %v3512_v24 = vunpack.c.l.bf16 %v3623_v3  ;;  %v399_v31 = vmax.f32 %v367_v22, 0.0  ;;  %v3517_v3 = vunpack.c.h.bf16 %v3624_v46 }
  0x21   : > { %3658 = vmatprep.subr.bf16.mxu0 %v4402_v25  ;;  %4203 = vmatprep.subr.bf16.mxu1 %v4762_v29  ;;  %v381_v25 = vmax.f32 %v349_v4, 0.0  ;;  %v3521_v4 = vunpack.c.h.bf16 %v3625_v47  ;;  %v4410_v47 = vld [vmem:[%s5815_s3 + $0xd0] sm:$0xff]  }
  0x22   : > { %v329_v32 = vmul.f32 %v3512_v24, %v4767_v33  ;;  %v476_v41 = vrot.slane %v399_v31, 7  ;;  %v332_v16 = vmul.f32 %v3517_v3, %v4767_v33  ;;  %v333_v31 = vmul.f32 %v3520_v12, %v4767_v33 }
  0x23   : > { %v449_v34 = vrot.slane %v381_v25, 7 }
  0x24   : > { %3659 = vmatpush3.bf16.msra.mxu0 %v4404_v40  ;;  %4211 = vmatpush3.bf16.msra.mxu1 %v4762_v29  ;;  %v4845_v40 = vrot.slane %v398_v30, 7  ;;  %v368_v42 = vadd.f32 %v4773_v35, %v329_v32  ;;  %v714_v48 = vld [vmem:[#allocation2 + $0xc2] sm:$0xff]  ;;  %v573_v52 = vsel %vm445_vm0, %v476_v41, 0.0  ;;  %v371_v30 = vadd.f32 %v4773_v35, %v332_v16 }
  0x25   : > { %4052 = vmatprep.subr.bf16.mxu0 %v4653_v1  ;;  %3780 = vmatprep.subr.bf16.mxu1 %v4405_v45  ;;  %v564_v44 = vsel %vm445_vm0, %v449_v34, 0.0  ;;  %v369_v45 = vadd.f32 %v4773_v35, %v330_v36  ;;  %v715_v49 = vld [vmem:[#allocation2 + $0xca] sm:$0xff]  ;;  %612 = vst [vmem:[#allocation2 + $0x100] sm:$0x3] %v573_v52  ;;  %v4411_v52 = vld [vmem:[%s5815_s3 + $0x118] sm:$0xff]   ;;  %v4413_v16 = vld [vmem:[%s5815_s3 + $0x120] sm:$0xff]  }
  0x26   : > { %585 = vst [vmem:[#allocation2 + $0x28] sm:$0x3] %v564_v44  ;;  %v4861_v50 = vsel %vm445_vm0, %v4845_v40, %v476_v41  ;;  %v556_v51 = vsel %vm445_vm0, 0.0, %v4845_v40  ;;  %v756_v53 = vpack.c.bf16 %v715_v49, %v714_v48  ;;  %v716_v54 = vld [vmem:[#allocation2 + $0xda] sm:$0xff]  ;;  %v717_v55 = vld [vmem:[#allocation2 + $0xe2] sm:$0xff]  ;;  %v400_v57 = vmax.f32 %v368_v42, 0.0 }
  0x27   : > { %4456 = vmatmul.mubr.msk.bf16.vlgmr.msra.gmra.mrb[0].mxu0 %vm4812_vm3, %v4455_v10  ;;  %610 = vst [vmem:[#allocation2 + $0xf0] sm:$0xff] %v556_v51  ;;  %611 = vst [vmem:[#allocation2 + $0xf8] sm:$0xff] %v4861_v50  ;;  %v401_v59 = vmax.f32 %v369_v45, 0.0  ;;  %v759_v61 = vpack.c.bf16 %v717_v55, %v716_v54  ;;  %v383_v10 = vmax.f32 %v351_v60, 0.0  ;;  %v372_v48 = vadd.f32 %v4773_v35, %v333_v31 }
  0x28   : > { %4053 = vmatpush3.bf16.msra.mxu0 %v4653_v1  ;;  %v4836_v1 = vrot.slane %v380_v19, 7  ;;  %4084 = vmatprep.mubr.bf16.mxu1 %v756_v53  ;;  %v4876_v7 = vrot.slane %v400_v57, 7  ;;  %v4408_v19 = vld [vmem:[%s5815_s3 + $0xc8] sm:$0xff]   ;;  %v3481_v51 = vunpack.c.h.bf16 %v3615_v18  ;;  %v313_v55 = vmul.f32 %v3480_v38, %v4767_v33  ;;  %v4928_v57 = vld [vmem:[%s4748_s16 + $0x70] sm:$0xff]  }
  0x29   : > { %4054 = vmatprep.subr.bf16.mxu0 %v4668_v6  ;;  %v479_v8 = vrot.slane %v401_v59, 7  ;;  %4085 = vmatmul.mubr.bf16.vlgmr.msra.gmra.mrb[0].mxu1 %v759_v61  ;;  %v452_v25 = vrot.slane %v383_v10, 7 }
  0x2a   : > { %v547_v39 = vsel %vm445_vm0, 0.0, %v4836_v1  ;;  %v4851_v43 = vsel %vm445_vm0, %v4836_v1, %v449_v34  ;;  %3781 = vmatpush3.bf16.msra.mxu1 %v4406_v56  ;;  %v557_v22 = vsel %vm445_vm0, 0.0, %v4876_v7  ;;  %v314_v61 = vmul.f32 %v3481_v51, %v4767_v33 }
  0x2b   : > { %583 = vst [vmem:[#allocation2 + $0x18] sm:$0xff] %v547_v39  ;;  %584 = vst [vmem:[#allocation2 + $0x20] sm:$0xff] %v4851_v43  ;;  %v4888_v21 = vsel %vm445_vm0, %v4876_v7, %v479_v8  ;;  %v574_v24 = vsel %vm445_vm0, %v479_v8, 0.0  ;;  %3782 = vmatprep.subr.bf16.mxu1 %v4407_v63  ;;  %v565_v36 = vsel %vm445_vm0, %v452_v25, 0.0  ;;  %v3626_v39 = vld [vmem:[%s4748_s16 + $0x68] sm:$0xff]   ;;  %v4932_v59 = vpack.c.bf16 %v4851_v43, %v4836_v1 }
  0x2c   : > { %4055 = vmatpush3.bf16.msra.mxu0 %v4668_v6  ;;  %v350_v6 = vadd.f32 %v4773_v35, %v311_v37  ;;  %613 = vst [vmem:[#allocation2 + $0x108] sm:$0xff] %v557_v22  ;;  %614 = vst [vmem:[#allocation2 + $0x110] sm:$0xff] %v4888_v21  ;;  %v334_v37 = vmul.f32 %v3521_v4, %v4767_v33  ;;  %v3524_v56 = vunpack.c.l.bf16 %v3626_v39  ;;  %v3525_v63 = vunpack.c.h.bf16 %v3626_v39  ;;  %v4414_v39 = vld [vmem:[%s5815_s3 + $0xe0] sm:$0xff]  }
  0x2d   : > { %4056 = vmatprep.subr.bf16.mxu0 %v4686_v11  ;;  %615 = vst [vmem:[#allocation2 + $0x118] sm:$0x3] %v574_v24  ;;  %588 = vst [vmem:[#allocation2 + $0x40] sm:$0x3] %v565_v36  ;;  %v352_v3 = vadd.f32 %v4773_v35, %v313_v55  ;;  %v353_v4 = vadd.f32 %v4773_v35, %v314_v61  ;;  %v3617_v61 = vld [vmem:[%s4748_s16 + $0x20] sm:$0xff]  }
  0x2e   : > { %v382_v0 = vmax.f32 %v350_v6, 0.0  ;;  %v718_v42 = vld [vmem:[#allocation2 + $0xf2] sm:$0xff]  ;;  %v719_v44 = vld [vmem:[#allocation2 + $0xfa] sm:$0xff]  ;;  %v403_v6 = vmax.f32 %v371_v30, 0.0  ;;  %3783 = vmatpush3.bf16.msra.mxu1 %v4408_v19  ;;  %v373_v49 = vadd.f32 %v4773_v35, %v334_v37  ;;  %v335_v18 = vmul.f32 %v3524_v56, %v4767_v33 }
  0x2f   : > { %v762_v46 = vpack.c.bf16 %v719_v44, %v718_v42  ;;  %3784 = vmatprep.subr.bf16.mxu1 %v4409_v26  ;;  %v384_v22 = vmax.f32 %v352_v3, 0.0  ;;  %v336_v24 = vmul.f32 %v3525_v63, %v4767_v33  ;;  %v3616_v26 = vld [vmem:[%s4748_s16 + $0x18] sm:$0xff]   ;;  %v3529_v44 = vunpack.c.h.bf16 %v4928_v57 }
  0x30   : > { %4057 = vmatpush3.bf16.msra.mxu0 %v4686_v11  ;;  %v4878_v15 = vrot.slane %v382_v0, 7  ;;  %v331_v11 = vmul.f32 %v3516_v2, %v4767_v33  ;;  %v482_v54 = vrot.slane %v403_v6, 7  ;;  %v405_v60 = vmax.f32 %v373_v49, 0.0  ;;  %v4412_v0 = vld [vmem:[%s5815_s3 + $0xd8] sm:$0xff]  }
  0x31   : > { %4058 = vmatprep.subr.bf16.mxu0 %v4699_v14  ;;  %4088 = vmatprep.mubr.bf16.mxu1 %v762_v46  ;;  %v4973_v36 = vrot.slane %v384_v22, 7  ;;  %v374_v37 = vadd.f32 %v4773_v35, %v335_v18  ;;  %v375_v38 = vadd.f32 %v4773_v35, %v336_v24  ;;  %v3484_v6 = vunpack.c.l.bf16 %v3616_v26  ;;  %v4415_v46 = vld [vmem:[%s5815_s3 + $0x128] sm:$0xff]  }
  0x32   : > { %v548_v27 = vsel %vm445_vm0, 0.0, %v4878_v15  ;;  %v370_v28 = vadd.f32 %v4773_v35, %v331_v11  ;;  %v669_v32 = vld [vmem:[#allocation2 + $0x21] sm:$0xff]  ;;  %v4906_v34 = vsel %vm445_vm0, %v4878_v15, %v452_v25  ;;  %v575_v43 = vsel %vm445_vm0, %v482_v54, 0.0  ;;  %3785 = vmatpush3.bf16.msra.mxu1 %v4410_v47 }
  0x33   : > { %586 = vst [vmem:[#allocation2 + $0x30] sm:$0xff] %v548_v27  ;;  %587 = vst [vmem:[#allocation2 + $0x38] sm:$0xff] %v4906_v34  ;;  %v720_v8 = vld [vmem:[#allocation2 + $0x10a] sm:$0xff]  ;;  %v485_v11 = vrot.slane %v405_v60, 7  ;;  %3786 = vmatprep.subr.bf16.mxu1 %v4411_v52  ;;  %v3528_v25 = vunpack.c.l.bf16 %v4928_v57  ;;  %v549_v47 = vsel %vm445_vm0, 0.0, %v4973_v36  ;;  %v407_v49 = vmax.f32 %v375_v38, 0.0 }
  0x34   : > { %4059 = vmatpush3.bf16.msra.mxu0 %v4699_v14  ;;  %v668_v14 = vld [vmem:[#allocation2 + $0x19] sm:$0xff]  ;;  %v402_v45 = vmax.f32 %v370_v28, 0.0  ;;  %618 = vst [vmem:[#allocation2 + $0x130] sm:$0x3] %v575_v43  ;;  %v3485_v51 = vunpack.c.h.bf16 %v3616_v26  ;;  %v4991_v52 = vpack.c.bf16 %v4906_v34, %v4878_v15  ;;  %589 = vst [vmem:[#allocation2 + $0x48] sm:$0xff] %v549_v47  ;;  %v338_v55 = vmul.f32 %v3529_v44, %v4767_v33 }
  0x35   : > { %4060 = vmatprep.subr.bf16.mxu0 %v4713_v17  ;;  %v4911_v41 = vpack.c.bf16 %v669_v32, %v668_v14  ;;  %v721_v10 = vld [vmem:[#allocation2 + $0x112] sm:$0xff]  ;;  %v385_v14 = vmax.f32 %v353_v4, 0.0  ;;  %v315_v60 = vmul.f32 %v3484_v6, %v4767_v33 }
  0x36   : > { %v4924_v53 = vrot.slane %v402_v45, 7  ;;  %v765_v19 = vpack.c.bf16 %v721_v10, %v720_v8  ;;  %3787 = vmatpush3.bf16.msra.mxu1 %v4412_v0  ;;  %v337_v45 = vmul.f32 %v3528_v25, %v4767_v33  ;;  %v4416_v0 = vld [vmem:[%s5815_s3 + $0xe8] sm:$0xff]   ;;  %v316_v3 = vmul.f32 %v3485_v51, %v4767_v33  ;;  %v4417_v4 = vld [vmem:[%s5815_s3 + $0x130] sm:$0xff]  }
  0x37   : > { %1010 = vmatprep.mubr.bf16.mxu0 %v4911_v41  ;;  %v455_v42 = vrot.slane %v385_v14, 7  ;;  %3788 = vmatprep.subr.bf16.mxu1 %v4413_v16  ;;  %v3618_v8 = vld [vmem:[%s4748_s16 + $0x28] sm:$0xff]   ;;  %v354_v18 = vadd.f32 %v4773_v35, %v315_v60  ;;  %v4418_v25 = vld [vmem:[%s5815_s3 + $0xf0] sm:$0xff]   ;;  %v3489_v14 = vunpack.c.h.bf16 %v3617_v61 }
  0x38   : > { %4061 = vmatpush3.bf16.msra.mxu0 %v4713_v17  ;;  %v404_v17 = vmax.f32 %v372_v48, 0.0  ;;  %v4943_v2 = vsel %vm445_vm0, %v4924_v53, %v482_v54  ;;  %v558_v1 = vsel %vm445_vm0, 0.0, %v4924_v53  ;;  %4089 = vmatmul.mubr.bf16.gmra.mrb[4].mxu1 %v765_v19  ;;  %v406_v48 = vmax.f32 %v374_v37, 0.0 }
  0x39   : > { %4460 = vmatmul.mubr.msk.bf16.gmra.mrb[4].mxu0 %vm4812_vm3, %v4932_v59  ;;  %4062 = vmatprep.subr.bf16.mxu0 %v4729_v20  ;;  %616 = vst [vmem:[#allocation2 + $0x120] sm:$0xff] %v558_v1  ;;  %617 = vst [vmem:[#allocation2 + $0x128] sm:$0xff] %v4943_v2  ;;  %v566_v54 = vsel %vm445_vm0, %v455_v42, 0.0  ;;  %v376_v56 = vadd.f32 %v4773_v35, %v337_v45  ;;  %v377_v1 = vadd.f32 %v4773_v35, %v338_v55  ;;  %v4428_v45 = vld [vmem:[%s5815_s3 + $0x1c0] sm:$0xff]  }
  0x3a   : > { %v4951_v12 = vrot.slane %v404_v17, 7  ;;  %v670_v27 = vld [vmem:[#allocation2 + $0x31] sm:$0xff]  ;;  %v671_v28 = vld [vmem:[#allocation2 + $0x39] sm:$0xff]  ;;  %591 = vst [vmem:[#allocation2 + $0x58] sm:$0x3] %v566_v54  ;;  %v5005_v57 = vrot.slane %v406_v48, 7  ;;  %3789 = vmatpush3.bf16.msra.mxu1 %v4414_v39  ;;  %v355_v26 = vadd.f32 %v4773_v35, %v316_v3  ;;  %v3492_v37 = vunpack.c.l.bf16 %v3618_v8 }
  0x3b   : > { %v4970_v32 = vpack.c.bf16 %v671_v28, %v670_v27  ;;  %v488_v17 = vrot.slane %v407_v49, 7  ;;  %v408_v43 = vmax.f32 %v376_v56, 0.0  ;;  %3790 = vmatprep.subr.bf16.mxu1 %v4415_v46  ;;  %v3488_v27 = vunpack.c.l.bf16 %v3617_v61  ;;  %v3619_v49 = vld [vmem:[%s4748_s16 + $0x30] sm:$0xff]  }
  0x3c   : > { %4063 = vmatpush3.bf16.msra.mxu0 %v4729_v20  ;;  %v4965_v30 = vsel %vm445_vm0, %v4951_v12, %v485_v11  ;;  %v559_v31 = vsel %vm445_vm0, 0.0, %v4951_v12  ;;  %v576_v20 = vsel %vm445_vm0, %v485_v11, 0.0  ;;  %v560_v11 = vsel %vm445_vm0, 0.0, %v5005_v57 }
  0x3d   : > { %4064 = vmatprep.subr.bf16.mxu0 %v4743_v23  ;;  %619 = vst [vmem:[#allocation2 + $0x138] sm:$0xff] %v559_v31  ;;  %620 = vst [vmem:[#allocation2 + $0x140] sm:$0xff] %v4965_v30  ;;  %1018 = vmatprep.mubr.bf16.mxu0 %v4970_v32  ;;  %v5018_v10 = vsel %vm445_vm0, %v5005_v57, %v488_v17  ;;  %v577_v16 = vsel %vm445_vm0, %v488_v17, 0.0  ;;  %v5028_v24 = vrot.slane %v408_v43, 7  ;;  %v4419_v31 = vld [vmem:[%s5815_s3 + $0x138] sm:$0xff]   ;;  %v3493_v47 = vunpack.c.h.bf16 %v3618_v8 }
  0x3e   : > { %621 = vst [vmem:[#allocation2 + $0x148] sm:$0x3] %v576_v20  ;;  %622 = vst [vmem:[#allocation2 + $0x150] sm:$0xff] %v560_v11  ;;  %v386_v20 = vmax.f32 %v354_v18, 0.0  ;;  %3791 = vmatpush3.bf16.msra.mxu1 %v4416_v0  ;;  %v317_v44 = vmul.f32 %v3488_v27, %v4767_v33  ;;  %v318_v46 = vmul.f32 %v3489_v14, %v4767_v33  ;;  %v4420_v0 = vld [vmem:[%s5815_s3 + $0xf8] sm:$0xff]  }
  0x3f   : > { %623 = vst [vmem:[#allocation2 + $0x158] sm:$0xff] %v5018_v10  ;;  %624 = vst [vmem:[#allocation2 + $0x160] sm:$0x3] %v577_v16  ;;  %v561_v39 = vsel %vm445_vm0, 0.0, %v5028_v24  ;;  %3792 = vmatprep.subr.bf16.mxu1 %v4417_v4  ;;  %v319_v48 = vmul.f32 %v3492_v37, %v4767_v33  ;;  %v5072_v4 = vld [vmem:[%s5815_s3 + $0x140] sm:$0xff]  }
  0x40   : > { %4065 = vmatpush3.bf16.msra.mxu0 %v4743_v23  ;;  %v4998_v23 = vsel %vm445_vm0, %v4973_v36, %v455_v42  ;;  %v722_v15 = vld [vmem:[#allocation2 + $0x122] sm:$0xff]  ;;  %v723_v34 = vld [vmem:[#allocation2 + $0x12a] sm:$0xff]  ;;  %v387_v42 = vmax.f32 %v355_v26, 0.0  ;;  %625 = vst [vmem:[#allocation2 + $0x168] sm:$0xff] %v561_v39  ;;  %v5043_v6 = vrot.slane %v386_v20, 7  ;;  %v357_v61 = vadd.f32 %v4773_v35, %v318_v46 }
  0x41   : > { %4464 = vmatmul.mubr.msk.bf16.gmra.mrb[8].mxu0 %vm4812_vm3, %v4991_v52  ;;  %4066 = vmatprep.subr.bf16.mxu0 %v4762_v29  ;;  %590 = vst [vmem:[#allocation2 + $0x50] sm:$0xff] %v4998_v23  ;;  %v768_v63 = vpack.c.bf16 %v723_v34, %v722_v15  ;;  %v356_v34 = vadd.f32 %v4773_v35, %v317_v44 }
  0x42   : > { %v458_v15 = vrot.slane %v387_v42, 7  ;;  %v550_v60 = vsel %vm445_vm0, 0.0, %v5043_v6  ;;  %3793 = vmatpush3.bf16.msra.mxu1 %v4418_v25  ;;  %v358_v8 = vadd.f32 %v4773_v35, %v319_v48  ;;  %v389_v18 = vmax.f32 %v357_v61, 0.0 }
  0x43   : > { %4092 = vmatprep.mubr.bf16.mxu1 %v768_v63  ;;  %v320_v63 = vmul.f32 %v3493_v47, %v4767_v33  ;;  %592 = vst [vmem:[#allocation2 + $0x60] sm:$0xff] %v550_v60  ;;  %v388_v3 = vmax.f32 %v356_v34, 0.0  ;;  %3794 = vmatprep.subr.bf16.mxu1 %v4419_v31  ;;  %v5077_v25 = vpack.c.bf16 %v4998_v23, %v4973_v36 }
  0x44   : > { %4067 = vmatpush3.bf16.msra.mxu0 %v4762_v29  ;;  %v724_v19 = vld [vmem:[#allocation2 + $0x13a] sm:$0xff]  ;;  %v409_v29 = vmax.f32 %v377_v1, 0.0  ;;  %v459_v1 = vsel %vm445_vm0, %v5043_v6, %v458_v15  ;;  %v567_v43 = vsel %vm445_vm0, %v458_v15, 0.0  ;;  %v390_v27 = vmax.f32 %v358_v8, 0.0 }
  0x45   : > { %v725_v22 = vld [vmem:[#allocation2 + $0x142] sm:$0xff]  ;;  %3916 = vmatprep.subr.bf16.mxu0 %v4428_v45  ;;  %593 = vst [vmem:[#allocation2 + $0x68] sm:$0xff] %v459_v1  ;;  %594 = vst [vmem:[#allocation2 + $0x70] sm:$0x3] %v567_v43  ;;  %v5082_v26 = vrot.slane %v388_v3, 7  ;;  %v461_v31 = vrot.slane %v389_v18, 7  ;;  %v5110_v3 = vpack.c.bf16 %v459_v1, %v5043_v6 }
  0x46   : > { %v771_v28 = vpack.c.bf16 %v725_v22, %v724_v19  ;;  %v491_v38 = vrot.slane %v409_v29, 7  ;;  %v726_v11 = vld [vmem:[#allocation2 + $0x152] sm:$0xff]  ;;  %v727_v16 = vld [vmem:[#allocation2 + $0x15a] sm:$0xff]  ;;  %v359_v19 = vadd.f32 %v4773_v35, %v320_v63  ;;  %v3496_v22 = vunpack.c.l.bf16 %v3619_v49  ;;  %3795 = vmatpush3.bf16.msra.mxu1 %v4420_v0  ;;  %v4422_v6 = vld [vmem:[%s5815_s3 + $0x148] sm:$0xff]  }
  0x47   : > { %v774_v29 = vpack.c.bf16 %v727_v16, %v726_v11  ;;  %v551_v37 = vsel %vm445_vm0, 0.0, %v5082_v26  ;;  %4100 = vmatprep.subr.bf16.mxu1 %v5072_v4  ;;  %v462_v23 = vsel %vm445_vm0, %v5082_v26, %v461_v31  ;;  %v568_v39 = vsel %vm445_vm0, %v461_v31, 0.0 }
  0x48   : > { %4093 = vmatmul.mubr.bf16.gmra.mrb[8].mxu1 %v771_v28  ;;  %v672_v51 = vld [vmem:[#allocation2 + $0x49] sm:$0xff]  ;;  %v673_v54 = vld [vmem:[#allocation2 + $0x51] sm:$0xff]  ;;  %v5050_v55 = vsel %vm445_vm0, %v5028_v24, %v491_v38  ;;  %v578_v56 = vsel %vm445_vm0, %v491_v38, 0.0  ;;  %v3497_v28 = vunpack.c.h.bf16 %v3619_v49  ;;  %v391_v20 = vmax.f32 %v359_v19, 0.0  ;;  %595 = vst [vmem:[#allocation2 + $0x78] sm:$0xff] %v551_v37  ;;  %596 = vst [vmem:[#allocation2 + $0x80] sm:$0xff] %v462_v23 }
  0x49   : > { %v5054_v17 = vpack.c.bf16 %v673_v54, %v672_v51  ;;  %626 = vst [vmem:[#allocation2 + $0x170] sm:$0xff] %v5050_v55  ;;  %627 = vst [vmem:[#allocation2 + $0x178] sm:$0x3] %v578_v56  ;;  %v321_v14 = vmul.f32 %v3496_v22, %v4767_v33  ;;  %4096 = vmatprep.mubr.bf16.mxu1 %v774_v29  ;;  %v5087_v38 = vrot.slane %v390_v27, 7  ;;  %v3628_v29 = vld [vmem:[%s4748_s16 + $0x78] sm:$0xff]   ;;  %v4423_v27 = vld [vmem:[%s5815_s3 + $0x150] sm:$0xff]  }
  0x4a   : > { %v322_v36 = vmul.f32 %v3497_v28, %v4767_v33  ;;  %v464_v42 = vrot.slane %v391_v20, 7  ;;  %597 = vst [vmem:[#allocation2 + $0x88] sm:$0x3] %v568_v39  ;;  %v3532_v28 = vunpack.c.l.bf16 %v3628_v29  ;;  %v3533_v31 = vunpack.c.h.bf16 %v3628_v29  ;;  %v4424_v37 = vld [vmem:[%s5815_s3 + $0x158] sm:$0xff]  }
  0x4b   : > { %1026 = vmatprep.mubr.bf16.mxu0 %v5054_v17  ;;  %v360_v44 = vadd.f32 %v4773_v35, %v321_v14  ;;  %v552_v47 = vsel %vm445_vm0, 0.0, %v5087_v38  ;;  %v5139_v20 = vpack.c.bf16 %v462_v23, %v5082_v26  ;;  %v692_v29 = vld [vmem:[#allocation2 + $0x139] sm:$0xff] }
  0x4c   : > { %4468 = vmatmul.mubr.msk.bf16.gmra.mrb[12].mxu0 %vm4812_vm3, %v5077_v25  ;;  %v361_v48 = vadd.f32 %v4773_v35, %v322_v36  ;;  %v465_v51 = vsel %vm445_vm0, %v5087_v38, %v464_v42  ;;  %v569_v54 = vsel %vm445_vm0, %v464_v42, 0.0  ;;  %598 = vst [vmem:[#allocation2 + $0x90] sm:$0xff] %v552_v47  ;;  %v674_v15 = vld [vmem:[#allocation2 + $0x61] sm:$0xff]  ;;  %v675_v34 = vld [vmem:[#allocation2 + $0x69] sm:$0xff] }
  0x4d   : > { %v392_v56 = vmax.f32 %v360_v44, 0.0  ;;  %599 = vst [vmem:[#allocation2 + $0x98] sm:$0xff] %v465_v51  ;;  %600 = vst [vmem:[#allocation2 + $0xa0] sm:$0x3] %v569_v54  ;;  %v5101_v61 = vpack.c.bf16 %v675_v34, %v674_v15  ;;  %v4436_v15 = vld [vmem:[%s5815_s3 + $0x178] sm:$0xff]  }
  0x4e   : > { %v393_v60 = vmax.f32 %v361_v48, 0.0 }
  0x4f   : > { %v5103_v63 = vrot.slane %v392_v56, 7  ;;  %1034 = vmatprep.mubr.bf16.mxu0 %v5101_v61  ;;  %v676_v11 = vld [vmem:[#allocation2 + $0x79] sm:$0xff]  ;;  %v685_v56 = vld [vmem:[#allocation2 + $0xe1] sm:$0xff] }
  0x50   : > { %v728_v45 = vld [vmem:[#allocation2 + $0x16a] sm:$0xff]  ;;  %v729_v46 = vld [vmem:[#allocation2 + $0x172] sm:$0xff]  ;;  %v467_v0 = vrot.slane %v393_v60, 7  ;;  %v5210_v60 = vld [vmem:[%s5815_s3 + $0x200] sm:$0xff]  }
  0x51   : > { %v777_v49 = vpack.c.bf16 %v729_v46, %v728_v45  ;;  %v553_v43 = vsel %vm445_vm0, 0.0, %v5103_v63  ;;  %v677_v16 = vld [vmem:[#allocation2 + $0x81] sm:$0xff]  ;;  %v683_v46 = vld [vmem:[#allocation2 + $0xc9] sm:$0xff] }
  0x52   : > { %v5117_v8 = vsel %vm445_vm0, %v5103_v63, %v467_v0  ;;  %601 = vst [vmem:[#allocation2 + $0xa8] sm:$0xff] %v553_v43  ;;  %v5121_v18 = vpack.c.bf16 %v677_v16, %v676_v11  ;;  %v687_v43 = vld [vmem:[#allocation2 + $0xf9] sm:$0xff]  ;;  %v4519_v16 = vpack.c.bf16 %v4861_v50, %v4845_v40  ;;  %v4527_v40 = vpack.c.bf16 %v4888_v21, %v4876_v7  ;;  %v694_v7 = vld [vmem:[#allocation2 + $0x151] sm:$0xff] }
  0x53   : > { %4097 = vmatmul.mubr.bf16.gmra.mrb[12].mxu1 %v777_v49  ;;  %602 = vst [vmem:[#allocation2 + $0xb0] sm:$0xff] %v5117_v8  ;;  %v5192_v54 = vpack.c.bf16 %v5117_v8, %v5103_v63  ;;  %v4503_v63 = vpack.c.bf16 %v4806_v5, %v4794_v58  ;;  %v4511_v58 = vpack.c.bf16 %v4824_v13, %v4799_v62  ;;  %v688_v5 = vld [vmem:[#allocation2 + $0x109] sm:$0xff]  ;;  %v690_v62 = vld [vmem:[#allocation2 + $0x121] sm:$0xff]  ;;  %v695_v21 = vld [vmem:[#allocation2 + $0x159] sm:$0xff] }
  0x54   : > { %1694 = vmatprep.mubr.bf16.mxu1 %v4911_v41  ;;  %4472 = vmatmul.mubr.msk.bf16.gmra.mrb[16].mxu0 %vm4812_vm3, %v5110_v3  ;;  %v570_v41 = vsel %vm445_vm0, %v467_v0, 0.0  ;;  %v678_v1 = vld [vmem:[#allocation2 + $0x91] sm:$0xff]  ;;  %v679_v19 = vld [vmem:[#allocation2 + $0x99] sm:$0xff]  ;;  %v691_v13 = vld [vmem:[#allocation2 + $0x129] sm:$0xff] }
  0x55   : > { %603 = vst [vmem:[#allocation2 + $0xb8] sm:$0x3] %v570_v41  ;;  %1042 = vmatprep.mubr.bf16.mxu0 %v5121_v18  ;;  %v5130_v22 = vpack.c.bf16 %v679_v19, %v678_v1  ;;  %v686_v0 = vld [vmem:[#allocation2 + $0xf1] sm:$0xff]  ;;  %v1339_v1 = vld [vmem:[#allocation2 + $0xc0] sm:$0xff]  ;;  %v1340_v19 = vld [vmem:[#allocation2 + $0xc8] sm:$0xff] }
  0x56   : > { %v5221_v8 = vpack.c.bf16 %v687_v43, %v686_v0  ;;  %v689_v41 = vld [vmem:[#allocation2 + $0x111] sm:$0xff]  ;;  %v5250_v50 = vpack.c.bf16 %v1340_v19, %v1339_v1  ;;  %v708_v0 = vld [vmem:[#allocation2 + $0x7a] sm:$0xff]  ;;  %v709_v43 = vld [vmem:[#allocation2 + $0x82] sm:$0xff] }
  0x57   : > { %v5232_v11 = vpack.c.bf16 %v689_v41, %v688_v5  ;;  %v710_v5 = vld [vmem:[#allocation2 + $0x92] sm:$0xff]  ;;  %v711_v41 = vld [vmem:[#allocation2 + $0x9a] sm:$0xff]  ;;  %v4439_v1 = vld [vmem:[%s5815_s3 + $0x1e8] sm:$0xff]  }
  0x5b   : > { %4476 = vmatmul.mubr.msk.bf16.vlgmr.msra.gmra.mrb[16].mxu1 %vm4812_vm3, %v4932_v59  ;;  %v680_v59 = vld [vmem:[#allocation2 + $0xa9] sm:$0xff] }
  0x5c   : > { %4101 = vmatpush3.bf16.msra.mxu1 %v5072_v4  ;;  %1702 = vmatprep.mubr.bf16.mxu1 %v4970_v32  ;;  %v339_v32 = vmul.f32 %v3532_v28, %v4767_v33  ;;  %v340_v4 = vmul.f32 %v3533_v31, %v4767_v33  ;;  %v681_v14 = vld [vmem:[#allocation2 + $0xb1] sm:$0xff]  ;;  %v4425_v33 = vld [vmem:[%s5815_s3 + $0x160] sm:$0xff]   ;;  %v4531_v31 = vpack.c.bf16 %v4943_v2, %v4924_v53  ;;  %v696_v53 = vld [vmem:[#allocation2 + $0x169] sm:$0xff] }
  0x5d   : > { %4102 = vmatprep.subr.bf16.mxu1 %v4422_v6  ;;  %4480 = vmatmul.mubr.msk.bf16.gmra.mrb[20].mxu0 %vm4812_vm3, %v5139_v20  ;;  %v5155_v23 = vpack.c.bf16 %v681_v14, %v680_v59  ;;  %v5264_v59 = vpack.c.bf16 %v695_v21, %v694_v7  ;;  %v697_v2 = vld [vmem:[#allocation2 + $0x171] sm:$0xff]  ;;  %v4547_v14 = vpack.c.bf16 %v5018_v10, %v5005_v57  ;;  %v700_v57 = vld [vmem:[#allocation2 + $0x1a] sm:$0xff]  ;;  %v701_v10 = vld [vmem:[#allocation2 + $0x22] sm:$0xff] }
  0x5e   : > { %1050 = vmatprep.mubr.bf16.mxu0 %v5130_v22  ;;  %v378_v26 = vadd.f32 %v4773_v35, %v339_v32  ;;  %v379_v36 = vadd.f32 %v4773_v35, %v340_v4  ;;  %v5164_v35 = vpack.c.bf16 %v465_v51, %v5087_v38  ;;  %v4427_v51 = vld [vmem:[%s5815_s3 + $0x170] sm:$0xff]   ;;  %v4539_v32 = vpack.c.bf16 %v4965_v30, %v4951_v12  ;;  %v698_v12 = vld [vmem:[#allocation2 + $0x2] sm:$0xff] }
  0x5f   : > { %v5274_v4 = vpack.c.bf16 %v697_v2, %v696_v53  ;;  %v699_v30 = vld [vmem:[#allocation2 + $0xa] sm:$0xff]  ;;  %v2114_v53 = vld [vmem:[#allocation2 + $0x39] sm:$0xff] }
  0x60   : > { %4103 = vmatpush3.bf16.msra.mxu1 %v4422_v6  ;;  %v410_v39 = vmax.f32 %v378_v26, 0.0  ;;  %v411_v42 = vmax.f32 %v379_v36, 0.0  ;;  %v5243_v6 = vpack.c.bf16 %v691_v13, %v690_v62  ;;  %v5287_v26 = vpack.c.bf16 %v5050_v55, %v5028_v24  ;;  %v702_v36 = vld [vmem:[#allocation2 + $0x32] sm:$0xff]  ;;  %v4430_v55 = vld [vmem:[%s5815_s3 + $0x1c8] sm:$0xff]   ;;  %v4438_v62 = vld [vmem:[%s5815_s3 + $0x1a0] sm:$0xff]  }
  0x61   : > { %4104 = vmatprep.subr.bf16.mxu1 %v4423_v27  ;;  %v5341_v13 = vpack.c.bf16 %v711_v41, %v710_v5  ;;  %v4441_v21 = vld [vmem:[%s5815_s3 + $0x1f0] sm:$0xff]  }
  0x62   : > { %v5161_v44 = vrot.slane %v410_v39, 7  ;;  %v494_v45 = vrot.slane %v411_v42, 7  ;;  %v703_v39 = vld [vmem:[#allocation2 + $0x3a] sm:$0xff]  ;;  %v5292_v42 = vpack.c.bf16 %v701_v10, %v700_v57  ;;  %v2115_v10 = vld [vmem:[#allocation2 + $0x49] sm:$0xff] }
  0x63   : > { %4484 = vmatmul.mubr.msk.bf16.gmra.mrb[20].mxu1 %vm4812_vm3, %v4991_v52  ;;  %v682_v52 = vld [vmem:[#allocation2 + $0xc1] sm:$0xff]  ;;  %v5299_v24 = vpack.c.bf16 %v703_v39, %v702_v36  ;;  %v2082_v57 = vld [vmem:[#allocation2 + $0x38] sm:$0xff] }
  0x64   : > { %1710 = vmatprep.mubr.bf16.mxu1 %v5054_v17  ;;  %4105 = vmatpush3.bf16.msra.mxu1 %v4423_v27  ;;  %v4426_v17 = vld [vmem:[%s5815_s3 + $0x168] sm:$0xff]   ;;  %v5175_v47 = vsel %vm445_vm0, %v5161_v44, %v494_v45  ;;  %v562_v38 = vsel %vm445_vm0, 0.0, %v5161_v44  ;;  %v579_v48 = vsel %vm445_vm0, %v494_v45, 0.0  ;;  %v5184_v49 = vpack.c.bf16 %v683_v46, %v682_v52  ;;  %v705_v46 = vld [vmem:[#allocation2 + $0x52] sm:$0xff] }
  0x65   : > { %4106 = vmatprep.subr.bf16.mxu1 %v4424_v37  ;;  %4488 = vmatmul.mubr.msk.bf16.gmra.mrb[24].mxu0 %vm4812_vm3, %v5164_v35  ;;  %628 = vst [vmem:[#allocation2 + $0x180] sm:$0xff] %v562_v38  ;;  %629 = vst [vmem:[#allocation2 + $0x188] sm:$0xff] %v5175_v47  ;;  %v693_v27 = vld [vmem:[#allocation2 + $0x141] sm:$0xff]  ;;  %v704_v52 = vld [vmem:[#allocation2 + $0x4a] sm:$0xff] }
  0x66   : > { %1058 = vmatprep.mubr.bf16.mxu0 %v5155_v23  ;;  %630 = vst [vmem:[#allocation2 + $0x190] sm:$0x3] %v579_v48  ;;  %v5254_v28 = vpack.c.bf16 %v693_v27, %v692_v29  ;;  %v4431_v45 = vld [vmem:[%s5815_s3 + $0x188] sm:$0xff]   ;;  %v2116_v36 = vld [vmem:[#allocation2 + $0x51] sm:$0xff] }
  0x67   : > { %v706_v38 = vld [vmem:[#allocation2 + $0x62] sm:$0xff]  ;;  %v707_v48 = vld [vmem:[#allocation2 + $0x6a] sm:$0xff] }
  0x68   : > { %4107 = vmatpush3.bf16.msra.mxu1 %v4424_v37  ;;  %v732_v37 = vpack.c.bf16 %v699_v30, %v698_v12  ;;  %v4440_v29 = vld [vmem:[%s5815_s3 + $0x1a8] sm:$0xff]   ;;  %v4443_v30 = vld [vmem:[%s5815_s3 + $0x1f8] sm:$0xff]  }
  0x69   : > { %4108 = vmatprep.subr.bf16.mxu1 %v4425_v33  ;;  %v712_v27 = vld [vmem:[#allocation2 + $0xaa] sm:$0xff] }
  0x6b   : > { %4492 = vmatmul.mubr.msk.bf16.gmra.mrb[24].mxu1 %vm4812_vm3, %v5077_v25  ;;  %v684_v25 = vld [vmem:[#allocation2 + $0xd9] sm:$0xff] }
  0x6c   : > { %1718 = vmatprep.mubr.bf16.mxu1 %v5101_v61  ;;  %4109 = vmatpush3.bf16.msra.mxu1 %v4425_v33  ;;  %v5204_v34 = vpack.c.bf16 %v685_v56, %v684_v25  ;;  %v4429_v33 = vld [vmem:[%s5815_s3 + $0x180] sm:$0xff]   ;;  %v4433_v25 = vld [vmem:[%s5815_s3 + $0x190] sm:$0xff]   ;;  %v5320_v56 = vpack.c.bf16 %v707_v48, %v706_v38 }
  0x6d   : > { %4110 = vmatprep.subr.bf16.mxu1 %v4426_v17  ;;  %4496 = vmatmul.mubr.msk.bf16.gmra.mrb[28].mxu0 %vm4812_vm3, %v5192_v54  ;;  %v1387_v19 = vld [vmem:[#allocation2 + $0x181] sm:$0xff]  ;;  %v1404_v38 = vld [vmem:[#allocation2 + $0xca] sm:$0xff] }
  0x6e   : > { %1066 = vmatprep.mubr.bf16.mxu0 %v5184_v49  ;;  %v1405_v48 = vld [vmem:[#allocation2 + $0xda] sm:$0xff] }
  0x70   : > { %4111 = vmatpush3.bf16.msra.mxu1 %v4426_v17  ;;  %v4432_v17 = vld [vmem:[%s5815_s3 + $0x1d0] sm:$0xff]  }
  0x71   : > { %4112 = vmatprep.subr.bf16.mxu1 %v4427_v51 }
  0x73   : > { %4500 = vmatmul.mubr.msk.bf16.gmra.mrb[28].mxu1 %vm4812_vm3, %v5110_v3 }
  0x74   : > { %1726 = vmatprep.mubr.bf16.mxu1 %v5121_v18  ;;  %4113 = vmatpush3.bf16.msra.mxu1 %v4427_v51  ;;  %v5313_v51 = vpack.c.bf16 %v705_v46, %v704_v52  ;;  %v2084_v52 = vld [vmem:[#allocation2 + $0x50] sm:$0xff]  ;;  %v4446_v46 = vld [vmem:[%s5815_s3 + $0x208] sm:$0xff]  }
  0x75   : > { %4114 = vmatprep.subr.bf16.mxu1 %v4436_v15  ;;  %4504 = vmatmul.mubr.msk.bf16.gmra.mrb[32].mxu0 %vm4812_vm3, %v4503_v63  ;;  %v4435_v63 = vld [vmem:[%s5815_s3 + $0x198] sm:$0xff]  }
  0x76   : > { %1074 = vmatprep.mubr.bf16.mxu0 %v5204_v34 }
  0x78   : > { %4115 = vmatpush3.bf16.msra.mxu1 %v4436_v15  ;;  %v4434_v15 = vld [vmem:[%s5815_s3 + $0x1d8] sm:$0xff]  }
  0x79   : > { %4148 = vmatprep.subr.bf16.mxu1 %v5210_v60 }
  0x7b   : > { %4508 = vmatmul.mubr.msk.bf16.gmra.mrb[32].mxu1 %vm4812_vm3, %v5139_v20 }
  0x7c   : > { %1734 = vmatprep.mubr.bf16.mxu1 %v5130_v22 }
  0x7d   : > { %4512 = vmatmul.mubr.msk.bf16.gmra.mrb[36].mxu0 %vm4812_vm3, %v4511_v58 }
  0x7e   : > { %1082 = vmatprep.mubr.bf16.mxu0 %v5221_v8 }
  0x83   : > { %4516 = vmatmul.mubr.msk.bf16.gmra.mrb[36].mxu1 %vm4812_vm3, %v5164_v35 }
  0x84   : > { %1742 = vmatprep.mubr.bf16.mxu1 %v5155_v23 }
  0x85   : > { %4520 = vmatmul.mubr.msk.bf16.gmra.mrb[40].mxu0 %vm4812_vm3, %v4519_v16 }
  0x86   : > { %1090 = vmatprep.mubr.bf16.mxu0 %v5232_v11 }
  0x8b   : > { %4524 = vmatmul.mubr.msk.bf16.gmra.mrb[40].mxu1 %vm4812_vm3, %v5192_v54 }
  0x8c   : > { %1750 = vmatprep.mubr.bf16.mxu1 %v5184_v49 }
  0x8d   : > { %4528 = vmatmul.mubr.msk.bf16.gmra.mrb[44].mxu0 %vm4812_vm3, %v4527_v40 }
  0x8e   : > { %1098 = vmatprep.mubr.bf16.mxu0 %v5243_v6 }
  0x93   : > { %1751 = vmatmul.mubr.bf16.gmra.mrb[44].mxu1 %v5250_v50 }
  0x94   : > { %1758 = vmatprep.mubr.bf16.mxu1 %v5204_v34 }
  0x95   : > { %4532 = vmatmul.mubr.msk.bf16.gmra.mrb[48].mxu0 %vm4812_vm3, %v4531_v31 }
  0x96   : > { %1106 = vmatprep.mubr.bf16.mxu0 %v5254_v28 }
  0x9b   : > { %4536 = vmatmul.mubr.msk.bf16.gmra.mrb[48].mxu1 %vm4812_vm3, %v4511_v58  ;;  %v4437_v58 = vld [vmem:[%s5815_s3 + $0x1e0] sm:$0xff]  }
  0x9c   : > { %1766 = vmatprep.mubr.bf16.mxu1 %v5221_v8 }
  0x9d   : > { %4540 = vmatmul.mubr.msk.bf16.gmra.mrb[52].mxu0 %vm4812_vm3, %v4539_v32 }
  0x9e   : > { %1114 = vmatprep.mubr.bf16.mxu0 %v5264_v59 }
  0xa3   : > { %4544 = vmatmul.mubr.msk.bf16.gmra.mrb[52].mxu1 %vm4812_vm3, %v4519_v16  ;;  %v5334_v16 = vpack.c.bf16 %v709_v43, %v708_v0  ;;  %v1407_v0 = vld [vmem:[#allocation2 + $0xf2] sm:$0xff]  ;;  %v1408_v43 = vld [vmem:[#allocation2 + $0xfa] sm:$0xff] }
  0xa4   : > { %1774 = vmatprep.mubr.bf16.mxu1 %v5232_v11 }
  0xa5   : > { %4548 = vmatmul.mubr.msk.bf16.gmra.mrb[56].mxu0 %vm4812_vm3, %v4547_v14 }
  0xa6   : > { %1122 = vmatprep.mubr.bf16.mxu0 %v5274_v4 }
  0xab   : > { %4552 = vmatmul.mubr.msk.bf16.gmra.mrb[56].mxu1 %vm4812_vm3, %v4527_v40  ;;  %v1388_v40 = vld [vmem:[#allocation2 + $0x189] sm:$0xff] }
  0xac   : > { %1782 = vmatprep.mubr.bf16.mxu1 %v5243_v6  ;;  %v5352_v7 = vpack.c.bf16 %v1388_v40, %v1387_v19 }
  0xad   : > { %4556 = vmatmul.mubr.msk.bf16.gmra.mrb[60].mxu0 %vm4812_vm3, %v5287_v26 }
  0xae   : > { %4068 = vmatprep.mubr.bf16.mxu0 %v732_v37  ;;  %v4444_v37 = vld [vmem:[%s5815_s3 + $0x1b8] sm:$0xff]  }
  0xb3   : > { %4560 = vmatmul.mubr.msk.bf16.gmra.mrb[60].mxu1 %vm4812_vm3, %v4531_v31  ;;  %v713_v31 = vld [vmem:[#allocation2 + $0xb2] sm:$0xff] }
  0xb4   : > { %1790 = vmatprep.mubr.bf16.mxu1 %v5254_v28  ;;  %v5357_v2 = vpack.c.bf16 %v713_v31, %v712_v27  ;;  %v1412_v27 = vld [vmem:[#allocation2 + $0x12a] sm:$0xff]  ;;  %v1413_v31 = vld [vmem:[#allocation2 + $0x13a] sm:$0xff] }
  0xb5   : > { %4069 = vmatmul.mubr.bf16.vlgmr.msra.gmra.mrb[64].mxu0 %v5292_v42 }
  0xb6   : > { %3917 = vmatpush3.bf16.msra.mxu0 %v4429_v33  ;;  %4072 = vmatprep.mubr.bf16.mxu0 %v5299_v24  ;;  %v5375_v33 = vpack.c.bf16 %v5175_v47, %v5161_v44  ;;  %v4447_v44 = vld [vmem:[%s5815_s3 + $0x210] sm:$0xff]   ;;  %v4448_v47 = vld [vmem:[%s5815_s3 + $0x218] sm:$0xff]  }
  0xb7   : > { %3918 = vmatprep.subr.bf16.mxu0 %v4430_v55  ;;  %v2181_v55 = vpack.c.bf16 %v2116_v36, %v2115_v10  ;;  %v1419_v36 = vld [vmem:[#allocation2 + $0x182] sm:$0xff] }
  0xba   : > { %3919 = vmatpush3.bf16.msra.mxu0 %v4431_v45  ;;  %v2083_v45 = vld [vmem:[#allocation2 + $0x48] sm:$0xff] }
  0xbb   : > { %4564 = vmatmul.mubr.msk.bf16.gmra.mrb[64].mxu1 %vm4812_vm3, %v4539_v32  ;;  %3920 = vmatprep.subr.bf16.mxu0 %v4432_v17  ;;  %v2113_v32 = vld [vmem:[#allocation2 + $0x31] sm:$0xff]  ;;  %v2180_v17 = vpack.c.bf16 %v2084_v52, %v2083_v45 }
  0xbc   : > { %1798 = vmatprep.mubr.bf16.mxu1 %v5264_v59  ;;  %v2178_v12 = vpack.c.bf16 %v2114_v53, %v2113_v32  ;;  %v1415_v53 = vld [vmem:[#allocation2 + $0x152] sm:$0xff] }
  0xbd   : > { %4073 = vmatmul.mubr.bf16.gmra.mrb[68].mxu0 %v5313_v51 }
  0xbe   : > { %3921 = vmatpush3.bf16.msra.mxu0 %v4433_v25  ;;  %4076 = vmatprep.mubr.bf16.mxu0 %v5320_v56  ;;  %v1406_v25 = vld [vmem:[#allocation2 + $0xe2] sm:$0xff] }
  0xbf   : > { %3922 = vmatprep.subr.bf16.mxu0 %v4434_v15  ;;  %v5417_v15 = vpack.c.bf16 %v1406_v25, %v1405_v48 }
  0xc2   : > { %3923 = vmatpush3.bf16.msra.mxu0 %v4435_v63  ;;  %v4452_v63 = vld [vmem:[%s5815_s3 + $0x238] sm:$0xff]  }
  0xc3   : > { %4568 = vmatmul.mubr.msk.bf16.gmra.mrb[68].mxu1 %vm4812_vm3, %v4547_v14  ;;  %3924 = vmatprep.subr.bf16.mxu0 %v4437_v58  ;;  %v4442_v14 = vld [vmem:[%s5815_s3 + $0x1b0] sm:$0xff]  }
  0xc4   : > { %1806 = vmatprep.mubr.bf16.mxu1 %v5274_v4  ;;  %v1410_v58 = vld [vmem:[#allocation2 + $0x112] sm:$0xff] }
  0xc5   : > { %4077 = vmatmul.mubr.bf16.gmra.mrb[72].mxu0 %v5334_v16 }
  0xc6   : > { %3925 = vmatpush3.bf16.msra.mxu0 %v4438_v62  ;;  %4080 = vmatprep.mubr.bf16.mxu0 %v5341_v13 }
  0xc7   : > { %3926 = vmatprep.subr.bf16.mxu0 %v4439_v1 }
  0xca   : > { %3927 = vmatpush3.bf16.msra.mxu0 %v4440_v29  ;;  %v1411_v29 = vld [vmem:[#allocation2 + $0x122] sm:$0xff] }
  0xcb   : > { %4572 = vmatmul.mubr.msk.bf16.gmra.mrb[72].mxu1 %vm4812_vm3, %v5287_v26  ;;  %3928 = vmatprep.subr.bf16.mxu0 %v4441_v21  ;;  %v2081_v26 = vld [vmem:[#allocation2 + $0x30] sm:$0xff]  ;;  %v1414_v21 = vld [vmem:[#allocation2 + $0x142] sm:$0xff] }
  0xcc   : > { %1814 = vmatprep.mubr.bf16.mxu1 %v5352_v7  ;;  %v2177_v39 = vpack.c.bf16 %v2082_v57, %v2081_v26  ;;  %v5444_v32 = vpack.c.bf16 %v1414_v21, %v1413_v31  ;;  %v2096_v26 = vld [vmem:[#allocation2 + $0xe0] sm:$0xff] }
  0xcd   : > { %4081 = vmatmul.mubr.bf16.gmra.mrb[76].mxu0 %v5357_v2 }
  0xce   : > { %3929 = vmatpush3.bf16.msra.mxu0 %v4442_v14  ;;  %2450 = vmatprep.mubr.bf16.mxu0 %v2178_v12  ;;  %v1416_v14 = vld [vmem:[#allocation2 + $0x15a] sm:$0xff]  ;;  %v1417_v12 = vld [vmem:[#allocation2 + $0x16a] sm:$0xff] }
  0xcf   : > { %3930 = vmatprep.subr.bf16.mxu0 %v4443_v30  ;;  %v1418_v30 = vld [vmem:[#allocation2 + $0x172] sm:$0xff] }
  0xd0   : > { %v5452_v57 = vpack.c.bf16 %v1418_v30, %v1417_v12 }
  0xd2   : > { %3931 = vmatpush3.bf16.msra.mxu0 %v4444_v37  ;;  %v5449_v37 = vpack.c.bf16 %v1416_v14, %v1415_v53  ;;  %v2106_v14 = vld [vmem:[#allocation2 + $0x158] sm:$0xff] }
  0xd3   : > { %4576 = vmatmul.mubr.msk.bf16.gmra.mrb[76].mxu1 %vm4812_vm3, %v5375_v33 }
  0xd4   : > { %4116 = vmatprep.mubr.bf16.mxu1 %v5292_v42  ;;  %v1403_v42 = vld [vmem:[#allocation2 + $0xc2] sm:$0xff] }
  0xd5   : > { %2451 = vmatmul.mubr.bf16.vlgmr.msra.gmra.mrb[80].mxu0 %v2177_v39  ;;  %v1420_v39 = vld [vmem:[#allocation2 + $0x18a] sm:$0xff] }
  0xd6   : > { %2458 = vmatprep.mubr.bf16.mxu0 %v2181_v55 }
  0xdb   : > { %4117 = vmatmul.mubr.bf16.vlgmr.msra.gmra.mrb[80].mxu1 %v5299_v24 }
  0xdc   : > { %4149 = vmatpush3.bf16.msra.mxu1 %v5210_v60  ;;  %4120 = vmatprep.mubr.bf16.mxu1 %v5313_v51  ;;  %v4449_v60 = vld [vmem:[%s5815_s3 + $0x220] sm:$0xff]  }
  0xdd   : > { %4150 = vmatprep.subr.bf16.mxu1 %v4446_v46  ;;  %2459 = vmatmul.mubr.bf16.gmra.mrb[84].mxu0 %v2180_v17  ;;  %v2097_v17 = vld [vmem:[#allocation2 + $0xf0] sm:$0xff] }
  0xde   : > { %2466 = vmatprep.mubr.bf16.mxu0 %v5101_v61  ;;  %v4450_v61 = vld [vmem:[%s5815_s3 + $0x228] sm:$0xff]  }
  0xe0   : > { %4151 = vmatpush3.bf16.msra.mxu1 %v4446_v46  ;;  %v5458_v46 = vpack.c.bf16 %v1420_v39, %v1419_v36 }
  0xe1   : > { %4152 = vmatprep.subr.bf16.mxu1 %v4447_v44 }
  0xe3   : > { %4121 = vmatmul.mubr.bf16.gmra.mrb[84].mxu1 %v5320_v56 }
  0xe4   : > { %4124 = vmatprep.mubr.bf16.mxu1 %v5334_v16  ;;  %4153 = vmatpush3.bf16.msra.mxu1 %v4447_v44  ;;  %v2098_v44 = vld [vmem:[#allocation2 + $0xf8] sm:$0xff] }
  0xe5   : > { %4154 = vmatprep.subr.bf16.mxu1 %v4448_v47  ;;  %4580 = vmatmul.mubr.msk.bf16.gmra.mrb[88].mxu0 %vm4812_vm3, %v5110_v3  ;;  %v4451_v3 = vld [vmem:[%s5815_s3 + $0x230] sm:$0xff]  }
  0xe6   : > { %2474 = vmatprep.mubr.bf16.mxu0 %v5121_v18  ;;  %v5414_v18 = vpack.c.bf16 %v1404_v38, %v1403_v42 }
  0xe8   : > { %4155 = vmatpush3.bf16.msra.mxu1 %v4448_v47  ;;  %v2201_v47 = vpack.c.bf16 %v2098_v44, %v2097_v17  ;;  %v2108_v17 = vld [vmem:[#allocation2 + $0x170] sm:$0xff] }
  0xe9   : > { %4156 = vmatprep.subr.bf16.mxu1 %v4449_v60 }
  0xeb   : > { %4125 = vmatmul.mubr.bf16.gmra.mrb[88].mxu1 %v5341_v13 }
  0xec   : > { %4128 = vmatprep.mubr.bf16.mxu1 %v5357_v2  ;;  %4157 = vmatpush3.bf16.msra.mxu1 %v4449_v60 }
  0xed   : > { %4158 = vmatprep.subr.bf16.mxu1 %v4450_v61  ;;  %4584 = vmatmul.mubr.msk.bf16.gmra.mrb[92].mxu0 %vm4812_vm3, %v5139_v20  ;;  %v1409_v20 = vld [vmem:[#allocation2 + $0x10a] sm:$0xff] }
  0xee   : > { %2482 = vmatprep.mubr.bf16.mxu0 %v5130_v22  ;;  %v5427_v22 = vpack.c.bf16 %v1408_v43, %v1407_v0  ;;  %v5430_v5 = vpack.c.bf16 %v1410_v58, %v1409_v20  ;;  %v2102_v43 = vld [vmem:[#allocation2 + $0x128] sm:$0xff] }
  0xf0   : > { %4159 = vmatpush3.bf16.msra.mxu1 %v4450_v61 }
  0xf1   : > { %4160 = vmatprep.subr.bf16.mxu1 %v4451_v3 }
  0xf3   : > { %4129 = vmatmul.mubr.bf16.gmra.mrb[92].mxu1 %v5414_v18 }
  0xf4   : > { %4132 = vmatprep.mubr.bf16.mxu1 %v5417_v15  ;;  %4161 = vmatpush3.bf16.msra.mxu1 %v4451_v3  ;;  %v2099_v3 = vld [vmem:[#allocation2 + $0x108] sm:$0xff] }
  0xf5   : > { %4162 = vmatprep.subr.bf16.mxu1 %v4452_v63  ;;  %4588 = vmatmul.mubr.msk.bf16.gmra.mrb[96].mxu0 %vm4812_vm3, %v5164_v35 }
  0xf6   : > { %2490 = vmatprep.mubr.bf16.mxu0 %v5155_v23  ;;  %v5441_v23 = vpack.c.bf16 %v1412_v27, %v1411_v29 }
  0xf8   : > { %4163 = vmatpush3.bf16.msra.mxu1 %v4452_v63 }
  0xfa   : > { %v3660_v41 = vpop.f32.mrb[0].mxu0 }
  0xfb   : > { %v3661_v62 = vpop.f32.mrb[1].mxu0  ;;  %4133 = vmatmul.mubr.bf16.gmra.mrb[0].mxu1 %v5427_v22 }
  0xfc   : > { %v5432_v1 = vadd.f32 %v3661_v62, %v3660_v41  ;;  %v3663_v19 = vpop.f32.mrb[2].mxu0  ;;  %4136 = vmatprep.mubr.bf16.mxu1 %v5430_v5 }
  0xfd   : > { %v3664_v40 = vpop.f32.mrb[3].mxu0  ;;  %4592 = vmatmul.mubr.msk.bf16.gmra.mrb[100].mxu0 %vm4812_vm3, %v5192_v54  ;;  %v2095_v54 = vld [vmem:[#allocation2 + $0xd8] sm:$0xff] }
  0xfe   : > { %v5436_v35 = vadd.f32 %v3664_v40, %v3663_v19  ;;  %2498 = vmatprep.mubr.bf16.mxu0 %v5184_v49  ;;  %v2198_v49 = vpack.c.bf16 %v2096_v26, %v2095_v54 }
 0x103   : > { %4137 = vmatmul.mubr.bf16.gmra.mrb[4].mxu1 %v5441_v23 }
 0x104   : > { %4140 = vmatprep.mubr.bf16.mxu1 %v5444_v32 }
 0x105   : > { %2499 = vmatmul.mubr.bf16.gmra.mrb[104].mxu0 %v5250_v50 }
 0x106   : > { %2506 = vmatprep.mubr.bf16.mxu0 %v5204_v34 }
 0x10b   : > { %4141 = vmatmul.mubr.bf16.gmra.mrb[8].mxu1 %v5449_v37 }
 0x10c   : > { %v3666_v10 = vpop.f32.mrb[4].mxu0  ;;  %4144 = vmatprep.mubr.bf16.mxu1 %v5452_v57 }
 0x10d   : > { %v3667_v55 = vpop.f32.mrb[5].mxu0  ;;  %2507 = vmatmul.mubr.bf16.gmra.mrb[108].mxu0 %v2198_v49 }
 0x10e   : > { %v5456_v45 = vadd.f32 %v3667_v55, %v3666_v10  ;;  %v3669_v50 = vpop.f32.mrb[6].mxu0  ;;  %2514 = vmatprep.mubr.bf16.mxu0 %v5221_v8  ;;  %v2100_v8 = vld [vmem:[#allocation2 + $0x110] sm:$0xff] }
 0x10f   : > { %v3670_v52 = vpop.f32.mrb[7].mxu0  ;;  %v2204_v63 = vpack.c.bf16 %v2100_v8, %v2099_v3 }
 0x110   : > { %v5460_v34 = vadd.f32 %v3670_v52, %v3669_v50  ;;  %v2107_v52 = vld [vmem:[#allocation2 + $0x168] sm:$0xff] }
 0x113   : > { %4145 = vmatmul.mubr.bf16.gmra.mrb[12].mxu1 %v5458_v46 }
 0x114   : > { %v3672_v60 = vpop.f32.mrb[8].mxu0  ;;  %4164 = vmatprep.mubr.bf16.mxu1 %v5299_v24  ;;  %v2101_v24 = vld [vmem:[#allocation2 + $0x120] sm:$0xff] }
 0x115   : > { %v3673_v61 = vpop.f32.mrb[9].mxu0  ;;  %2515 = vmatmul.mubr.bf16.gmra.mrb[112].mxu0 %v2201_v47  ;;  %v2207_v19 = vpack.c.bf16 %v2102_v43, %v2101_v24 }
 0x116   : > { %v5465_v42 = vadd.f32 %v3673_v61, %v3672_v60  ;;  %v3675_v38 = vpop.f32.mrb[10].mxu0  ;;  %2522 = vmatprep.mubr.bf16.mxu0 %v5232_v11 }
 0x117   : > { %v3676_v48 = vpop.f32.mrb[11].mxu0 }
 0x118   : > { %v5467_v25 = vadd.f32 %v3676_v48, %v3675_v38  ;;  %v2216_v48 = vpack.c.bf16 %v2108_v17, %v2107_v52 }
 0x11b   : > { %4165 = vmatmul.mubr.bf16.vlgmr.msra.gmra.mrb[80].mxu1 %v5313_v51  ;;  %v2103_v51 = vld [vmem:[#allocation2 + $0x138] sm:$0xff] }
 0x11c   : > { %4168 = vmatprep.mubr.bf16.mxu1 %v5320_v56  ;;  %v2104_v56 = vld [vmem:[#allocation2 + $0x140] sm:$0xff] }
 0x11d   : > { %2523 = vmatmul.mubr.bf16.gmra.mrb[116].mxu0 %v2204_v63  ;;  %v2210_v29 = vpack.c.bf16 %v2104_v56, %v2103_v51 }
 0x11e   : > { %2530 = vmatprep.mubr.bf16.mxu0 %v5243_v6 }
 0x11f   : > { %v3678_v0 = vpop.f32.mrb[12].mxu0 }
 0x120   : > { %v3679_v20 = vpop.f32.mrb[13].mxu0 }
 0x121   : > { %v5473_v58 = vadd.f32 %v3679_v20, %v3678_v0  ;;  %v3681_v41 = vpop.f32.mrb[14].mxu0  ;;  %v2143_v20 = vld [vmem:[#allocation2 + $0x199] sm:$0xff] }
 0x122   : > { %v3682_v62 = vpop.f32.mrb[15].mxu0 }
 0x123   : > { %4169 = vmatmul.mubr.bf16.gmra.mrb[84].mxu1 %v5334_v16  ;;  %v5476_v11 = vadd.f32 %v3682_v62, %v3681_v41  ;;  %v2144_v41 = vld [vmem:[#allocation2 + $0x1a1] sm:$0xff] }
 0x124   : > { %4172 = vmatprep.mubr.bf16.mxu1 %v5341_v13 }
 0x125   : > { %2531 = vmatmul.mubr.bf16.gmra.mrb[120].mxu0 %v2207_v19 }
 0x126   : > { %2538 = vmatprep.mubr.bf16.mxu0 %v5254_v28  ;;  %v2105_v28 = vld [vmem:[#allocation2 + $0x150] sm:$0xff] }
 0x127   : > { %v3684_v6 = vpop.f32.mrb[16].mxu0  ;;  %v2213_v10 = vpack.c.bf16 %v2106_v14, %v2105_v28 }
 0x128   : > { %v3685_v40 = vpop.f32.mrb[17].mxu0 }
 0x129   : > { %v5481_v27 = vadd.f32 %v3685_v40, %v3684_v6  ;;  %v3687_v31 = vpop.f32.mrb[18].mxu0  ;;  %v2223_v6 = vpack.c.bf16 %v2144_v41, %v2143_v20 }
 0x12a   : > { %v3688_v21 = vpop.f32.mrb[19].mxu0 }
 0x12b   : > { %4173 = vmatmul.mubr.bf16.gmra.mrb[88].mxu1 %v5357_v2  ;;  %v5484_v16 = vadd.f32 %v3688_v21, %v3687_v31  ;;  %v2111_v21 = vld [vmem:[#allocation2 + $0x198] sm:$0xff] }
 0x12c   : > { %4176 = vmatprep.mubr.bf16.mxu1 %v5414_v18 }
 0x12d   : > { %2539 = vmatmul.mubr.bf16.gmra.mrb[124].mxu0 %v2210_v29 }
 0x12e   : > { %v3796_v53 = vpop.f32.mrb[16].mxu1  ;;  %2546 = vmatprep.mubr.bf16.mxu0 %v5264_v59 }
 0x12f   : > { %v3797_v13 = vpop.f32.mrb[17].mxu1 }
 0x130   : > { %v5487_v12 = vadd.f32 %v3797_v13, %v3796_v53  ;;  %v3799_v30 = vpop.f32.mrb[18].mxu1  ;;  %v3690_v2 = vpop.f32.mrb[20].mxu0  ;;  %v2112_v53 = vld [vmem:[#allocation2 + $0x1a0] sm:$0xff] }
 0x131   : > { %v3800_v54 = vpop.f32.mrb[19].mxu1  ;;  %v3691_v49 = vpop.f32.mrb[21].mxu0 }
 0x132   : > { %v5489_v26 = vadd.f32 %v3800_v54, %v3799_v30  ;;  %v5492_v18 = vadd.f32 %v3691_v49, %v3690_v2  ;;  %v3693_v36 = vpop.f32.mrb[22].mxu0 }
 0x133   : > { %4177 = vmatmul.mubr.bf16.gmra.mrb[92].mxu1 %v5417_v15  ;;  %v3694_v39 = vpop.f32.mrb[23].mxu0 }
 0x134   : > { %4180 = vmatprep.mubr.bf16.mxu1 %v5427_v22  ;;  %v5495_v59 = vadd.f32 %v3694_v39, %v3693_v36 }
 0x135   : > { %2547 = vmatmul.mubr.bf16.gmra.mrb[128].mxu0 %v2213_v10  ;;  %v2176_v10 = vld [vmem:[#allocation2 + $0x1a2] sm:$0xff] }
 0x136   : > { %v3802_v55 = vpop.f32.mrb[20].mxu1  ;;  %2554 = vmatprep.mubr.bf16.mxu0 %v5274_v4 }
 0x137   : > { %v3803_v50 = vpop.f32.mrb[21].mxu1 }
 0x138   : > { %v5498_v44 = vadd.f32 %v3803_v50, %v3802_v55  ;;  %v3805_v47 = vpop.f32.mrb[22].mxu1  ;;  %v3696_v15 = vpop.f32.mrb[24].mxu0 }
 0x139   : > { %v3806_v60 = vpop.f32.mrb[23].mxu1  ;;  %v3697_v38 = vpop.f32.mrb[25].mxu0 }
 0x13a   : > { %v5500_v61 = vadd.f32 %v3806_v60, %v3805_v47  ;;  %v5503_v22 = vadd.f32 %v3697_v38, %v3696_v15  ;;  %v3699_v3 = vpop.f32.mrb[26].mxu0 }
 0x13b   : > { %4181 = vmatmul.mubr.bf16.gmra.mrb[0].mxu1 %v5430_v5  ;;  %v3700_v8 = vpop.f32.mrb[27].mxu0 }
 0x13c   : > { %4184 = vmatprep.mubr.bf16.mxu1 %v5441_v23  ;;  %v5506_v4 = vadd.f32 %v3700_v8, %v3699_v3 }
 0x13d   : > { %2555 = vmatmul.mubr.bf16.gmra.mrb[132].mxu0 %v2216_v48 }
 0x13e   : > { %v3808_v63 = vpop.f32.mrb[24].mxu1  ;;  %2562 = vmatprep.mubr.bf16.mxu0 %v5352_v7 }
 0x13f   : > { %v3809_v0 = vpop.f32.mrb[25].mxu1 }
 0x140   : > { %v5509_v24 = vadd.f32 %v3809_v0, %v3808_v63  ;;  %v3811_v43 = vpop.f32.mrb[26].mxu1  ;;  %v3702_v5 = vpop.f32.mrb[28].mxu0 }
 0x141   : > { %v3812_v62 = vpop.f32.mrb[27].mxu1  ;;  %v3703_v51 = vpop.f32.mrb[29].mxu0 }
 0x142   : > { %v5511_v19 = vadd.f32 %v3812_v62, %v3811_v43  ;;  %v5514_v23 = vadd.f32 %v3703_v51, %v3702_v5  ;;  %v3705_v56 = vpop.f32.mrb[30].mxu0 }
 0x143   : > { %4185 = vmatmul.mubr.bf16.gmra.mrb[4].mxu1 %v5444_v32  ;;  %v3706_v40 = vpop.f32.mrb[31].mxu0 }
 0x144   : > { %4188 = vmatprep.mubr.bf16.mxu1 %v5449_v37  ;;  %v5517_v7 = vadd.f32 %v3706_v40, %v3705_v56  ;;  %v2222_v37 = vpack.c.bf16 %v2112_v53, %v2111_v21 }
 0x145   : > { %4596 = vmatmul.mubr.msk.bf16.gmra.mrb[136].mxu0 %vm4812_vm3, %v5375_v33  ;;  %v2175_v33 = vld [vmem:[#allocation2 + $0x19a] sm:$0xff] }
 0x146   : > { %v3814_v29 = vpop.f32.mrb[28].mxu1  ;;  %2570 = vmatprep.mubr.bf16.mxu0 %v2223_v6  ;;  %v2224_v50 = vpack.c.bf16 %v2176_v10, %v2175_v33 }
 0x147   : > { %v3815_v31 = vpop.f32.mrb[29].mxu1 }
 0x148   : > { %v5522_v13 = vadd.f32 %v3815_v31, %v3814_v29  ;;  %v3817_v32 = vpop.f32.mrb[30].mxu1  ;;  %v3708_v14 = vpop.f32.mrb[32].mxu0 }
 0x149   : > { %v3818_v28 = vpop.f32.mrb[31].mxu1  ;;  %v3709_v54 = vpop.f32.mrb[33].mxu0 }
 0x14a   : > { %v5524_v30 = vadd.f32 %v3818_v28, %v3817_v32  ;;  %v5527_v2 = vadd.f32 %v3709_v54, %v3708_v14  ;;  %v3711_v49 = vpop.f32.mrb[34].mxu0 }
 0x14b   : > { %4189 = vmatmul.mubr.bf16.gmra.mrb[8].mxu1 %v5452_v57  ;;  %v3712_v9 = vpop.f32.mrb[35].mxu0 }
 0x14c   : > { %4192 = vmatprep.mubr.bf16.mxu1 %v5458_v46  ;;  %v5530_v36 = vadd.f32 %v3712_v9, %v3711_v49 }
 0x14d   : > { %2571 = vmatmul.mubr.bf16.gmra.mrb[140].mxu0 %v2222_v37 }
 0x14e   : > { %v3820_v39 = vpop.f32.mrb[32].mxu1 }
 0x14f   : > { %v3821_v55 = vpop.f32.mrb[33].mxu1 }
 0x150   : > { %v5532_v52 = vadd.f32 %v3821_v55, %v3820_v39  ;;  %v3823_v17 = vpop.f32.mrb[34].mxu1  ;;  %v3714_v60 = vpop.f32.mrb[36].mxu0 }
 0x151   : > { %v3824_v47 = vpop.f32.mrb[35].mxu1  ;;  %v3715_v15 = vpop.f32.mrb[37].mxu0 }
 0x152   : > { %v5534_v57 = vadd.f32 %v3824_v47, %v3823_v17  ;;  %v3716_v38 = vadd.f32 %v3715_v15, %v3714_v60  ;;  %v3717_v48 = vpop.f32.mrb[38].mxu0 }
 0x153   : > { %4193 = vmatmul.mubr.bf16.gmra.mrb[12].mxu1 %v2224_v50  ;;  %v3718_v46 = vpop.f32.mrb[39].mxu0 }
 0x154   : > { %v3719_v3 = vadd.f32 %v3718_v46, %v3717_v48 }
 0x156   : > { %v3826_v8 = vpop.f32.mrb[36].mxu1 }
 0x157   : > { %v3827_v63 = vpop.f32.mrb[37].mxu1 }
 0x158   : > { %v5536_v0 = vadd.f32 %v3827_v63, %v3826_v8  ;;  %v3829_v43 = vpop.f32.mrb[38].mxu1  ;;  %v3720_v41 = vpop.f32.mrb[40].mxu0 }
 0x159   : > { %v3830_v20 = vpop.f32.mrb[39].mxu1  ;;  %v3721_v5 = vpop.f32.mrb[41].mxu0 }
 0x15a   : > { %v5538_v62 = vadd.f32 %v3830_v20, %v3829_v43  ;;  %v3722_v51 = vadd.f32 %v3721_v5, %v3720_v41  ;;  %v3723_v56 = vpop.f32.mrb[42].mxu0 }
 0x15b   : > { %v3724_v6 = vpop.f32.mrb[43].mxu0 }
 0x15c   : > { %v5540_v40 = vadd.f32 %v3724_v6, %v3723_v56 }
 0x15e   : > { %v3832_v29 = vpop.f32.mrb[40].mxu1 }
 0x15f   : > { %v3833_v31 = vpop.f32.mrb[41].mxu1 }
 0x160   : > { %v5542_v21 = vadd.f32 %v3833_v31, %v3832_v29  ;;  %v3835_v53 = vpop.f32.mrb[42].mxu1  ;;  %v3726_v28 = vpop.f32.mrb[44].mxu0 }
 0x161   : > { %v3836_v32 = vpop.f32.mrb[43].mxu1  ;;  %v3727_v54 = vpop.f32.mrb[45].mxu0 }
 0x162   : > { %v5544_v14 = vadd.f32 %v3836_v32, %v3835_v53  ;;  %v5546_v37 = vadd.f32 %v3727_v54, %v3726_v28  ;;  %v3729_v49 = vpop.f32.mrb[46].mxu0 }
 0x163   : > { %v3730_v9 = vpop.f32.mrb[47].mxu0 }
 0x164   : > { %v5548_v33 = vadd.f32 %v3730_v9, %v3729_v49 }
 0x166   : > { %v3838_v10 = vpop.f32.mrb[44].mxu1 }
 0x167   : > { %v3839_v39 = vpop.f32.mrb[45].mxu1 }
 0x168   : > { %v5550_v55 = vadd.f32 %v3839_v39, %v3838_v10  ;;  %v3841_v50 = vpop.f32.mrb[46].mxu1  ;;  %v3732_v47 = vpop.f32.mrb[48].mxu0 }
 0x169   : > { %v3842_v17 = vpop.f32.mrb[47].mxu1  ;;  %v3733_v15 = vpop.f32.mrb[49].mxu0 }
 0x16a   : > { %v5552_v60 = vadd.f32 %v3842_v17, %v3841_v50  ;;  %v5554_v48 = vadd.f32 %v3733_v15, %v3732_v47  ;;  %v3735_v46 = vpop.f32.mrb[50].mxu0 }
 0x16b   : > { %v3736_v8 = vpop.f32.mrb[51].mxu0 }
 0x16c   : > { %v5556_v63 = vadd.f32 %v3736_v8, %v3735_v46 }
 0x16e   : > { %v3844_v43 = vpop.f32.mrb[48].mxu1 }
 0x16f   : > { %v3845_v20 = vpop.f32.mrb[49].mxu1 }
 0x170   : > { %v3846_v41 = vadd.f32 %v3845_v20, %v3844_v43  ;;  %v3847_v5 = vpop.f32.mrb[50].mxu1  ;;  %v3738_v6 = vpop.f32.mrb[52].mxu0 }
 0x171   : > { %v3848_v56 = vpop.f32.mrb[51].mxu1  ;;  %v3739_v53 = vpop.f32.mrb[53].mxu0 }
 0x172   : > { %v5559_v29 = vadd.f32 %v3846_v41, %v5527_v2  ;;  %v3849_v31 = vadd.f32 %v3848_v56, %v3847_v5  ;;  %v5561_v32 = vadd.f32 %v3739_v53, %v3738_v6  ;;  %v3741_v28 = vpop.f32.mrb[54].mxu0 }
 0x173   : > { %v3742_v49 = vpop.f32.mrb[55].mxu0 }
 0x174   : > { %v5564_v54 = vadd.f32 %v3849_v31, %v5530_v36  ;;  %v5566_v9 = vadd.f32 %v3742_v49, %v3741_v28 }
 0x176   : > { %v3850_v10 = vpop.f32.mrb[52].mxu1 }
 0x177   : > { %v3851_v39 = vpop.f32.mrb[53].mxu1 }
 0x178   : > { %v3852_v50 = vadd.f32 %v3851_v39, %v3850_v10  ;;  %v3853_v17 = vpop.f32.mrb[54].mxu1  ;;  %v3744_v15 = vpop.f32.mrb[56].mxu0 }
 0x179   : > { %v3854_v47 = vpop.f32.mrb[55].mxu1  ;;  %v3745_v8 = vpop.f32.mrb[57].mxu0 }
 0x17a   : > { %v5568_v46 = vadd.f32 %v3852_v50, %v3716_v38  ;;  %v3855_v2 = vadd.f32 %v3854_v47, %v3853_v17  ;;  %v5570_v43 = vadd.f32 %v3745_v8, %v3744_v15  ;;  %v3747_v20 = vpop.f32.mrb[58].mxu0 }
 0x17b   : > { %v3748_v36 = vpop.f32.mrb[59].mxu0 }
 0x17c   : > { %v5572_v41 = vadd.f32 %v3855_v2, %v3719_v3  ;;  %v5574_v5 = vadd.f32 %v3748_v36, %v3747_v20 }
 0x17e   : > { %v3856_v56 = vpop.f32.mrb[56].mxu1 }
 0x17f   : > { %v3857_v6 = vpop.f32.mrb[57].mxu1 }
 0x180   : > { %v3858_v31 = vadd.f32 %v3857_v6, %v3856_v56  ;;  %v3859_v53 = vpop.f32.mrb[58].mxu1  ;;  %v3750_v49 = vpop.f32.mrb[60].mxu0 }
 0x181   : > { %v3860_v28 = vpop.f32.mrb[59].mxu1  ;;  %v3751_v39 = vpop.f32.mrb[61].mxu0 }
 0x182   : > { %v5576_v10 = vadd.f32 %v3858_v31, %v3722_v51  ;;  %v3861_v38 = vadd.f32 %v3860_v28, %v3859_v53  ;;  %v5578_v50 = vadd.f32 %v3751_v39, %v3750_v49  ;;  %v3753_v17 = vpop.f32.mrb[62].mxu0 }
 0x183   : > { %v3754_v3 = vpop.f32.mrb[63].mxu0 }
 0x184   : > { %v5581_v47 = vadd.f32 %v3861_v38, %v5540_v40  ;;  %v5583_v15 = vadd.f32 %v3754_v3, %v3753_v17 }
 0x186   : > { %v3862_v2 = vpop.f32.mrb[60].mxu1 }
 0x187   : > { %v3863_v8 = vpop.f32.mrb[61].mxu1 }
 0x188   : > { %v3864_v20 = vadd.f32 %v3863_v8, %v3862_v2  ;;  %v3865_v36 = vpop.f32.mrb[62].mxu1  ;;  %v4070_v6 = vpop.f32.mrb[64].mxu0 }
 0x189   : > { %v3866_v56 = vpop.f32.mrb[63].mxu1  ;;  %v1174_v53 = vadd.f32 %v4070_v6, %v5456_v45  ;;  %v1165_v28 = vpop.f32.mrb[65].mxu0 }
 0x18a   : > { %v5586_v51 = vadd.f32 %v3864_v20, %v5546_v37  ;;  %v3867_v31 = vadd.f32 %v3866_v56, %v3865_v36  ;;  %v1166_v49 = vadd.f32 %v5432_v1, %v1165_v28  ;;  %v4071_v40 = vpop.f32.mrb[66].mxu0 }
 0x18b   : > { %v5594_v39 = vadd.f32 %v5498_v44, %v1174_v53  ;;  %v1177_v17 = vadd.f32 %v4071_v40, %v5460_v34  ;;  %v1168_v3 = vpop.f32.mrb[67].mxu0 }
 0x18c   : > { %v5591_v38 = vadd.f32 %v3867_v31, %v5548_v33  ;;  %v5598_v2 = vadd.f32 %v5487_v12, %v1166_v49  ;;  %v1169_v37 = vadd.f32 %v5436_v35, %v1168_v3 }
 0x18d   : > { %v5602_v45 = vadd.f32 %v5500_v61, %v1177_v17 }
 0x18e   : > { %v3868_v8 = vpop.f32.mrb[64].mxu1  ;;  %v5605_v20 = vadd.f32 %v5489_v26, %v1169_v37 }
 0x18f   : > { %v3869_v1 = vpop.f32.mrb[65].mxu1 }
 0x190   : > { %v3870_v33 = vadd.f32 %v3869_v1, %v3868_v8  ;;  %v3871_v36 = vpop.f32.mrb[66].mxu1  ;;  %v4074_v56 = vpop.f32.mrb[68].mxu0 }
 0x191   : > { %v3872_v44 = vpop.f32.mrb[67].mxu1  ;;  %v1190_v12 = vadd.f32 %v4074_v56, %v5473_v58  ;;  %v1181_v31 = vpop.f32.mrb[69].mxu0 }
 0x192   : > { %v5608_v34 = vadd.f32 %v3870_v33, %v5554_v48  ;;  %v3873_v6 = vadd.f32 %v3872_v44, %v3871_v36  ;;  %v1182_v35 = vadd.f32 %v5465_v42, %v1181_v31  ;;  %v4075_v53 = vpop.f32.mrb[70].mxu0 }
 0x193   : > { %v5616_v26 = vadd.f32 %v5522_v13, %v1190_v12  ;;  %v1193_v28 = vadd.f32 %v4075_v53, %v5476_v11  ;;  %v1184_v49 = vpop.f32.mrb[71].mxu0 }
 0x194   : > { %v5613_v61 = vadd.f32 %v3873_v6, %v5556_v63  ;;  %v5620_v40 = vadd.f32 %v5509_v24, %v1182_v35  ;;  %v1185_v48 = vadd.f32 %v5467_v25, %v1184_v49 }
 0x195   : > { %v5624_v58 = vadd.f32 %v5524_v30, %v1193_v28 }
 0x196   : > { %v3874_v17 = vpop.f32.mrb[68].mxu1  ;;  %v5627_v3 = vadd.f32 %v5511_v19, %v1185_v48 }
 0x197   : > { %v3875_v42 = vpop.f32.mrb[69].mxu1 }
 0x198   : > { %v3876_v63 = vadd.f32 %v3875_v42, %v3874_v17  ;;  %v3877_v37 = vpop.f32.mrb[70].mxu1  ;;  %v4078_v8 = vpop.f32.mrb[72].mxu0 }
 0x199   : > { %v3878_v13 = vpop.f32.mrb[71].mxu1  ;;  %v1206_v24 = vadd.f32 %v4078_v8, %v5492_v18  ;;  %v1197_v33 = vpop.f32.mrb[73].mxu0 }
 0x19a   : > { %v5630_v11 = vadd.f32 %v3876_v63, %v5561_v32  ;;  %v3879_v1 = vadd.f32 %v3878_v13, %v3877_v37  ;;  %v1198_v25 = vadd.f32 %v5481_v27, %v1197_v33  ;;  %v4079_v36 = vpop.f32.mrb[74].mxu0 }
 0x19b   : > { %v5638_v19 = vadd.f32 %v5536_v0, %v1206_v24  ;;  %v1209_v44 = vadd.f32 %v4079_v36, %v5495_v59  ;;  %v1200_v56 = vpop.f32.mrb[75].mxu0 }
 0x19c   : > { %v5635_v30 = vadd.f32 %v3879_v1, %v5566_v9  ;;  %v5642_v6 = vadd.f32 %v5532_v52, %v1198_v25  ;;  %v1201_v32 = vadd.f32 %v5484_v16, %v1200_v56 }
 0x19d   : > { %v5646_v18 = vadd.f32 %v5538_v62, %v1209_v44 }
 0x19e   : > { %v3880_v12 = vpop.f32.mrb[72].mxu1  ;;  %v5649_v31 = vadd.f32 %v5534_v57, %v1201_v32 }
 0x19f   : > { %v3881_v27 = vpop.f32.mrb[73].mxu1 }
 0x1a0   : > { %v3882_v9 = vadd.f32 %v3881_v27, %v3880_v12  ;;  %v3883_v35 = vpop.f32.mrb[74].mxu1  ;;  %v4082_v53 = vpop.f32.mrb[76].mxu0 }
 0x1a1   : > { %v3884_v0 = vpop.f32.mrb[75].mxu1  ;;  %v1222_v52 = vadd.f32 %v4082_v53, %v5514_v23  ;;  %v1213_v49 = vpop.f32.mrb[77].mxu0 }
 0x1a2   : > { %v5652_v59 = vadd.f32 %v3882_v9, %v5570_v43  ;;  %v3885_v28 = vadd.f32 %v3884_v0, %v3883_v35  ;;  %v1214_v16 = vadd.f32 %v5503_v22, %v1213_v49  ;;  %v4083_v48 = vpop.f32.mrb[78].mxu0 }
 0x1a3   : > { %v5660_v57 = vadd.f32 %v5550_v55, %v1222_v52  ;;  %v1225_v17 = vadd.f32 %v4083_v48, %v5517_v7  ;;  %v1216_v42 = vpop.f32.mrb[79].mxu0 }
 0x1a4   : > { %v5657_v62 = vadd.f32 %v3885_v28, %v5574_v5  ;;  %v5664_v63 = vadd.f32 %v5542_v21, %v1214_v16  ;;  %v1217_v43 = vadd.f32 %v5506_v4, %v1216_v42 }
 0x1a5   : > { %v5668_v23 = vadd.f32 %v5552_v60, %v1225_v17 }
 0x1a6   : > { %v3886_v37 = vpop.f32.mrb[76].mxu1  ;;  %v4273_v13 = vadd.f32 %v5544_v14, %v1217_v43 }
 0x1a7   : > { %v3887_v22 = vpop.f32.mrb[77].mxu1 }
 0x1a8   : > { %v3888_v5 = vadd.f32 %v3887_v22, %v3886_v37  ;;  %v3889_v8 = vpop.f32.mrb[78].mxu1  ;;  %v3932_v55 = vpop.f32.mrb[80].mxu0 }
 0x1a9   : > { %v3890_v1 = vpop.f32.mrb[79].mxu1  ;;  %v3933_v33 = vpop.f32.mrb[81].mxu0 }
 0x1aa   : > { %v5672_v24 = vadd.f32 %v3888_v5, %v5578_v50  ;;  %v3891_v7 = vadd.f32 %v3890_v1, %v3889_v8  ;;  %v3934_v21 = vadd.f32 %v3933_v33, %v3932_v55  ;;  %v3935_v25 = vpop.f32.mrb[82].mxu0 }
 0x1ab   : > { %v3936_v36 = vpop.f32.mrb[83].mxu0 }
 0x1ac   : > { %v5675_v4 = vadd.f32 %v3891_v7, %v5583_v15  ;;  %v3937_v60 = vadd.f32 %v3936_v36, %v3935_v25  ;;  %v5678_v44 = vadd.f32 %v5598_v2, %v3934_v21 }
 0x1ae   : > { %v5681_v14 = vadd.f32 %v5605_v20, %v3937_v60 }
 0x1b0   : > { %v3938_v56 = vpop.f32.mrb[84].mxu0 }
 0x1b1   : > { %v3939_v32 = vpop.f32.mrb[85].mxu0 }
 0x1b2   : > { %v3940_v12 = vadd.f32 %v3939_v32, %v3938_v56  ;;  %v3941_v50 = vpop.f32.mrb[86].mxu0 }
 0x1b3   : > { %v3942_v27 = vpop.f32.mrb[87].mxu0 }
 0x1b4   : > { %v3943_v9 = vadd.f32 %v3942_v27, %v3941_v50  ;;  %v4214_v35 = vadd.f32 %v5594_v39, %v3940_v12 }
 0x1b6   : > { %v5685_v0 = vadd.f32 %v5602_v45, %v3943_v9 }
 0x1b8   : > { %v3944_v15 = vpop.f32.mrb[88].mxu0 }
 0x1b9   : > { %v3945_v53 = vpop.f32.mrb[89].mxu0 }
 0x1ba   : > { %v3946_v28 = vadd.f32 %v3945_v53, %v3944_v15  ;;  %v3947_v52 = vpop.f32.mrb[90].mxu0 }
 0x1bb   : > { %v3948_v2 = vpop.f32.mrb[91].mxu0 }
 0x1bc   : > { %v3949_v49 = vadd.f32 %v3948_v2, %v3947_v52  ;;  %v5688_v20 = vadd.f32 %v5620_v40, %v3946_v28 }
 0x1be   : > { %v5691_v16 = vadd.f32 %v5627_v3, %v3949_v49 }
 0x1c0   : > { %v3950_v48 = vpop.f32.mrb[92].mxu0 }
 0x1c1   : > { %v3951_v17 = vpop.f32.mrb[93].mxu0 }
 0x1c2   : > { %v3952_v42 = vadd.f32 %v3951_v17, %v3950_v48  ;;  %v3953_v43 = vpop.f32.mrb[94].mxu0 }
 0x1c3   : > { %v3954_v39 = vpop.f32.mrb[95].mxu0 }
 0x1c4   : > { %v3955_v37 = vadd.f32 %v3954_v39, %v3953_v43  ;;  %v5694_v45 = vadd.f32 %v5616_v26, %v3952_v42 }
 0x1c6   : > { %v5697_v22 = vadd.f32 %v5624_v58, %v3955_v37 }
 0x1c8   : > { %v3956_v5 = vpop.f32.mrb[96].mxu0 }
 0x1c9   : > { %v3957_v8 = vpop.f32.mrb[97].mxu0 }
 0x1ca   : > { %v3958_v1 = vadd.f32 %v3957_v8, %v3956_v5  ;;  %v3959_v40 = vpop.f32.mrb[98].mxu0 }
 0x1cb   : > { %v3960_v55 = vpop.f32.mrb[99].mxu0 }
 0x1cc   : > { %v3961_v7 = vadd.f32 %v3960_v55, %v3959_v40  ;;  %v5700_v3 = vadd.f32 %v5642_v6, %v3958_v1 }
 0x1ce   : > { %v5703_v33 = vadd.f32 %v5649_v31, %v3961_v7 }
 0x1d0   : > { %v3962_v21 = vpop.f32.mrb[100].mxu0 }
 0x1d1   : > { %v3963_v25 = vpop.f32.mrb[101].mxu0 }
 0x1d2   : > { %v3964_v36 = vadd.f32 %v3963_v25, %v3962_v21  ;;  %v3965_v26 = vpop.f32.mrb[102].mxu0 }
 0x1d3   : > { %v3966_v60 = vpop.f32.mrb[103].mxu0 }
 0x1d4   : > { %v3967_v56 = vadd.f32 %v3966_v60, %v3965_v26  ;;  %v5706_v58 = vadd.f32 %v5638_v19, %v3964_v36 }
 0x1d6   : > { %v5709_v32 = vadd.f32 %v5646_v18, %v3967_v56 }
 0x1d8   : > { %v3968_v12 = vpop.f32.mrb[104].mxu0 }
 0x1d9   : > { %v3969_v50 = vpop.f32.mrb[105].mxu0 }
 0x1da   : > { %v3970_v6 = vadd.f32 %v3969_v50, %v3968_v12  ;;  %v3971_v27 = vpop.f32.mrb[106].mxu0 }
 0x1db   : > { %v3972_v9 = vpop.f32.mrb[107].mxu0 }
 0x1dc   : > { %v3973_v31 = vadd.f32 %v3972_v9, %v3971_v27  ;;  %v5712_v15 = vadd.f32 %v5664_v63, %v3970_v6 }
 0x1de   : > { %v5714_v53 = vadd.f32 %v4273_v13, %v3973_v31 }
 0x1e0   : > { %v3974_v28 = vpop.f32.mrb[108].mxu0 }
 0x1e1   : > { %v3975_v52 = vpop.f32.mrb[109].mxu0 }
 0x1e2   : > { %v3976_v2 = vadd.f32 %v3975_v52, %v3974_v28  ;;  %v3977_v49 = vpop.f32.mrb[110].mxu0 }
 0x1e3   : > { %v3978_v19 = vpop.f32.mrb[111].mxu0 }
 0x1e4   : > { %v3979_v48 = vadd.f32 %v3978_v19, %v3977_v49  ;;  %v5718_v18 = vadd.f32 %v5660_v57, %v3976_v2 }
 0x1e6   : > { %v5721_v17 = vadd.f32 %v5668_v23, %v3979_v48 }
 0x1e8   : > { %v3980_v42 = vpop.f32.mrb[112].mxu0 }
 0x1e9   : > { %v3981_v43 = vpop.f32.mrb[113].mxu0 }
 0x1ea   : > { %v3982_v63 = vadd.f32 %v3981_v43, %v3980_v42  ;;  %v3983_v39 = vpop.f32.mrb[114].mxu0 }
 0x1eb   : > { %v3984_v13 = vpop.f32.mrb[115].mxu0 }
 0x1ec   : > { %v3985_v37 = vadd.f32 %v3984_v13, %v3983_v39  ;;  %v5724_v5 = vadd.f32 %v5559_v29, %v3982_v63 }
 0x1ee   : > { %v4166_v8 = vpop.f32.mrb[80].mxu1  ;;  %v5727_v57 = vadd.f32 %v5564_v54, %v3985_v37 }
 0x1ef   : > { %v4215_v1 = vadd.f32 %v4214_v35, %v4166_v8  ;;  %v2613_v40 = vpop.f32.mrb[81].mxu1 }
 0x1f0   : > { %v4219_v23 = vadd.f32 %v5678_v44, %v2613_v40  ;;  %v4167_v55 = vpop.f32.mrb[82].mxu1  ;;  %v3986_v25 = vpop.f32.mrb[116].mxu0 }
 0x1f1   : > { %v4223_v7 = vadd.f32 %v5685_v0, %v4167_v55  ;;  %v2616_v21 = vpop.f32.mrb[83].mxu1  ;;  %v3987_v35 = vpop.f32.mrb[117].mxu0  ;;  %v3068_v27 = vmul.f32 %v4215_v1, %v4215_v1 }
 0x1f2   : > { %v4227_v29 = vadd.f32 %v5681_v14, %v2616_v21  ;;  %v3988_v54 = vadd.f32 %v3987_v35, %v3986_v25  ;;  %v3989_v26 = vpop.f32.mrb[118].mxu0  ;;  %v3066_v60 = vmul.f32 %v4219_v23, %v4219_v23 }
 0x1f3   : > { %v3542_v36 = vpack.c.bf16 %v4223_v7, %v4215_v1  ;;  %v3990_v0 = vpop.f32.mrb[119].mxu0  ;;  %v3069_v49 = vmul.f32 %v4223_v7, %v4223_v7 }
 0x1f4   : > { %v3537_v44 = vpack.c.bf16 %v4227_v29, %v4219_v23  ;;  %v3028_v56 = vadd.f32 %v4227_v29, %v4219_v23  ;;  %v3067_v12 = vmul.f32 %v4227_v29, %v4227_v29  ;;  %v3991_v50 = vadd.f32 %v3990_v0, %v3989_v26 }
 0x1f5   : > { %3629 = vst [vmem:[%s5734_s22 + $0x8] sm:$0xff] %v3542_v36   ;;  %v5739_v6 = vadd.f32 %v5568_v46, %v3988_v54 }
 0x1f6   : > { %3538 = vst [vmem:[%s5734_s22] sm:$0xff] %v3537_v44   ;;  %v3029_v9 = vadd.f32 %v4215_v1, %v3028_v56  ;;  %v3098_v31 = vadd.f32 %v3067_v12, %v3066_v60  ;;  %v4170_v28 = vpop.f32.mrb[84].mxu1  ;;  %v5744_v2 = vadd.f32 %v5572_v41, %v3991_v50 }
 0x1f7   : > { %v4231_v14 = vadd.f32 %v5694_v45, %v4170_v28  ;;  %v2629_v52 = vpop.f32.mrb[85].mxu1 }
 0x1f8   : > { %v3099_v19 = vadd.f32 %v3098_v31, %v3068_v27  ;;  %v4235_v48 = vadd.f32 %v5688_v20, %v2629_v52  ;;  %v3030_v42 = vadd.f32 %v4223_v7, %v3029_v9  ;;  %v4171_v43 = vpop.f32.mrb[86].mxu1  ;;  %v3992_v39 = vpop.f32.mrb[120].mxu0 }
 0x1f9   : > { %v4239_v46 = vadd.f32 %v5697_v22, %v4171_v43  ;;  %v2632_v63 = vpop.f32.mrb[87].mxu1  ;;  %v3993_v1 = vpop.f32.mrb[121].mxu0  ;;  %v3072_v35 = vmul.f32 %v4231_v14, %v4231_v14 }
 0x1fa   : > { %v3031_v13 = vadd.f32 %v4235_v48, %v3030_v42  ;;  %v3070_v37 = vmul.f32 %v4235_v48, %v4235_v48  ;;  %v3100_v8 = vadd.f32 %v3099_v19, %v3069_v49  ;;  %v4243_v45 = vadd.f32 %v5691_v16, %v2632_v63  ;;  %v3995_v23 = vpop.f32.mrb[122].mxu0 }
 0x1fb   : > { %v3552_v41 = vpack.c.bf16 %v4239_v46, %v4231_v14  ;;  %v3994_v40 = vadd.f32 %v3993_v1, %v3992_v39  ;;  %v3996_v25 = vpop.f32.mrb[123].mxu0  ;;  %v3073_v56 = vmul.f32 %v4239_v46, %v4239_v46 }
 0x1fc   : > { %v3101_v55 = vadd.f32 %v3100_v8, %v3070_v37  ;;  %v3547_v21 = vpack.c.bf16 %v4243_v45, %v4235_v48  ;;  %v3032_v20 = vadd.f32 %v4243_v45, %v3031_v13  ;;  %v3071_v7 = vmul.f32 %v4243_v45, %v4243_v45 }
 0x1fd   : > { %3631 = vst [vmem:[%s5734_s22 + $0x18] sm:$0xff] %v3552_v41   ;;  %v3997_v22 = vadd.f32 %v3996_v25, %v3995_v23  ;;  %v5751_v29 = vadd.f32 %v5576_v10, %v3994_v40 }
 0x1fe   : > { %3630 = vst [vmem:[%s5734_s22 + $0x10] sm:$0xff] %v3547_v21   ;;  %v3033_v36 = vadd.f32 %v4231_v14, %v3032_v20  ;;  %v3102_v54 = vadd.f32 %v3101_v55, %v3071_v7  ;;  %v4174_v26 = vpop.f32.mrb[88].mxu1 }
 0x1ff   : > { %v4247_v16 = vadd.f32 %v5706_v58, %v4174_v26  ;;  %v2645_v60 = vpop.f32.mrb[89].mxu1  ;;  %v5756_v44 = vadd.f32 %v5581_v47, %v3997_v22 }
 0x200   : > { %v3103_v12 = vadd.f32 %v3102_v54, %v3072_v35  ;;  %v4251_v0 = vadd.f32 %v5700_v3, %v2645_v60  ;;  %v3034_v50 = vadd.f32 %v4239_v46, %v3033_v36  ;;  %v4175_v27 = vpop.f32.mrb[90].mxu1  ;;  %v3998_v31 = vpop.f32.mrb[124].mxu0 }
 0x201   : > { %v4255_v10 = vadd.f32 %v5709_v32, %v4175_v27  ;;  %v2648_v9 = vpop.f32.mrb[91].mxu1  ;;  %v3999_v49 = vpop.f32.mrb[125].mxu0  ;;  %v3076_v13 = vmul.f32 %v4247_v16, %v4247_v16 }
 0x202   : > { %v3035_v28 = vadd.f32 %v4251_v0, %v3034_v50  ;;  %v3074_v14 = vmul.f32 %v4251_v0, %v4251_v0  ;;  %v3104_v52 = vadd.f32 %v3103_v12, %v3073_v56  ;;  %v4259_v58 = vadd.f32 %v5703_v33, %v2648_v9  ;;  %v4001_v48 = vpop.f32.mrb[126].mxu0 }
 0x203   : > { %v3562_v47 = vpack.c.bf16 %v4255_v10, %v4247_v16  ;;  %v4000_v19 = vadd.f32 %v3999_v49, %v3998_v31  ;;  %v4002_v63 = vpop.f32.mrb[127].mxu0  ;;  %v3077_v40 = vmul.f32 %v4255_v10, %v4255_v10 }
 0x204   : > { %v3105_v42 = vadd.f32 %v3104_v52, %v3074_v14  ;;  %v3557_v43 = vpack.c.bf16 %v4259_v58, %v4251_v0  ;;  %v3036_v3 = vadd.f32 %v4259_v58, %v3035_v28  ;;  %v3075_v46 = vmul.f32 %v4259_v58, %v4259_v58 }
 0x205   : > { %3633 = vst [vmem:[%s5734_s22 + $0x28] sm:$0xff] %v3562_v47   ;;  %v4003_v32 = vadd.f32 %v4002_v63, %v4001_v48  ;;  %v5763_v39 = vadd.f32 %v5586_v51, %v4000_v19 }
 0x206   : > { %3632 = vst [vmem:[%s5734_s22 + $0x20] sm:$0xff] %v3557_v43   ;;  %v3037_v37 = vadd.f32 %v4247_v16, %v3036_v3  ;;  %v3106_v8 = vadd.f32 %v3105_v42, %v3075_v46  ;;  %v4178_v45 = vpop.f32.mrb[92].mxu1 }
 0x207   : > { %v4263_v33 = vadd.f32 %v5718_v18, %v4178_v45  ;;  %v2661_v1 = vpop.f32.mrb[93].mxu1  ;;  %v5768_v41 = vadd.f32 %v5591_v38, %v4003_v32 }
 0x208   : > { %v3107_v23 = vadd.f32 %v3106_v8, %v3076_v13  ;;  %v4267_v55 = vadd.f32 %v5712_v15, %v2661_v1  ;;  %v3038_v21 = vadd.f32 %v4255_v10, %v3037_v37  ;;  %v4179_v20 = vpop.f32.mrb[94].mxu1  ;;  %v4004_v25 = vpop.f32.mrb[128].mxu0 }
 0x209   : > { %v4271_v51 = vadd.f32 %v5721_v17, %v4179_v20  ;;  %v2664_v7 = vpop.f32.mrb[95].mxu1  ;;  %v4005_v54 = vpop.f32.mrb[129].mxu0  ;;  %v3080_v27 = vmul.f32 %v4263_v33, %v4263_v33 }
 0x20a   : > { %v3039_v22 = vadd.f32 %v4267_v55, %v3038_v21  ;;  %v3078_v35 = vmul.f32 %v4267_v55, %v4267_v55  ;;  %v3108_v36 = vadd.f32 %v3107_v23, %v3077_v40  ;;  %v4275_v18 = vadd.f32 %v5714_v53, %v2664_v7  ;;  %v4007_v16 = vpop.f32.mrb[130].mxu0 }
 0x20b   : > { %v3572_v38 = vpack.c.bf16 %v4271_v51, %v4263_v33  ;;  %v4006_v26 = vadd.f32 %v4005_v54, %v4004_v25  ;;  %v4008_v0 = vpop.f32.mrb[131].mxu0  ;;  %v3081_v52 = vmul.f32 %v4271_v51, %v4271_v51 }
 0x20c   : > { %v3109_v60 = vadd.f32 %v3108_v36, %v3078_v35  ;;  %v3567_v56 = vpack.c.bf16 %v4275_v18, %v4267_v55  ;;  %v3040_v15 = vadd.f32 %v4275_v18, %v3039_v22  ;;  %v3079_v12 = vmul.f32 %v4275_v18, %v4275_v18 }
 0x20d   : > { %3635 = vst [vmem:[%s5734_s22 + $0x38] sm:$0xff] %v3572_v38   ;;  %v4009_v17 = vadd.f32 %v4008_v0, %v4007_v16  ;;  %v5775_v50 = vadd.f32 %v5608_v34, %v4006_v26 }
 0x20e   : > { %3634 = vst [vmem:[%s5734_s22 + $0x30] sm:$0xff] %v3567_v56   ;;  %v3041_v10 = vadd.f32 %v4263_v33, %v3040_v15  ;;  %v3110_v9 = vadd.f32 %v3109_v60, %v3079_v12  ;;  %v4182_v31 = vpop.f32.mrb[0].mxu1 }
 0x20f   : > { %v4278_v53 = vadd.f32 %v5739_v6, %v4182_v31  ;;  %v2677_v28 = vpop.f32.mrb[1].mxu1  ;;  %v5780_v14 = vadd.f32 %v5613_v61, %v4009_v17 }
 0x210   : > { %v3111_v58 = vadd.f32 %v3110_v9, %v3080_v27  ;;  %v4281_v49 = vadd.f32 %v5724_v5, %v2677_v28  ;;  %v3042_v47 = vadd.f32 %v4271_v51, %v3041_v10  ;;  %v4183_v19 = vpop.f32.mrb[2].mxu1  ;;  %v4010_v42 = vpop.f32.mrb[132].mxu0 }
 0x211   : > { %v4284_v34 = vadd.f32 %v5744_v2, %v4183_v19  ;;  %v2680_v48 = vpop.f32.mrb[3].mxu1  ;;  %v4011_v63 = vpop.f32.mrb[133].mxu0  ;;  %v3084_v40 = vmul.f32 %v4278_v53, %v4278_v53 }
 0x212   : > { %v3043_v43 = vadd.f32 %v4281_v49, %v3042_v47  ;;  %v3082_v3 = vmul.f32 %v4281_v49, %v4281_v49  ;;  %v3112_v46 = vadd.f32 %v3111_v58, %v3081_v52  ;;  %v4287_v6 = vadd.f32 %v5727_v57, %v2680_v48  ;;  %v4013_v13 = vpop.f32.mrb[134].mxu0 }
 0x213   : > { %v3582_v61 = vpack.c.bf16 %v4284_v34, %v4278_v53  ;;  %v4012_v32 = vadd.f32 %v4011_v63, %v4010_v42  ;;  %v4014_v33 = vpop.f32.mrb[135].mxu0  ;;  %v3085_v7 = vmul.f32 %v4284_v34, %v4284_v34 }
 0x214   : > { %v3113_v37 = vadd.f32 %v3112_v46, %v3082_v3  ;;  %v3577_v8 = vpack.c.bf16 %v4287_v6, %v4281_v49  ;;  %v3044_v5 = vadd.f32 %v4287_v6, %v3043_v43  ;;  %v3083_v45 = vmul.f32 %v4287_v6, %v4287_v6 }
 0x215   : > { %3637 = vst [vmem:[%s5734_s22 + $0x48] sm:$0xff] %v3582_v61   ;;  %v4015_v2 = vadd.f32 %v4014_v33, %v4013_v13  ;;  %v4301_v1 = vadd.f32 %v5630_v11, %v4012_v32 }
 0x216   : > { %3636 = vst [vmem:[%s5734_s22 + $0x40] sm:$0xff] %v3577_v8   ;;  %v3045_v23 = vadd.f32 %v4278_v53, %v3044_v5  ;;  %v3114_v55 = vadd.f32 %v3113_v37, %v3083_v45  ;;  %v4186_v21 = vpop.f32.mrb[4].mxu1 }
 0x217   : > { %v4290_v57 = vadd.f32 %v5763_v39, %v4186_v21  ;;  %v2693_v20 = vpop.f32.mrb[5].mxu1  ;;  %v4307_v51 = vadd.f32 %v5635_v30, %v4015_v2 }
 0x218   : > { %v3115_v25 = vadd.f32 %v3114_v55, %v3084_v40  ;;  %v4293_v22 = vadd.f32 %v5751_v29, %v2693_v20  ;;  %v3046_v35 = vadd.f32 %v4284_v34, %v3045_v23  ;;  %v4187_v36 = vpop.f32.mrb[6].mxu1  ;;  %v4016_v54 = vpop.f32.mrb[136].mxu0 }
 0x219   : > { %v4296_v18 = vadd.f32 %v5768_v41, %v4187_v36  ;;  %v2696_v11 = vpop.f32.mrb[7].mxu1  ;;  %v4017_v60 = vpop.f32.mrb[137].mxu0  ;;  %v3088_v9 = vmul.f32 %v4290_v57, %v4290_v57 }
 0x21a   : > { %v3047_v38 = vadd.f32 %v4293_v22, %v3046_v35  ;;  %v3086_v26 = vmul.f32 %v4293_v22, %v4293_v22  ;;  %v3116_v16 = vadd.f32 %v3115_v25, %v3085_v7  ;;  %v4299_v39 = vadd.f32 %v5756_v44, %v2696_v11  ;;  %v4019_v15 = vpop.f32.mrb[138].mxu0 }
 0x21b   : > { %v3592_v56 = vpack.c.bf16 %v4296_v18, %v4290_v57  ;;  %v4018_v30 = vadd.f32 %v4017_v60, %v4016_v54  ;;  %v4020_v27 = vpop.f32.mrb[139].mxu0  ;;  %v3089_v49 = vmul.f32 %v4296_v18, %v4296_v18 }
 0x21c   : > { %v3117_v12 = vadd.f32 %v3116_v16, %v3086_v26  ;;  %v3587_v0 = vpack.c.bf16 %v4299_v39, %v4293_v22  ;;  %v3048_v29 = vadd.f32 %v4299_v39, %v3047_v38  ;;  %v3087_v17 = vmul.f32 %v4299_v39, %v4299_v39 }
 0x21d   : > { %3639 = vst [vmem:[%s5734_s22 + $0x58] sm:$0xff] %v3592_v56   ;;  %v4021_v41 = vadd.f32 %v4020_v27, %v4019_v15  ;;  %v4316_v10 = vadd.f32 %v5652_v59, %v4018_v30 }
 0x21e   : > { %3638 = vst [vmem:[%s5734_s22 + $0x50] sm:$0xff] %v3587_v0   ;;  %v3049_v31 = vadd.f32 %v4290_v57, %v3048_v29  ;;  %v3118_v53 = vadd.f32 %v3117_v12, %v3087_v17  ;;  %v4190_v28 = vpop.f32.mrb[8].mxu1 }
 0x21f   : > { %v4302_v52 = vadd.f32 %v4301_v1, %v4190_v28  ;;  %v2709_v44 = vpop.f32.mrb[9].mxu1  ;;  %v4322_v58 = vadd.f32 %v5657_v62, %v4021_v41 }
 0x220   : > { %v3119_v47 = vadd.f32 %v3118_v53, %v3088_v9  ;;  %v4305_v19 = vadd.f32 %v5775_v50, %v2709_v44  ;;  %v3050_v34 = vadd.f32 %v4296_v18, %v3049_v31  ;;  %v4191_v48 = vpop.f32.mrb[10].mxu1  ;;  %v4022_v3 = vpop.f32.mrb[140].mxu0 }
 0x221   : > { %v4308_v42 = vadd.f32 %v4307_v51, %v4191_v48  ;;  %v2712_v43 = vpop.f32.mrb[11].mxu1  ;;  %v4023_v61 = vpop.f32.mrb[141].mxu0  ;;  %v3092_v1 = vmul.f32 %v4302_v52, %v4302_v52 }
 0x222   : > { %v3051_v59 = vadd.f32 %v4305_v19, %v3050_v34  ;;  %v3090_v46 = vmul.f32 %v4305_v19, %v4305_v19  ;;  %v3120_v6 = vadd.f32 %v3119_v47, %v3089_v49  ;;  %v4311_v63 = vadd.f32 %v5780_v14, %v2712_v43  ;;  %v4025_v62 = vpop.f32.mrb[142].mxu0 }
 0x223   : > { %v3602_v32 = vpack.c.bf16 %v4308_v42, %v4302_v52  ;;  %v4024_v13 = vadd.f32 %v4023_v61, %v4022_v3  ;;  %v4026_v45 = vpop.f32.mrb[143].mxu0  ;;  %v3093_v20 = vmul.f32 %v4308_v42, %v4308_v42 }
 0x224   : > { %v3121_v37 = vadd.f32 %v3120_v6, %v3090_v46  ;;  %v3597_v8 = vpack.c.bf16 %v4311_v63, %v4305_v19  ;;  %v3052_v5 = vadd.f32 %v4311_v63, %v3051_v59  ;;  %v3091_v50 = vmul.f32 %v4311_v63, %v4311_v63 }
 0x225   : > { %3641 = vst [vmem:[%s5734_s22 + $0x68] sm:$0xff] %v3602_v32   ;;  %v4313_v33 = vadd.f32 %v5672_v24, %v4024_v13  ;;  %v4027_v2 = vadd.f32 %v4026_v45, %v4025_v62 }
 0x226   : > { %3640 = vst [vmem:[%s5734_s22 + $0x60] sm:$0xff] %v3597_v8   ;;  %v3053_v40 = vadd.f32 %v4302_v52, %v3052_v5  ;;  %v3122_v23 = vadd.f32 %v3121_v37, %v3091_v50  ;;  %v4194_v55 = vpop.f32.mrb[12].mxu1 }
 0x227   : > { %v4314_v21 = vadd.f32 %v4313_v33, %v4194_v55  ;;  %v2725_v14 = vpop.f32.mrb[13].mxu1  ;;  %v4319_v57 = vadd.f32 %v5675_v4, %v4027_v2 }
 0x228   : > { %v3123_v51 = vadd.f32 %v3122_v23, %v3092_v1  ;;  %v4317_v7 = vadd.f32 %v4316_v10, %v2725_v14  ;;  %v3054_v25 = vadd.f32 %v4308_v42, %v3053_v40  ;;  %v4195_v22 = vpop.f32.mrb[14].mxu1 }
 0x229   : > { %v4320_v35 = vadd.f32 %v4319_v57, %v4195_v22  ;;  %v2728_v36 = vpop.f32.mrb[15].mxu1  ;;  %v3096_v38 = vmul.f32 %v4314_v21, %v4314_v21 }
 0x22a   : > { %v3055_v24 = vadd.f32 %v4317_v7, %v3054_v25  ;;  %v3094_v18 = vmul.f32 %v4317_v7, %v4317_v7  ;;  %v3124_v11 = vadd.f32 %v3123_v51, %v3093_v20  ;;  %v4323_v54 = vadd.f32 %v4322_v58, %v2728_v36 }
 0x22b   : > { %v3612_v26 = vpack.c.bf16 %v4320_v35, %v4314_v21  ;;  %v3097_v56 = vmul.f32 %v4320_v35, %v4320_v35 }
 0x22c   : > { %v3125_v16 = vadd.f32 %v3124_v11, %v3094_v18  ;;  %v3607_v39 = vpack.c.bf16 %v4323_v54, %v4317_v7  ;;  %v3056_v60 = vadd.f32 %v4323_v54, %v3055_v24  ;;  %v3095_v4 = vmul.f32 %v4323_v54, %v4323_v54 }
 0x22d   : > { %3643 = vst [vmem:[%s5734_s22 + $0x78] sm:$0xff] %v3612_v26  }
 0x22e   : > { %3642 = vst [vmem:[%s5734_s22 + $0x70] sm:$0xff] %v3607_v39   ;;  %v3057_v30 = vadd.f32 %v4314_v21, %v3056_v60  ;;  %v3126_v15 = vadd.f32 %v3125_v16, %v3095_v4 }
 0x230   : > { %v3058_v12 = vadd.f32 %v4320_v35, %v3057_v30  ;;  %v3127_v0 = vadd.f32 %v3126_v15, %v3096_v38 }
 0x232   : > { %v3059_v29 = vrot.slane %v3058_v12, 4  ;;  %v3128_v17 = vadd.f32 %v3127_v0, %v3097_v56 }
 0x234   : > { %v3060_v27 = vadd.f32 %v3059_v29, %v3058_v12  ;;  %v3129_v41 = vrot.slane %v3128_v17, 4 }
 0x236   : > { %v3061_v10 = vrot.slane %v3060_v27, 2  ;;  %v3130_v9 = vadd.f32 %v3129_v41, %v3128_v17 }
 0x238   : > { %v3062_v31 = vadd.f32 %v3061_v10, %v3060_v27  ;;  %v3131_v53 = vrot.slane %v3130_v9, 2 }
 0x23a   : > { %v3063_v28 = vrot.slane %v3062_v31, 1  ;;  %v3132_v52 = vadd.f32 %v3131_v53, %v3130_v9 }
 0x23c   : > { %v3064_v44 = vadd.f32 %v3063_v28, %v3062_v31  ;;  %v3133_v58 = vrot.slane %v3132_v52, 1 }
 0x23e   : > { %3065 = vst [vmem:[%s236_s27] sm:$0x1] %v3064_v44  ;;  %v3134_v49 = vadd.f32 %v3133_v58, %v3132_v52 }
 0x240   : > { %3135 = vst [vmem:[%s236_s27 + $0x1] sm:$0x1] %v3134_v49 }
 0x241 PF: > { %s16_s18 = sadd.s32 1, %s4603_s18  }
 0x242   : > { %p13_p5 = scmp.ge.s32.totalorder %s16_s18, 4  }
 0x244   :  { %15 = sbr.rel (!%p13_p5) target bundleno = 1 (0x1), region = 82 }

</bundles_post_ra>
